<compile_context>
chip_gen: v7x
topology: tpu7x:2x2x1
jax: 0.10.0
libtpu: 0.0.40
codegen_flags: <defaults>
</compile_context>

<pallas_src>
import math
import jax
import jax.numpy as jnp
from jax.experimental import pallas as pl
from jax.experimental.pallas import tpu as pltpu

PAD_VALUE = -999.0
NEG_INF = -1.0e9


# --------------------------------------------------------------------------
# Pallas kernel: one block of TB sequences per grid step.
# --------------------------------------------------------------------------
def ecg_block_kernel(
    x_ref,        # (TB*S, C)   flattened tokens
    sel_ref,      # (C, D)      channel -> lane replication matrix (0/1)
    mask_ref,     # (TB, S, 1)  token mask, 1.0 = valid
    maskt_ref,    # (TB, 1, S)  token mask, transposed
    w_in_ref, b_in_ref,          # (C, D), (1, D)
    w_qkv_ref, b_qkv_ref,        # (D, 3D), (1, 3D)
    w_o_ref, b_o_ref,            # (D, D), (1, D)
    w1_ref, b1_ref,              # (D, dff), (1, dff)
    w2_ref, b2_ref,              # (dff, D), (1, D)
    out_ref,                     # (TB, D)   pooled features
):
    f32 = jnp.float32
    x2 = x_ref[...]                         # (M, C),  M = TB*S
    m = mask_ref[...]                       # (TB, S, 1)
    mt = maskt_ref[...]                     # (TB, 1, S)

    TB, S = m.shape[0], m.shape[1]
    D = w_o_ref.shape[0]
    M = x2.shape[0]

    # ---- value mask (PyTorch: (x != pad).repeat(...)[..., :D]) -----------
    # vm[i, d] = (x[i, d % C] != pad); built with a tiny (M,C)x(C,D) matmul.
    ch_mask = (x2 != PAD_VALUE).astype(f32)                          # (M, C)
    vm = jnp.dot(ch_mask, sel_ref[...], preferred_element_type=f32)  # (M, D)

    # ---- input projection + value masking --------------------------------
    h = jnp.dot(x2, w_in_ref[...], preferred_element_type=f32) + b_in_ref[...]
    src = h * vm

    # valid_counts computed once and reused by both LNs (as in PyTorch)
    valid_counts = jnp.maximum(jnp.sum(vm, axis=-1, keepdims=True), 1.0)
    inv_counts = 1.0 / valid_counts

    def masked_ln(s):
        # fused single-pass moments: exact for a 0/1 mask
        s1 = jnp.sum(s * vm, axis=-1, keepdims=True)
        s2 = jnp.sum(s * s * vm, axis=-1, keepdims=True)
        mean = s1 * inv_counts
        var = jnp.maximum(s2 * inv_counts - mean * mean, 0.0)
        return ((s - mean) * jax.lax.rsqrt(var + 1e-5)) * vm

    # ---- masked pre-"LN" #1 ----------------------------------------------
    src_norm = masked_ln(src)

    # ---- attention bias: -1e9 where BOTH query and key positions are pad --
    pad_q = 1.0 - m                          # (TB, S, 1)
    pad_k = 1.0 - mt                         # (TB, 1, S)
    attn_bias = jnp.where(pad_q * pad_k > 0.5, NEG_INF, 0.0)   # (TB, S, S)

    # ---- single-head self-attention (fused QKV matmul) --------------------
    qkv = jnp.dot(src_norm, w_qkv_ref[...], preferred_element_type=f32)
    qkv = qkv + b_qkv_ref[...]                                   # (M, 3D)
    q = qkv[:, 0:D].reshape(TB, S, D)
    k = qkv[:, D:2 * D].reshape(TB, S, D)
    v = qkv[:, 2 * D:3 * D].reshape(TB, S, D)

    scale = 1.0 / math.sqrt(float(D))        # nhead = 1  ->  head_dim == D
    scores = jnp.einsum('bqd,bkd->bqk', q, k, preferred_element_type=f32)
    scores = scores * scale + attn_bias

    s_max = jnp.max(scores, axis=-1, keepdims=True)
    e = jnp.exp(scores - s_max)
    attn = e / jnp.sum(e, axis=-1, keepdims=True)

    ctx = jnp.einsum('bqk,bkd->bqd', attn, v, preferred_element_type=f32)
    ctx2 = ctx.reshape(M, D)
    attn_out = jnp.dot(ctx2, w_o_ref[...], preferred_element_type=f32) + b_o_ref[...]
    attn_out = jnp.where(jnp.isnan(attn_out), 0.0, attn_out)    # nan_to_num(0)
    attn_out = attn_out * vm
    src = src + attn_out                     # dropout == identity (eval mode)

    # ---- masked pre-"LN" #2 + feed-forward --------------------------------
    src_norm2 = masked_ln(src)
    ff = jnp.dot(src_norm2, w1_ref[...], preferred_element_type=f32) + b1_ref[...]
    ff = jnp.maximum(ff, 0.0)                                   # ReLU
    ff = jnp.dot(ff, w2_ref[...], preferred_element_type=f32) + b2_ref[...]
    src = src + ff                           # dropout == identity (eval mode)

    # ---- masked mean pooling over the sequence ----------------------------
    src3 = (src * vm).reshape(TB, S, D)
    vm3 = vm.reshape(TB, S, D)
    x_sum = jnp.sum(src3, axis=1)                                # (TB, D)
    counts = jnp.maximum(jnp.sum(vm3, axis=1), 1.0)              # (TB, D)
    out_ref[...] = x_sum / counts


# --------------------------------------------------------------------------
# Wrapper
# --------------------------------------------------------------------------
def _choose_batch_block(B, block_b):
    """Pick a batch block size that satisfies the (8,128) sublane rules."""
    if B <= block_b:
        return B, B                                    # single step: block == full
    tb = max(8, (block_b // 8) * 8)                    # multi-step: multiple of 8
    b_pad = ((B + tb - 1) // tb) * tb
    return tb, b_pad


def ecg_transformer_forward(x, mask, params, *, block_b=8):
    """x: (B, S, C) f32, mask: (B, S) bool (True = valid token)."""
    B, S, C = x.shape
    D = params['w_in'].shape[1]
    dff = params['w1'].shape[1]

    TB, B_pad = _choose_batch_block(B, block_b)

    if B_pad != B:
        pad_rows = B_pad - B
        x = jnp.concatenate(
            [x, jnp.full((pad_rows, S, C), PAD_VALUE, x.dtype)], axis=0)
        mask = jnp.concatenate(
            [mask, jnp.zeros((pad_rows, S), dtype=mask.dtype)], axis=0)

    x2 = x.astype(jnp.float32).reshape(B_pad * S, C)       # flatten tokens
    mask_f = mask.astype(jnp.float32)[:, :, None]          # (B_pad, S, 1)
    mask_t = mask.astype(jnp.float32)[:, None, :]          # (B_pad, 1, S)

    # channel -> lane replication matrix: sel[c, d] = 1 iff d % C == c
    sel = (jnp.arange(D)[None, :] % C == jnp.arange(C)[:, None]).astype(jnp.float32)

    # fuse QKV projections into one matmul
    w_qkv = jnp.concatenate([params['w_q'], params['w_k'], params['w_v']], axis=1)
    b_qkv = jnp.concatenate([params['b_q'], params['b_k'], params['b_v']], axis=1)

    row_map = lambda b: (b, 0)
    b3_map = lambda b: (b, 0, 0)
    w_map = lambda b: (0, 0)

    in_specs = [
        pl.BlockSpec((TB * S, C), row_map),       # x (flattened tokens)
        pl.BlockSpec((C, D), w_map),              # sel
        pl.BlockSpec((TB, S, 1), b3_map),         # token mask
        pl.BlockSpec((TB, 1, S), b3_map),         # token mask (transposed)
        pl.BlockSpec((C, D), w_map),              # w_in
        pl.BlockSpec((1, D), w_map),              # b_in
        pl.BlockSpec((D, 3 * D), w_map),          # w_qkv (fused)
        pl.BlockSpec((1, 3 * D), w_map),          # b_qkv (fused)
        pl.BlockSpec((D, D), w_map),              # w_o
        pl.BlockSpec((1, D), w_map),              # b_o
        pl.BlockSpec((D, dff), w_map),            # w1
        pl.BlockSpec((1, dff), w_map),            # b1
        pl.BlockSpec((dff, D), w_map),            # w2
        pl.BlockSpec((1, D), w_map),              # b2
    ]

    pooled = pl.pallas_call(
        ecg_block_kernel,
        out_shape=jax.ShapeDtypeStruct((B_pad, D), jnp.float32),
        grid=(B_pad // TB,),
        in_specs=in_specs,
        out_specs=pl.BlockSpec((TB, D), row_map),
        compiler_params=pltpu.CompilerParams(dimension_semantics=("parallel",)),
    )(x2, sel, mask_f, mask_t,
      params['w_in'], params['b_in'],
      w_qkv, b_qkv,
      params['w_o'], params['b_o'],
      params['w1'], params['b1'], params['w2'], params['b2'])

    # classifier hoisted out of the kernel: one batched (B, D)x(D, NC) matmul
    pooled = pooled[:B]
    return pooled @ params['w_fc'] + params['b_fc']


# --------------------------------------------------------------------------
# Pure-JAX reference (mirrors the PyTorch forward, eval mode)
# --------------------------------------------------------------------------
def ecg_transformer_reference(x, mask, params):
    f32 = jnp.float32
    x = x.astype(f32)
    D = params['w_in'].shape[1]
    reps = D // 3 + 1
    vm = jnp.tile(x != PAD_VALUE, (1, 1, reps))[..., :D].astype(f32)

    src = (x @ params['w_in'] + params['b_in']) * vm

    valid_counts = jnp.maximum(jnp.sum(vm, -1, keepdims=True), 1.0)

    def masked_ln(s):
        mean = jnp.sum(s * vm, -1, keepdims=True) / valid_counts
        var = jnp.sum(((s - mean) * vm) ** 2, -1, keepdims=True) / valid_counts
        return (s - mean) / jnp.sqrt(var + 1e-5) * vm

    src_norm = masked_ln(src)

    pad = (~mask).astype(f32)
    attn_bias = jnp.where(pad[:, :, None] * pad[:, None, :] > 0.5, NEG_INF, 0.0)

    q = src_norm @ params['w_q'] + params['b_q']
    k = src_norm @ params['w_k'] + params['b_k']
    v = src_norm @ params['w_v'] + params['b_v']
    scores = jnp.einsum('bqd,bkd->bqk', q, k) / jnp.sqrt(jnp.float32(D)) + attn_bias
    attn = jax.nn.softmax(scores, axis=-1)
    ctx = jnp.einsum('bqk,bkd->bqd', attn, v)
    attn_out = jnp.nan_to_num(ctx @ params['w_o'] + params['b_o'], nan=0.0) * vm
    src = src + attn_out

    src_norm2 = masked_ln(src)
    ff = jax.nn.relu(src_norm2 @ params['w1'] + params['b1'])
    ff = ff @ params['w2'] + params['b2']
    src = src + ff

    x_sum = jnp.sum(src * vm, axis=1)
    x_mean = x_sum / jnp.maximum(jnp.sum(vm, axis=1), 1.0)
    return x_mean @ params['w_fc'] + params['b_fc']


# --------------------------------------------------------------------------
# Parameter init (torch-Linear-style, weights stored as (in, out))
# --------------------------------------------------------------------------
def init_params(key, input_dim=3, d_model=48, dim_ff=128, num_classes=9):
    def lin(k, fan_in, fan_out):
        kw, kb = jax.random.split(k)
        bound = 1.0 / math.sqrt(fan_in)
        w = jax.random.uniform(kw, (fan_in, fan_out), jnp.float32, -bound, bound)
        b = jax.random.uniform(kb, (1, fan_out), jnp.float32, -bound, bound)
        return w, b

    keys = jax.random.split(key, 8)
    p = {}
    p['w_in'], p['b_in'] = lin(keys[0], input_dim, d_model)
    p['w_q'], p['b_q'] = lin(keys[1], d_model, d_model)    # in_proj q
    p['w_k'], p['b_k'] = lin(keys[2], d_model, d_model)    # in_proj k
    p['w_v'], p['b_v'] = lin(keys[3], d_model, d_model)    # in_proj v
    p['w_o'], p['b_o'] = lin(keys[4], d_model, d_model)    # out_proj
    p['w1'], p['b1'] = lin(keys[5], d_model, dim_ff)       # feedforward[0]
    p['w2'], p['b2'] = lin(keys[6], dim_ff, d_model)       # feedforward[3]
    p['w_fc'], p['b_fc'] = lin(keys[7], d_model, num_classes)
    return p


if __name__ == "__main__":
    B, S, C_IN = 12, 16, 3
    D_MODEL, DIM_FF, NUM_CLASSES = 48, 128, 9

    key = jax.random.PRNGKey(0)
    k_params, k_x, k_len = jax.random.split(key, 3)
    params = init_params(k_params, C_IN, D_MODEL, DIM_FF, NUM_CLASSES)

    x = jax.random.normal(k_x, (B, S, C_IN), jnp.float32)
    # variable-length sequences: mask True = valid token, tail padded
    valid_len = jax.random.randint(k_len, (B,), 3, S + 1)
    mask = jnp.arange(S)[None, :] < valid_len[:, None]          # (B, S) bool
    x = jnp.where(mask[..., None], x, PAD_VALUE)

    pred = ecg_transformer_forward(x, mask, params, block_b=8)
    jax.block_until_ready(pred)

    assert pred.shape == (B, NUM_CLASSES), pred.shape
    assert not bool(jnp.isnan(pred).any())

    ref = ecg_transformer_reference(x, mask, params)
    err = float(jnp.max(jnp.abs(pred - ref)))
    assert err < 2e-3, f"max abs error vs reference: {err}"

    print("KERNEL_OK")
</pallas_src>

<mosaic_0001>
module attributes {stable_mosaic.version = 11 : i64} {
  func.func @ecg_block_kernel(%arg0: i32, %arg1: memref<128x3xf32, #tpu.memory_space<vmem>>, %arg2: memref<3x48xf32, #tpu.memory_space<vmem>>, %arg3: memref<8x16x1xf32, #tpu.memory_space<vmem>>, %arg4: memref<8x1x16xf32, #tpu.memory_space<vmem>>, %arg5: memref<3x48xf32, #tpu.memory_space<vmem>>, %arg6: memref<1x48xf32, #tpu.memory_space<vmem>>, %arg7: memref<48x144xf32, #tpu.memory_space<vmem>>, %arg8: memref<1x144xf32, #tpu.memory_space<vmem>>, %arg9: memref<48x48xf32, #tpu.memory_space<vmem>>, %arg10: memref<1x48xf32, #tpu.memory_space<vmem>>, %arg11: memref<48x128xf32, #tpu.memory_space<vmem>>, %arg12: memref<1x128xf32, #tpu.memory_space<vmem>>, %arg13: memref<128x48xf32, #tpu.memory_space<vmem>>, %arg14: memref<1x48xf32, #tpu.memory_space<vmem>>, %arg15: memref<8x48xf32, #tpu.memory_space<vmem>>) attributes {dimension_semantics = [#tpu.dimension_semantics<parallel>], iteration_bounds = array<i64: 2>, scalar_prefetch = 0 : i64, scratch_operands = 0 : i64, tpu.core_type = #tpu.core_type<tc>, window_params = [{transform_indices = @transform_0, window_bounds = array<i64: 128, 3>}, {pipeline_mode = #tpu.pipeline_mode<synchronous>, transform_indices = @transform_1, window_bounds = array<i64: 3, 48>}, {transform_indices = @transform_2, window_bounds = array<i64: 8, 16, 1>}, {transform_indices = @transform_3, window_bounds = array<i64: 8, 1, 16>}, {pipeline_mode = #tpu.pipeline_mode<synchronous>, transform_indices = @transform_4, window_bounds = array<i64: 3, 48>}, {pipeline_mode = #tpu.pipeline_mode<synchronous>, transform_indices = @transform_5, window_bounds = array<i64: 1, 48>}, {pipeline_mode = #tpu.pipeline_mode<synchronous>, transform_indices = @transform_6, window_bounds = array<i64: 48, 144>}, {pipeline_mode = #tpu.pipeline_mode<synchronous>, transform_indices = @transform_7, window_bounds = array<i64: 1, 144>}, {pipeline_mode = #tpu.pipeline_mode<synchronous>, transform_indices = @transform_8, window_bounds = array<i64: 48, 48>}, {pipeline_mode = #tpu.pipeline_mode<synchronous>, transform_indices = @transform_9, window_bounds = array<i64: 1, 48>}, {pipeline_mode = #tpu.pipeline_mode<synchronous>, transform_indices = @transform_10, window_bounds = array<i64: 48, 128>}, {pipeline_mode = #tpu.pipeline_mode<synchronous>, transform_indices = @transform_11, window_bounds = array<i64: 1, 128>}, {pipeline_mode = #tpu.pipeline_mode<synchronous>, transform_indices = @transform_12, window_bounds = array<i64: 128, 48>}, {pipeline_mode = #tpu.pipeline_mode<synchronous>, transform_indices = @transform_13, window_bounds = array<i64: 1, 48>}, {transform_indices = @transform_14, window_bounds = array<i64: 8, 48>}]} {
    %c0 = arith.constant 0 : index
    %c0_0 = arith.constant 0 : index
    %0 = vector.load %arg1[%c0, %c0_0] : memref<128x3xf32, #tpu.memory_space<vmem>>, vector<128x3xf32>
    %c0_1 = arith.constant 0 : index
    %c0_2 = arith.constant 0 : index
    %c0_3 = arith.constant 0 : index
    %1 = vector.load %arg3[%c0_1, %c0_2, %c0_3] : memref<8x16x1xf32, #tpu.memory_space<vmem>>, vector<8x16x1xf32>
    %c0_4 = arith.constant 0 : index
    %c0_5 = arith.constant 0 : index
    %c0_6 = arith.constant 0 : index
    %2 = vector.load %arg4[%c0_4, %c0_5, %c0_6] : memref<8x1x16xf32, #tpu.memory_space<vmem>>, vector<8x1x16xf32>
    %cst = arith.constant -9.990000e+02 : f32
    %3 = vector.broadcast %cst : f32 to vector<128x3xf32>
    %4 = arith.cmpf one, %0, %3 : vector<128x3xf32>
    %5 = arith.extui %4 : vector<128x3xi1> to vector<128x3xi32>
    %6 = arith.sitofp %5 : vector<128x3xi32> to vector<128x3xf32>
    %c0_7 = arith.constant 0 : index
    %c0_8 = arith.constant 0 : index
    %7 = vector.load %arg2[%c0_7, %c0_8] : memref<3x48xf32, #tpu.memory_space<vmem>>, vector<3x48xf32>
    %cst_9 = arith.constant dense<0.000000e+00> : vector<128x48xf32>
    %8 = tpu.matmul %6, %7, %cst_9 {dimension_numbers = #tpu.dot_dimension_numbers<[1], [0], [0], [1], [0, 0, 1, 1], [], []>} : vector<128x3xf32>, vector<3x48xf32>, vector<128x48xf32> -> vector<128x48xf32>
    %c0_10 = arith.constant 0 : index
    %c0_11 = arith.constant 0 : index
    %9 = vector.load %arg5[%c0_10, %c0_11] : memref<3x48xf32, #tpu.memory_space<vmem>>, vector<3x48xf32>
    %cst_12 = arith.constant dense<0.000000e+00> : vector<128x48xf32>
    %10 = tpu.matmul %0, %9, %cst_12 {dimension_numbers = #tpu.dot_dimension_numbers<[1], [0], [0], [1], [0, 0, 1, 1], [], []>} : vector<128x3xf32>, vector<3x48xf32>, vector<128x48xf32> -> vector<128x48xf32>
    %c0_13 = arith.constant 0 : index
    %c0_14 = arith.constant 0 : index
    %11 = vector.load %arg6[%c0_13, %c0_14] : memref<1x48xf32, #tpu.memory_space<vmem>>, vector<1x48xf32>
    %12 = vector.broadcast %11 : vector<1x48xf32> to vector<128x48xf32>
    %13 = arith.addf %10, %12 : vector<128x48xf32>
    %14 = arith.mulf %13, %8 : vector<128x48xf32>
    %cst_15 = arith.constant dense<0.000000e+00> : vector<128xf32>
    %15 = vector.multi_reduction <add>, %8, %cst_15 [1] : vector<128x48xf32> to vector<128xf32>
    %16 = vector.shape_cast %15 : vector<128xf32> to vector<128x1xf32>
    %cst_16 = arith.constant 1.000000e+00 : f32
    %17 = vector.broadcast %cst_16 : f32 to vector<128x1xf32>
    %18 = arith.maximumf %16, %17 : vector<128x1xf32>
    %cst_17 = arith.constant 1.000000e+00 : f32
    %19 = vector.broadcast %cst_17 : f32 to vector<128x1xf32>
    %20 = arith.divf %19, %18 : vector<128x1xf32>
    %21 = arith.mulf %14, %8 : vector<128x48xf32>
    %cst_18 = arith.constant dense<0.000000e+00> : vector<128xf32>
    %22 = vector.multi_reduction <add>, %21, %cst_18 [1] : vector<128x48xf32> to vector<128xf32>
    %23 = vector.shape_cast %22 : vector<128xf32> to vector<128x1xf32>
    %24 = arith.mulf %14, %14 : vector<128x48xf32>
    %25 = arith.mulf %24, %8 : vector<128x48xf32>
    %cst_19 = arith.constant dense<0.000000e+00> : vector<128xf32>
    %26 = vector.multi_reduction <add>, %25, %cst_19 [1] : vector<128x48xf32> to vector<128xf32>
    %27 = vector.shape_cast %26 : vector<128xf32> to vector<128x1xf32>
    %28 = arith.mulf %23, %20 : vector<128x1xf32>
    %29 = arith.mulf %27, %20 : vector<128x1xf32>
    %30 = arith.mulf %28, %28 : vector<128x1xf32>
    %31 = arith.subf %29, %30 : vector<128x1xf32>
    %cst_20 = arith.constant 0.000000e+00 : f32
    %32 = vector.broadcast %cst_20 : f32 to vector<128x1xf32>
    %33 = arith.maximumf %31, %32 : vector<128x1xf32>
    %34 = vector.broadcast %28 : vector<128x1xf32> to vector<128x48xf32>
    %35 = arith.subf %14, %34 : vector<128x48xf32>
    %cst_21 = arith.constant 9.99999974E-6 : f32
    %36 = vector.broadcast %cst_21 : f32 to vector<128x1xf32>
    %37 = arith.addf %33, %36 : vector<128x1xf32>
    %38 = math.rsqrt %37 : vector<128x1xf32>
    %39 = vector.broadcast %38 : vector<128x1xf32> to vector<128x48xf32>
    %40 = arith.mulf %35, %39 : vector<128x48xf32>
    %41 = arith.mulf %40, %8 : vector<128x48xf32>
    %cst_22 = arith.constant 1.000000e+00 : f32
    %42 = vector.broadcast %cst_22 : f32 to vector<8x16x1xf32>
    %43 = arith.subf %42, %1 : vector<8x16x1xf32>
    %cst_23 = arith.constant 1.000000e+00 : f32
    %44 = vector.broadcast %cst_23 : f32 to vector<8x1x16xf32>
    %45 = arith.subf %44, %2 : vector<8x1x16xf32>
    %46 = vector.broadcast %43 : vector<8x16x1xf32> to vector<8x16x16xf32>
    %47 = vector.broadcast %45 : vector<8x1x16xf32> to vector<8x16x16xf32>
    %48 = arith.mulf %46, %47 : vector<8x16x16xf32>
    %cst_24 = arith.constant 5.000000e-01 : f32
    %49 = vector.broadcast %cst_24 : f32 to vector<8x16x16xf32>
    %50 = arith.cmpf ogt, %48, %49 : vector<8x16x16xf32>
    %cst_25 = arith.constant -1.000000e+09 : f32
    %cst_26 = arith.constant 0.000000e+00 : f32
    %51 = vector.broadcast %cst_25 : f32 to vector<8x16x16xf32>
    %52 = vector.broadcast %cst_26 : f32 to vector<8x16x16xf32>
    %53 = arith.select %50, %51, %52 : vector<8x16x16xi1>, vector<8x16x16xf32>
    %c0_27 = arith.constant 0 : index
    %c0_28 = arith.constant 0 : index
    %54 = vector.load %arg7[%c0_27, %c0_28] : memref<48x144xf32, #tpu.memory_space<vmem>>, vector<48x144xf32>
    %cst_29 = arith.constant dense<0.000000e+00> : vector<128x144xf32>
    %55 = tpu.matmul %41, %54, %cst_29 {dimension_numbers = #tpu.dot_dimension_numbers<[1], [0], [0], [1], [0, 0, 1, 1], [], []>} : vector<128x48xf32>, vector<48x144xf32>, vector<128x144xf32> -> vector<128x144xf32>
    %c0_30 = arith.constant 0 : index
    %c0_31 = arith.constant 0 : index
    %56 = vector.load %arg8[%c0_30, %c0_31] : memref<1x144xf32, #tpu.memory_space<vmem>>, vector<1x144xf32>
    %57 = vector.broadcast %56 : vector<1x144xf32> to vector<128x144xf32>
    %58 = arith.addf %55, %57 : vector<128x144xf32>
    %59 = vector.extract_strided_slice %58 {offsets = [0, 0], sizes = [128, 48], strides = [1, 1]} : vector<128x144xf32> to vector<128x48xf32>
    %60 = vector.shape_cast %59 : vector<128x48xf32> to vector<8x16x48xf32>
    %61 = vector.extract_strided_slice %58 {offsets = [0, 48], sizes = [128, 48], strides = [1, 1]} : vector<128x144xf32> to vector<128x48xf32>
    %62 = vector.shape_cast %61 : vector<128x48xf32> to vector<8x16x48xf32>
    %63 = vector.extract_strided_slice %58 {offsets = [0, 96], sizes = [128, 48], strides = [1, 1]} : vector<128x144xf32> to vector<128x48xf32>
    %64 = vector.shape_cast %63 : vector<128x48xf32> to vector<8x16x48xf32>
    "tpu.trace_start"() <{level = 10 : i32, message = "bqd,bkd->bqk"}> : () -> ()
    %cst_32 = arith.constant dense<0.000000e+00> : vector<8x16x16xf32>
    %65 = tpu.matmul %60, %62, %cst_32 {dimension_numbers = #tpu.dot_dimension_numbers<[2], [2], [1], [1], [0, 0, 0, 1, 1, 1], [0], [0]>} : vector<8x16x48xf32>, vector<8x16x48xf32>, vector<8x16x16xf32> -> vector<8x16x16xf32>
    "tpu.trace_stop"() : () -> ()
    %cst_33 = arith.constant 0.144337565 : f32
    %66 = vector.broadcast %cst_33 : f32 to vector<8x16x16xf32>
    %67 = arith.mulf %65, %66 : vector<8x16x16xf32>
    %68 = arith.addf %67, %53 : vector<8x16x16xf32>
    %cst_34 = arith.constant dense<0xFF800000> : vector<8x16xf32>
    %69 = vector.multi_reduction <maximumf>, %68, %cst_34 [2] : vector<8x16x16xf32> to vector<8x16xf32>
    %70 = vector.shape_cast %69 : vector<8x16xf32> to vector<8x16x1xf32>
    %71 = vector.broadcast %70 : vector<8x16x1xf32> to vector<8x16x16xf32>
    %72 = arith.subf %68, %71 : vector<8x16x16xf32>
    %73 = math.exp %72 : vector<8x16x16xf32>
    %cst_35 = arith.constant dense<0.000000e+00> : vector<8x16xf32>
    %74 = vector.multi_reduction <add>, %73, %cst_35 [2] : vector<8x16x16xf32> to vector<8x16xf32>
    %75 = vector.shape_cast %74 : vector<8x16xf32> to vector<8x16x1xf32>
    %76 = vector.broadcast %75 : vector<8x16x1xf32> to vector<8x16x16xf32>
    %77 = arith.divf %73, %76 : vector<8x16x16xf32>
    "tpu.trace_start"() <{level = 10 : i32, message = "bqk,bkd->bqd"}> : () -> ()
    %cst_36 = arith.constant dense<0.000000e+00> : vector<8x16x48xf32>
    %78 = tpu.matmul %77, %64, %cst_36 {dimension_numbers = #tpu.dot_dimension_numbers<[2], [1], [1], [2], [0, 0, 0, 1, 1, 2], [0], [0]>} : vector<8x16x16xf32>, vector<8x16x48xf32>, vector<8x16x48xf32> -> vector<8x16x48xf32>
    "tpu.trace_stop"() : () -> ()
    %79 = vector.shape_cast %78 : vector<8x16x48xf32> to vector<128x48xf32>
    %c0_37 = arith.constant 0 : index
    %c0_38 = arith.constant 0 : index
    %80 = vector.load %arg9[%c0_37, %c0_38] : memref<48x48xf32, #tpu.memory_space<vmem>>, vector<48x48xf32>
    %cst_39 = arith.constant dense<0.000000e+00> : vector<128x48xf32>
    %81 = tpu.matmul %79, %80, %cst_39 {dimension_numbers = #tpu.dot_dimension_numbers<[1], [0], [0], [1], [0, 0, 1, 1], [], []>} : vector<128x48xf32>, vector<48x48xf32>, vector<128x48xf32> -> vector<128x48xf32>
    %c0_40 = arith.constant 0 : index
    %c0_41 = arith.constant 0 : index
    %82 = vector.load %arg10[%c0_40, %c0_41] : memref<1x48xf32, #tpu.memory_space<vmem>>, vector<1x48xf32>
    %83 = vector.broadcast %82 : vector<1x48xf32> to vector<128x48xf32>
    %84 = arith.addf %81, %83 : vector<128x48xf32>
    %85 = arith.cmpf one, %84, %84 : vector<128x48xf32>
    %cst_42 = arith.constant 0.000000e+00 : f32
    %86 = vector.broadcast %cst_42 : f32 to vector<128x48xf32>
    %87 = arith.select %85, %86, %84 : vector<128x48xi1>, vector<128x48xf32>
    %88 = arith.mulf %87, %8 : vector<128x48xf32>
    %89 = arith.addf %14, %88 : vector<128x48xf32>
    %90 = arith.mulf %89, %8 : vector<128x48xf32>
    %cst_43 = arith.constant dense<0.000000e+00> : vector<128xf32>
    %91 = vector.multi_reduction <add>, %90, %cst_43 [1] : vector<128x48xf32> to vector<128xf32>
    %92 = vector.shape_cast %91 : vector<128xf32> to vector<128x1xf32>
    %93 = arith.mulf %89, %89 : vector<128x48xf32>
    %94 = arith.mulf %93, %8 : vector<128x48xf32>
    %cst_44 = arith.constant dense<0.000000e+00> : vector<128xf32>
    %95 = vector.multi_reduction <add>, %94, %cst_44 [1] : vector<128x48xf32> to vector<128xf32>
    %96 = vector.shape_cast %95 : vector<128xf32> to vector<128x1xf32>
    %97 = arith.mulf %92, %20 : vector<128x1xf32>
    %98 = arith.mulf %96, %20 : vector<128x1xf32>
    %99 = arith.mulf %97, %97 : vector<128x1xf32>
    %100 = arith.subf %98, %99 : vector<128x1xf32>
    %cst_45 = arith.constant 0.000000e+00 : f32
    %101 = vector.broadcast %cst_45 : f32 to vector<128x1xf32>
    %102 = arith.maximumf %100, %101 : vector<128x1xf32>
    %103 = vector.broadcast %97 : vector<128x1xf32> to vector<128x48xf32>
    %104 = arith.subf %89, %103 : vector<128x48xf32>
    %cst_46 = arith.constant 9.99999974E-6 : f32
    %105 = vector.broadcast %cst_46 : f32 to vector<128x1xf32>
    %106 = arith.addf %102, %105 : vector<128x1xf32>
    %107 = math.rsqrt %106 : vector<128x1xf32>
    %108 = vector.broadcast %107 : vector<128x1xf32> to vector<128x48xf32>
    %109 = arith.mulf %104, %108 : vector<128x48xf32>
    %110 = arith.mulf %109, %8 : vector<128x48xf32>
    %c0_47 = arith.constant 0 : index
    %c0_48 = arith.constant 0 : index
    %111 = vector.load %arg11[%c0_47, %c0_48] : memref<48x128xf32, #tpu.memory_space<vmem>>, vector<48x128xf32>
    %cst_49 = arith.constant dense<0.000000e+00> : vector<128x128xf32>
    %112 = tpu.matmul %110, %111, %cst_49 {dimension_numbers = #tpu.dot_dimension_numbers<[1], [0], [0], [1], [0, 0, 1, 1], [], []>} : vector<128x48xf32>, vector<48x128xf32>, vector<128x128xf32> -> vector<128x128xf32>
    %c0_50 = arith.constant 0 : index
    %c0_51 = arith.constant 0 : index
    %113 = vector.load %arg12[%c0_50, %c0_51] : memref<1x128xf32, #tpu.memory_space<vmem>>, vector<1x128xf32>
    %114 = vector.broadcast %113 : vector<1x128xf32> to vector<128x128xf32>
    %115 = arith.addf %112, %114 : vector<128x128xf32>
    %cst_52 = arith.constant 0.000000e+00 : f32
    %116 = vector.broadcast %cst_52 : f32 to vector<128x128xf32>
    %117 = arith.maximumf %115, %116 : vector<128x128xf32>
    %c0_53 = arith.constant 0 : index
    %c0_54 = arith.constant 0 : index
    %118 = vector.load %arg13[%c0_53, %c0_54] : memref<128x48xf32, #tpu.memory_space<vmem>>, vector<128x48xf32>
    %cst_55 = arith.constant dense<0.000000e+00> : vector<128x48xf32>
    %119 = tpu.matmul %117, %118, %cst_55 {dimension_numbers = #tpu.dot_dimension_numbers<[1], [0], [0], [1], [0, 0, 1, 1], [], []>} : vector<128x128xf32>, vector<128x48xf32>, vector<128x48xf32> -> vector<128x48xf32>
    %c0_56 = arith.constant 0 : index
    %c0_57 = arith.constant 0 : index
    %120 = vector.load %arg14[%c0_56, %c0_57] : memref<1x48xf32, #tpu.memory_space<vmem>>, vector<1x48xf32>
    %121 = vector.broadcast %120 : vector<1x48xf32> to vector<128x48xf32>
    %122 = arith.addf %119, %121 : vector<128x48xf32>
    %123 = arith.addf %89, %122 : vector<128x48xf32>
    %124 = arith.mulf %123, %8 : vector<128x48xf32>
    %125 = vector.shape_cast %124 : vector<128x48xf32> to vector<8x16x48xf32>
    %126 = vector.shape_cast %8 : vector<128x48xf32> to vector<8x16x48xf32>
    %cst_58 = arith.constant dense<0.000000e+00> : vector<8x48xf32>
    %127 = vector.multi_reduction <add>, %125, %cst_58 [1] : vector<8x16x48xf32> to vector<8x48xf32>
    %cst_59 = arith.constant dense<0.000000e+00> : vector<8x48xf32>
    %128 = vector.multi_reduction <add>, %126, %cst_59 [1] : vector<8x16x48xf32> to vector<8x48xf32>
    %cst_60 = arith.constant 1.000000e+00 : f32
    %129 = vector.broadcast %cst_60 : f32 to vector<8x48xf32>
    %130 = arith.maximumf %128, %129 : vector<8x48xf32>
    %131 = arith.divf %127, %130 : vector<8x48xf32>
    %c0_61 = arith.constant 0 : index
    %c0_62 = arith.constant 0 : index
    %132 = vector.load %arg15[%c0_61, %c0_62] : memref<8x48xf32, #tpu.memory_space<vmem>>, vector<8x48xf32>
    tpu.vector_store %arg15[%c0_61, %c0_62], %131 {strides = array<i32>} : memref<8x48xf32, #tpu.memory_space<vmem>>, vector<8x48xf32>,
    return
  }
  func.func @transform_0(%arg0: i32) -> (i32, i32) {
    %c0_i32 = arith.constant 0 : i32
    %c0_i32_0 = arith.constant 0 : i32
    return %arg0, %c0_i32 : i32, i32
  }
  func.func @transform_1(%arg0: i32) -> (i32, i32) {
    %c0_i32 = arith.constant 0 : i32
    %c0_i32_0 = arith.constant 0 : i32
    %c0_i32_1 = arith.constant 0 : i32
    return %c0_i32, %c0_i32_0 : i32, i32
  }
  func.func @transform_2(%arg0: i32) -> (i32, i32, i32) {
    %c0_i32 = arith.constant 0 : i32
    %c0_i32_0 = arith.constant 0 : i32
    %c0_i32_1 = arith.constant 0 : i32
    return %arg0, %c0_i32, %c0_i32_0 : i32, i32, i32
  }
  func.func @transform_3(%arg0: i32) -> (i32, i32, i32) {
    %c0_i32 = arith.constant 0 : i32
    %c0_i32_0 = arith.constant 0 : i32
    %c0_i32_1 = arith.constant 0 : i32
    return %arg0, %c0_i32, %c0_i32_0 : i32, i32, i32
  }
  func.func @transform_4(%arg0: i32) -> (i32, i32) {
    %c0_i32 = arith.constant 0 : i32
    %c0_i32_0 = arith.constant 0 : i32
    %c0_i32_1 = arith.constant 0 : i32
    return %c0_i32, %c0_i32_0 : i32, i32
  }
  func.func @transform_5(%arg0: i32) -> (i32, i32) {
    %c0_i32 = arith.constant 0 : i32
    %c0_i32_0 = arith.constant 0 : i32
    %c0_i32_1 = arith.constant 0 : i32
    return %c0_i32, %c0_i32_0 : i32, i32
  }
  func.func @transform_6(%arg0: i32) -> (i32, i32) {
    %c0_i32 = arith.constant 0 : i32
    %c0_i32_0 = arith.constant 0 : i32
    %c0_i32_1 = arith.constant 0 : i32
    return %c0_i32, %c0_i32_0 : i32, i32
  }
  func.func @transform_7(%arg0: i32) -> (i32, i32) {
    %c0_i32 = arith.constant 0 : i32
    %c0_i32_0 = arith.constant 0 : i32
    %c0_i32_1 = arith.constant 0 : i32
    return %c0_i32, %c0_i32_0 : i32, i32
  }
  func.func @transform_8(%arg0: i32) -> (i32, i32) {
    %c0_i32 = arith.constant 0 : i32
    %c0_i32_0 = arith.constant 0 : i32
    %c0_i32_1 = arith.constant 0 : i32
    return %c0_i32, %c0_i32_0 : i32, i32
  }
  func.func @transform_9(%arg0: i32) -> (i32, i32) {
    %c0_i32 = arith.constant 0 : i32
    %c0_i32_0 = arith.constant 0 : i32
    %c0_i32_1 = arith.constant 0 : i32
    return %c0_i32, %c0_i32_0 : i32, i32
  }
  func.func @transform_10(%arg0: i32) -> (i32, i32) {
    %c0_i32 = arith.constant 0 : i32
    %c0_i32_0 = arith.constant 0 : i32
    %c0_i32_1 = arith.constant 0 : i32
    return %c0_i32, %c0_i32_0 : i32, i32
  }
  func.func @transform_11(%arg0: i32) -> (i32, i32) {
    %c0_i32 = arith.constant 0 : i32
    %c0_i32_0 = arith.constant 0 : i32
    %c0_i32_1 = arith.constant 0 : i32
    return %c0_i32, %c0_i32_0 : i32, i32
  }
  func.func @transform_12(%arg0: i32) -> (i32, i32) {
    %c0_i32 = arith.constant 0 : i32
    %c0_i32_0 = arith.constant 0 : i32
    %c0_i32_1 = arith.constant 0 : i32
    return %c0_i32, %c0_i32_0 : i32, i32
  }
  func.func @transform_13(%arg0: i32) -> (i32, i32) {
    %c0_i32 = arith.constant 0 : i32
    %c0_i32_0 = arith.constant 0 : i32
    %c0_i32_1 = arith.constant 0 : i32
    return %c0_i32, %c0_i32_0 : i32, i32
  }
  func.func @transform_14(%arg0: i32) -> (i32, i32) {
    %c0_i32 = arith.constant 0 : i32
    %c0_i32_0 = arith.constant 0 : i32
    return %arg0, %c0_i32 : i32, i32
  }
}

</mosaic_0001>

<bundles_post_ra>
// kernel: tpu_custom_call.1
= control target key start
LH: loop header
LB: loop body
LE: loop exit
PB: predicated region body
PF: predicated region fallthrough
CT: control target
= control target key end

     0   :  { %s7905_s0 = inlined_call_operand.vmem [shape: f32[256,3], index: 0, kind: input, shape index: {}]   ;;  %s7906_s1 = inlined_call_operand.vmem [shape: f32[3,48], index: 1, kind: input, shape index: {}]   ;;  %s7907_s2 = inlined_call_operand.vmem [shape: f32[16,16,1], index: 2, kind: input, shape index: {}]   ;;  %s7908_s3 = inlined_call_operand.vmem [shape: f32[16,1,16], index: 3, kind: input, shape index: {}]   ;;  %s7909_s4 = inlined_call_operand.vmem [shape: f32[3,48], index: 4, kind: input, shape index: {}]   ;;  %s7910_s5 = inlined_call_operand.vmem [shape: f32[1,48], index: 5, kind: input, shape index: {}]   ;;  %s7911_s6 = inlined_call_operand.vmem [shape: f32[48,144], index: 6, kind: input, shape index: {}]   ;;  %s7912_s7 = inlined_call_operand.vmem [shape: f32[1,144], index: 7, kind: input, shape index: {}]   ;;  %s7913_s8 = inlined_call_operand.vmem [shape: f32[48,48], index: 8, kind: input, shape index: {}]   ;;  %s7914_s9 = inlined_call_operand.vmem [shape: f32[1,48], index: 9, kind: input, shape index: {}]   ;;  %s7915_s10 = inlined_call_operand.vmem [shape: f32[48,128], index: 10, kind: input, shape index: {}]   ;;  %s7916_s11 = inlined_call_operand.vmem [shape: f32[1,128], index: 11, kind: input, shape index: {}]   ;;  %s7917_s12 = inlined_call_operand.vmem [shape: f32[128,48], index: 12, kind: input, shape index: {}]   ;;  %s7918_s13 = inlined_call_operand.vmem [shape: f32[1,48], index: 13, kind: input, shape index: {}]   ;;  %s7919_s14 = inlined_call_operand.hbm [shape: f32[16,48], index: 14, kind: output, shape index: {}]  }
   0x1   :  { %7988 = sst [smem:[#allocation47_spill]] %s7905_s0 }
   0x2   :  { %7989 = sst [smem:[#allocation48_spill]] %s7906_s1 }
   0x3   :  { %7990 = sst [smem:[#allocation49_spill]] %s7909_s4 }
   0x4   :  { %7991 = sst [smem:[#allocation50_spill]] %s7910_s5 }
   0x5   :  { %19 = vsyncpa [#allocation3], 0 }
   0x6   :  { %21 = vsyncpa [#allocation3 + $0x1], 0  ;;  %s6068_s29 = smov 0   ;;  %s6070_s30 = smov 0  }
   0x7   :  { %s6072_s15 = smov 0   ;;  %s6074_s16 = smov 0  }
   0x8 LB: > { %s6089_s17 = sadd.s32 4294967295, %s5986_s16   ;;  %s4801_s18 = sadd.s32 4294967294, %s5986_s16   ;;  %s5986_s16 = sphi %s6074_s16, %s8089_s16   ;;  %s5982_s15 = sphi %s6072_s15, %s8088_s15   ;;  %s5978_s30 = sphi %s6070_s30, %s8087_s30   ;;  %s5974_s29 = sphi %s6068_s29, %s8086_s29  }
   0x9   : > { %s6093_s19 = sadd.s32 1, %s5986_s16   ;;  %s343_s20 = sadd.s32 1, %s5982_s15 }
   0xa   : > { %s340_s21 = ssub.s32 %s5986_s16, %s6093_s19  ;;  %p353_p0 = scmp.ne.s32.totalorder %s5982_s15, %s5978_s30 }
   0xb   : > { %p341_p1 = scmp.eq.s32.totalorder %s340_s21, 0  ;;  %p354_p2 = scmp.eq.s32.totalorder %s6089_s17, 1 }
   0xc   : > { %p359_p3 = scmp.ne.s32.totalorder %s5978_s30, %s5974_s29  ;;  %p360_p4 = scmp.eq.s32.totalorder %s4801_s18, 1 }
   0xd   : > { %s6104_s22 = scalar_select %p341_p1, %s5982_s15, %s343_s20  }
   0xe   : > { %p6106_p5 = por %p354_p2, %p353_p0  ;;  %p6110_p6 = por %p360_p4, %p359_p3 }
   0xf   : > { %p4804_p7 = scmp.ge.s32.totalorder %s5986_s16, 1  ;;  %p438_p8 = scmp.lt.s32.totalorder %s5986_s16, 3 }
  0x11   : > { %p439_p9 = pnand %p4804_p7, %p438_p8 }
  0x13   : > { %442 = sbr.rel (%p439_p9) target bundleno = 2475 (0x9ab), region = 76 }
  0x1a   : > { %s7994_s1 = sld [smem:[#allocation48_spill]]  ;;  %vm650_vm0 = vcmask 1042432   ;;  %s4806_s27 = sshll.u32 %s6089_s17, 4  ;;  %vm601_vm1 = vcmask 23552   ;;  %v7920_v7 = vmov 0.0  }
  0x1b   : > { %p495_p10 = scmp.lt.s32.totalorder %s4806_s27, 31  ;;  %s7995_s4 = sld [smem:[#allocation49_spill]] }
  0x1c   : > { %s7996_s0 = sld [smem:[#allocation47_spill]]  ;;  %s7998_s5 = sld [smem:[#allocation50_spill]] }
  0x1d   : > { %s8091_s27 = smov (!%p495_p10, %s4806_s27), 31  ;;  %s5991_s28 = smov 32  }
  0x1e   : > { %s4807_s20 = sshll.u32 %s8091_s27, 3 }
  0x20   : > { %v600_v0 = vld [vmem:[%s7994_s1] sm:$0x7] }
  0x21   : > { %5141 = vmatprep.subr.msk.mxu0 %vm650_vm0, %v600_v0  ;;  %v799_v1 = vld [vmem:[%s7995_s4] sm:$0x7] }
  0x22   : > { %5142 = vmatpush3.msk.msra.mxu0 %vm650_vm0, %v600_v0  ;;  %5581 = vmatprep.subr.msk.mxu1 %vm650_vm0, %v799_v1  ;;  %s6131_s26 = scalar_lea.vmem %s7996_s0, %s4807_s20  ;;  %v6244_v48 = vld [vmem:[%s7998_s5] ss:$0 sm:$0xff]  ;;  %s5990_s5 = smov 80  }
  0x23   : > { %5582 = vmatpush3.msk.msra.mxu1 %vm650_vm0, %v799_v1  ;;  %5167 = vmatprep.subr.msk.mxu0 %vm650_vm0, %v799_v1  ;;  %v6134_v2 = vld [vmem:[%s6131_s26] sm:$0xff]  ;;  %v6137_v3 = vld [vmem:[%s6131_s26 + $0x8] sm:$0xff]  ;;  %v6140_v4 = vld [vmem:[%s6131_s26 + $0x10] sm:$0xff]  ;;  %s4808_s20 = sshll.u32 %s6089_s17, 3  ;;  %s4963_s0 = sshll.u32 %s6089_s17, 7 }
  0x24   : > { %vm552_vm2 = vcmp.ne.f32.partialorder %v6134_v2, -999.0  ;;  %vm553_vm3 = vcmp.ne.f32.partialorder %v6137_v3, -999.0  ;;  %vm554_vm4 = vcmp.ne.f32.partialorder %v6140_v4, -999.0  ;;  %v6146_v5 = vld [vmem:[%s6131_s26 + $0x18] sm:$0xff]  ;;  %v6149_v6 = vld [vmem:[%s6131_s26 + $0x20] sm:$0xff]  ;;  %v518_v11 = vld [vmem:[%s6131_s26 + $0x30] sm:$0xff] }
  0x25   : > { %v4812_v8 = vsel %vm552_vm2, 1.0, %v7920_v7  ;;  %v4813_v9 = vsel %vm553_vm3, 1.0, %v7920_v7  ;;  %v4814_v10 = vsel %vm554_vm4, 1.0, %v7920_v7  ;;  %vm555_vm5 = vcmp.ne.f32.partialorder %v6146_v5, -999.0  ;;  %v519_v12 = vld [vmem:[%s6131_s26 + $0x38] sm:$0xff]  ;;  %v6160_v13 = vld [vmem:[%s6131_s26 + $0x28] sm:$0xff]  ;;  %5178 = vmatprep.mubr.msk.f32.mxu1 %vm601_vm1, %v518_v11 }
  0x26   : > { %5143 = vmatprep.mubr.msk.f32.mxu0 %vm601_vm1, %v4812_v8  ;;  %vm556_vm6 = vcmp.ne.f32.partialorder %v6149_v6, -999.0  ;;  %v520_v14 = vld [vmem:[%s6131_s26 + $0x40] sm:$0xff]  ;;  %5179 = vmatmul.mubr.msk.f32.vlgmr.msra.gmra.mrb[0].mxu1 %vm601_vm1, %v519_v12  ;;  %v4815_v15 = vsel %vm555_vm5, 1.0, %v7920_v7  ;;  %v521_v16 = vld [vmem:[%s6131_s26 + $0x48] sm:$0xff]  ;;  %vm557_vm7 = vcmp.ne.f32.partialorder %v6160_v13, -999.0  ;;  %v522_v18 = vld [vmem:[%s6131_s26 + $0x50] sm:$0xff] }
  0x27   : > { %5144 = vmatmul.mubr.msk.f32.vlgmr.msra.gmra.mrb[0].mxu0 %vm601_vm1, %v4813_v9  ;;  %v4816_v17 = vsel %vm556_vm6, 1.0, %v7920_v7  ;;  %5181 = vmatprep.mubr.msk.f32.mxu1 %vm601_vm1, %v520_v14  ;;  %vm558_vm8 = vcmp.ne.f32.partialorder %v518_v11, -999.0  ;;  %v4817_v19 = vsel %vm557_vm7, 1.0, %v7920_v7  ;;  %v523_v20 = vld [vmem:[%s6131_s26 + $0x58] sm:$0xff]  ;;  %vm559_vm9 = vcmp.ne.f32.partialorder %v519_v12, -999.0  ;;  %v524_v22 = vld [vmem:[%s6131_s26 + $0x60] sm:$0xff] }
  0x28   : > { %5146 = vmatprep.mubr.msk.f32.mxu0 %vm601_vm1, %v4814_v10  ;;  %5168 = vmatpush3.msk.msra.mxu0 %vm650_vm0, %v799_v1  ;;  %v4818_v21 = vsel %vm558_vm8, 1.0, %v7920_v7  ;;  %vm560_vm10 = vcmp.ne.f32.partialorder %v520_v14, -999.0  ;;  %v4819_v23 = vsel %vm559_vm9, 1.0, %v7920_v7  ;;  %v525_v24 = vld [vmem:[%s6131_s26 + $0x68] sm:$0xff]  ;;  %vm561_vm11 = vcmp.ne.f32.partialorder %v521_v16, -999.0  ;;  %v526_v26 = vld [vmem:[%s6131_s26 + $0x70] sm:$0xff] }
  0x29   : > { %v4820_v25 = vsel %vm560_vm10, 1.0, %v7920_v7  ;;  %vm562_vm12 = vcmp.ne.f32.partialorder %v522_v18, -999.0  ;;  %v4821_v27 = vsel %vm561_vm11, 1.0, %v7920_v7  ;;  %v527_v28 = vld [vmem:[%s6131_s26 + $0x78] sm:$0xff]  ;;  %vm563_vm13 = vcmp.ne.f32.partialorder %v523_v20, -999.0  ;;  %p501_p11 = scmp.lt.s32.totalorder %s4808_s20, 15 }
  0x2a   : > { %5182 = vmatmul.mubr.msk.f32.gmra.mrb[2].mxu1 %vm601_vm1, %v521_v16  ;;  %v4822_v29 = vsel %vm562_vm12, 1.0, %v7920_v7  ;;  %vm564_vm14 = vcmp.ne.f32.partialorder %v524_v22, -999.0  ;;  %v4823_v30 = vsel %vm563_vm13, 1.0, %v7920_v7  ;;  %vm565_vm15 = vcmp.ne.f32.partialorder %v525_v24, -999.0  ;;  %s5992_s26 = smov [#allocation2]  }
  0x2b   : > { %5147 = vmatmul.mubr.msk.f32.gmra.mrb[2].mxu0 %vm601_vm1, %v4815_v15  ;;  %5184 = vmatprep.mubr.msk.f32.mxu1 %vm601_vm1, %v522_v18  ;;  %v4824_v31 = vsel %vm564_vm14, 1.0, %v7920_v7  ;;  %vm566_vm0 = vcmp.ne.f32.partialorder %v526_v26, -999.0  ;;  %v4825_v32 = vsel %vm565_vm15, 1.0, %v7920_v7  ;;  %vm567_vm2 = vcmp.ne.f32.partialorder %v527_v28, -999.0  ;;  %s8093_s20 = smov (!%p501_p11, %s4808_s20), 15 }
  0x2c   : > { %5149 = vmatprep.mubr.msk.f32.mxu0 %vm601_vm1, %v4816_v17  ;;  %v4826_v33 = vsel %vm566_vm0, 1.0, %v7920_v7  ;;  %v4827_v34 = vsel %vm567_vm2, 1.0, %v7920_v7  ;;  %vm1019_vm3 = vcmask 392192   ;;  %s4966_s21 = sshll.u32 %s8093_s20, 4  ;;  %vm2784_vm4 = vcmask 261120   ;;  %s7076_s1 = scalar_lea.vmem %s7908_s3, %s8093_s20 }
  0x2d   : > { %s6861_s27 = scalar_lea.vmem %s7907_s2, %s4966_s21  ;;  %vm2597_vm7 = vcmask 130048   ;;  %s7862_s21 = scalar_lea.hbm %s7919_s14, %s4963_s0 }
  0x2e   : > { %5185 = vmatmul.mubr.msk.f32.gmra.mrb[4].mxu1 %vm601_vm1, %v523_v20 }
  0x2f   : > { %5150 = vmatmul.mubr.msk.f32.gmra.mrb[4].mxu0 %vm601_vm1, %v4817_v19  ;;  %5187 = vmatprep.mubr.msk.f32.mxu1 %vm601_vm1, %v524_v22 }
  0x30   : > { %5152 = vmatprep.mubr.msk.f32.mxu0 %vm601_vm1, %v4818_v21 }
  0x32   : > { %5188 = vmatmul.mubr.msk.f32.gmra.mrb[6].mxu1 %vm601_vm1, %v525_v24 }
  0x33   : > { %5153 = vmatmul.mubr.msk.f32.gmra.mrb[6].mxu0 %vm601_vm1, %v4819_v23  ;;  %5190 = vmatprep.mubr.msk.f32.mxu1 %vm601_vm1, %v526_v26 }
  0x34   : > { %5155 = vmatprep.mubr.msk.f32.mxu0 %vm601_vm1, %v4820_v25 }
  0x36   : > { %5191 = vmatmul.mubr.msk.f32.gmra.mrb[8].mxu1 %vm601_vm1, %v527_v28 }
  0x37   : > { %5156 = vmatmul.mubr.msk.f32.gmra.mrb[8].mxu0 %vm601_vm1, %v4821_v27 }
  0x38   : > { %5158 = vmatprep.mubr.msk.f32.mxu0 %vm601_vm1, %v4822_v29 }
  0x3b   : > { %5159 = vmatmul.mubr.msk.f32.gmra.mrb[10].mxu0 %vm601_vm1, %v4823_v30 }
  0x3c   : > { %5161 = vmatprep.mubr.msk.f32.mxu0 %vm601_vm1, %v4824_v31 }
  0x3f   : > { %5162 = vmatmul.mubr.msk.f32.gmra.mrb[12].mxu0 %vm601_vm1, %v4825_v32 }
  0x40   : > { %5164 = vmatprep.mubr.msk.f32.mxu0 %vm601_vm1, %v4826_v33 }
  0x43   : > { %5165 = vmatmul.mubr.msk.f32.gmra.mrb[14].mxu0 %vm601_vm1, %v4827_v34 }
  0x44   : > { %5169 = vmatprep.mubr.msk.f32.mxu0 %vm601_vm1, %v6134_v2 }
  0x47   : > { %5170 = vmatmul.mubr.msk.f32.vlgmr.msra.gmra.mrb[16].mxu0 %vm601_vm1, %v6137_v3 }
  0x48   : > { %5172 = vmatprep.mubr.msk.f32.mxu0 %vm601_vm1, %v6140_v4 }
  0x4b   : > { %5173 = vmatmul.mubr.msk.f32.gmra.mrb[18].mxu0 %vm601_vm1, %v6146_v5 }
  0x4c   : > { %5175 = vmatprep.mubr.msk.f32.mxu0 %vm601_vm1, %v6149_v6 }
  0x4f   : > { %5176 = vmatmul.mubr.msk.f32.gmra.mrb[20].mxu0 %vm601_vm1, %v6160_v13  ;;  %vm6956_vm1 = vmpackc.low %vm1019_vm3, %vm1019_vm3 }
  0x50   : > { %1756 = vmatprep.mubr.f32.mxu0 %v7920_v7 }
  0xf9   : > { %v5180_v36 = vpop.f32.mrb[0].mxu1 }
  0xfa   : > { %v6223_v35 = vpop.f32.mrb[0].mxu0  ;;  %v954_v39 = vpop.f32.mrb[1].mxu1  ;;  %v960_v58 = vadd.f32 %v5180_v36, %v6244_v48 }
  0xfb   : > { %v6225_v37 = vpop.f32.mrb[1].mxu0  ;;  %v1023_v38 = vsel %vm1019_vm3, %v6223_v35, 0.0  ;;  %v955_v55 = vadd.f32 %v6244_v48, %v954_v39 }
  0xfc   : > { %1024 = vadd.xlane.f32.xlu0 %v1023_v38  ;;  %v1020_v40 = vsel %vm1019_vm3, %v6225_v37, 0.0 }
  0xfd   : > { %v6231_v41 = vadd.f32 %v1023_v38, %v1020_v40  ;;  %v5183_v43 = vpop.f32.mrb[2].mxu1 }
  0xfe   : > { %v6233_v42 = vpop.f32.mrb[2].mxu0  ;;  %v964_v46 = vpop.f32.mrb[3].mxu1  ;;  %v970_v20 = vadd.f32 %v5183_v43, %v6244_v48 }
  0xff   : > { %7997 = vst [vmem:[#allocation5_spill] sm:$0xff] %v6231_v41  ;;  %v6235_v44 = vpop.f32.mrb[3].mxu0  ;;  %v1029_v45 = vsel %vm1019_vm3, %v6233_v42, 0.0  ;;  %v965_v15 = vadd.f32 %v6244_v48, %v964_v46 }
 0x100   : > { %1021 = vadd.xlane.f32.xlu0 %v1020_v40  ;;  %1030 = vadd.xlane.f32.xlu1 %v1029_v45  ;;  %v1026_v47 = vsel %vm1019_vm3, %v6235_v44, 0.0 }
 0x101   : > { %v6246_v49 = vadd.f32 %v1029_v45, %v1026_v47  ;;  %v5186_v51 = vpop.f32.mrb[4].mxu1 }
 0x102   : > { %v6248_v50 = vpop.f32.mrb[4].mxu0  ;;  %v974_v54 = vpop.f32.mrb[5].mxu1  ;;  %v980_v40 = vadd.f32 %v5186_v51, %v6244_v48 }
 0x103   : > { %7999 = vst [vmem:[#allocation6_spill] sm:$0xff] %v6246_v49  ;;  %v6250_v52 = vpop.f32.mrb[5].mxu0  ;;  %v1035_v53 = vsel %vm1019_vm3, %v6248_v50, 0.0  ;;  %v975_v38 = vadd.f32 %v6244_v48, %v974_v54 }
 0x104   : > { %1027 = vadd.xlane.f32.xlu1 %v1026_v47  ;;  %v1032_v56 = vsel %vm1019_vm3, %v6250_v52, 0.0 }
 0x105   : > { %1033 = vadd.xlane.f32.xlu0 %v1032_v56  ;;  %v6257_v57 = vadd.f32 %v1035_v53, %v1032_v56  ;;  %v5189_v60 = vpop.f32.mrb[6].mxu1 }
 0x106   : > { %v6260_v59 = vpop.f32.mrb[6].mxu0  ;;  %v984_v63 = vpop.f32.mrb[7].mxu1  ;;  %v6269_v1 = vadd.f32 %v5189_v60, %v6244_v48 }
 0x107   : > { %8000 = vst [vmem:[#allocation7_spill] sm:$0xff] %v6257_v57  ;;  %v6262_v61 = vpop.f32.mrb[7].mxu0  ;;  %v1041_v62 = vsel %vm1019_vm3, %v6260_v59, 0.0  ;;  %v6272_v2 = vadd.f32 %v6244_v48, %v984_v63  ;;  %v6282_v8 = vmul.f32 %v6260_v59, %v960_v58 }
 0x108   : > { %1036 = vadd.xlane.f32.xlu1 %v1035_v53  ;;  %v1038_v0 = vsel %vm1019_vm3, %v6262_v61, 0.0  ;;  %v6275_v3 = vmul.f32 %v955_v55, %v6262_v61 }
 0x109   : > { %1039 = vadd.xlane.f32.xlu0 %v1038_v0  ;;  %v6277_v4 = vadd.f32 %v1041_v62, %v1038_v0  ;;  %v5192_v6 = vpop.f32.mrb[8].mxu1  ;;  %v1187_v19 = vmul.f32 %v6282_v8, %v6282_v8  ;;  %v1123_v22 = vmul.f32 %v6260_v59, %v6282_v8 }
 0x10a   : > { %8001 = vst [vmem:[#allocation8_spill] sm:$0xff] %v6275_v3  ;;  %v6279_v5 = vpop.f32.mrb[8].mxu0  ;;  %v994_v10 = vpop.f32.mrb[9].mxu1  ;;  %v1122_v13 = vmul.f32 %v6275_v3, %v6262_v61  ;;  %v6293_v14 = vadd.f32 %v5192_v6, %v6244_v48  ;;  %v1186_v23 = vmul.f32 %v6275_v3, %v6275_v3 }
 0x10b   : > { %8002 = vst [vmem:[#allocation9_spill] sm:$0xff] %v6277_v4  ;;  %8003 = vst [vmem:[#allocation10_spill] sm:$0xff] %v6279_v5  ;;  %v6284_v9 = vpop.f32.mrb[9].mxu0  ;;  %v1047_v12 = vsel %vm1019_vm3, %v6279_v5, 0.0  ;;  %v6301_v18 = vadd.f32 %v6244_v48, %v994_v10  ;;  %v1203_v25 = vmul.f32 %v6260_v59, %v1187_v19  ;;  %v1153_v31 = vsel %vm1019_vm3, %v1123_v22, 0.0 }
 0x10c   : > { %8004 = vst [vmem:[#allocation11_spill] sm:$0xff] %v6284_v9  ;;  %1042 = vadd.xlane.f32.xlu1 %v1041_v62  ;;  %v1044_v11 = vsel %vm1019_vm3, %v6284_v9, 0.0  ;;  %v1150_v24 = vsel %vm1019_vm3, %v1122_v13, 0.0  ;;  %v6323_v29 = vmul.f32 %v965_v15, %v6284_v9  ;;  %v1202_v32 = vmul.f32 %v1186_v23, %v6262_v61 }
 0x10d   : > { %1045 = vadd.xlane.f32.xlu0 %v1044_v11  ;;  %v6298_v17 = vadd.f32 %v1047_v12, %v1044_v11  ;;  %v6333_v34 = vmul.f32 %v6279_v5, %v970_v20  ;;  %v1233_v36 = vsel %vm1019_vm3, %v1203_v25, 0.0 }
 0x10e   : > { %v6296_v16 = vpop.f32.mrb[10].mxu0  ;;  %8009 = vst [vmem:[#allocation16_spill] sm:$0xff] %v6323_v29  ;;  %v1230_v46 = vsel %vm1019_vm3, %v1202_v32, 0.0 }
 0x10f   : > { %8005 = vst [vmem:[#allocation12_spill] sm:$0xff] %v6296_v16  ;;  %8006 = vst [vmem:[#allocation13_spill] sm:$0xff] %v6298_v17  ;;  %v6306_v21 = vpop.f32.mrb[11].mxu0  ;;  %v6320_v28 = vsel %vm1019_vm3, %v6296_v16, 0.0  ;;  %v6359_v55 = vmul.f32 %v6296_v16, %v980_v40 }
 0x110   : > { %8007 = vst [vmem:[#allocation14_spill] sm:$0xff] %v6306_v21  ;;  %1048 = vadd.xlane.f32.xlu1 %v1047_v12  ;;  %v1050_v26 = vsel %vm1019_vm3, %v6306_v21, 0.0  ;;  %8012 = vst [vmem:[#allocation19_spill] sm:$0xff] %v6333_v34  ;;  %v6356_v54 = vmul.f32 %v975_v38, %v6306_v21 }
 0x111   : > { %1151 = vadd.xlane.f32.xlu0 %v1150_v24  ;;  %v6330_v33 = vadd.f32 %v6320_v28, %v1050_v26  ;;  %8017 = vst [vmem:[#allocation24_spill] sm:$0xff] %v6359_v55 }
 0x112   : > { %v6316_v27 = vpop.f32.mrb[12].mxu0  ;;  %8016 = vst [vmem:[#allocation23_spill] sm:$0xff] %v6356_v54 }
 0x113   : > { %8008 = vst [vmem:[#allocation15_spill] sm:$0xff] %v6316_v27  ;;  %v6325_v30 = vpop.f32.mrb[13].mxu0  ;;  %8011 = vst [vmem:[#allocation18_spill] sm:$0xff] %v6330_v33  ;;  %v6349_v47 = vsel %vm1019_vm3, %v6316_v27, 0.0 }
 0x114   : > { %8010 = vst [vmem:[#allocation17_spill] sm:$0xff] %v6325_v30  ;;  %1154 = vadd.xlane.f32.xlu1 %v1153_v31  ;;  %v6339_v39 = vsel %vm1019_vm3, %v6325_v30, 0.0 }
 0x115   : > { %1234 = vadd.xlane.f32.xlu0 %v1233_v36  ;;  %v6353_v53 = vadd.f32 %v6349_v47, %v6339_v39 }
 0x116   : > { %v6342_v43 = vpop.f32.mrb[14].mxu0 }
 0x117   : > { %8013 = vst [vmem:[#allocation20_spill] sm:$0xff] %v6342_v43  ;;  %v6344_v45 = vpop.f32.mrb[15].mxu0  ;;  %8015 = vst [vmem:[#allocation22_spill] sm:$0xff] %v6353_v53 }
 0x118   : > { %8014 = vst [vmem:[#allocation21_spill] sm:$0xff] %v6344_v45  ;;  %1231 = vadd.xlane.f32.xlu1 %v1230_v46 }
 0x119   : > { %1051 = vadd.xlane.f32.xlu0 %v1050_v26 }
 0x11a   : > { %v5171_v51 = vpop.f32.mrb[16].mxu0 }
 0x11b   : > { %v930_v56 = vadd.f32 %v5171_v51, %v6244_v48  ;;  %v924_v58 = vpop.f32.mrb[17].mxu0 }
 0x11c   : > { %v925_v60 = vadd.f32 %v6244_v48, %v924_v58 }
 0x11d   : > { %v6364_v62 = vmul.f32 %v6223_v35, %v930_v56 }
 0x11e   : > { %v6367_v63 = vmul.f32 %v925_v60, %v6225_v37  ;;  %v5174_v0 = vpop.f32.mrb[18].mxu0 }
 0x11f   : > { %v940_v6 = vadd.f32 %v5174_v0, %v6244_v48  ;;  %v934_v10 = vpop.f32.mrb[19].mxu0  ;;  %v1117_v11 = vmul.f32 %v6223_v35, %v6364_v62  ;;  %v1181_v12 = vmul.f32 %v6364_v62, %v6364_v62 }
 0x120   : > { %8018 = vst [vmem:[#allocation25_spill] sm:$0xff] %v6367_v63  ;;  %v935_v13 = vadd.f32 %v6244_v48, %v934_v10  ;;  %v1116_v15 = vmul.f32 %v6367_v63, %v6225_v37  ;;  %v1180_v19 = vmul.f32 %v6367_v63, %v6367_v63 }
 0x121   : > { %v6380_v20 = vmul.f32 %v6233_v42, %v940_v6  ;;  %v1135_v22 = vsel %vm1019_vm3, %v1117_v11, 0.0  ;;  %v1197_v31 = vmul.f32 %v6223_v35, %v1181_v12  ;;  %v6409_v6 = vsel %vm1019_vm3, %v6344_v45, 0.0 }
 0x122   : > { %v6384_v23 = vmul.f32 %v935_v13, %v6235_v44  ;;  %1136 = vadd.xlane.f32.xlu1 %v1135_v22  ;;  %v5177_v24 = vpop.f32.mrb[20].mxu0  ;;  %v1132_v25 = vsel %vm1019_vm3, %v1116_v15, 0.0  ;;  %v1196_v26 = vmul.f32 %v1180_v19, %v6225_v37  ;;  %v6415_v12 = vsel %vm1019_vm3, %v6342_v43, 0.0 }
 0x123   : > { %v950_v32 = vadd.f32 %v5177_v24, %v6244_v48  ;;  %v944_v36 = vpop.f32.mrb[21].mxu0  ;;  %1133 = vadd.xlane.f32.xlu0 %v1132_v25  ;;  %v1119_v51 = vmul.f32 %v6233_v42, %v6380_v20  ;;  %v1215_v60 = vsel %vm1019_vm3, %v1197_v31, 0.0  ;;  %v1183_v0 = vmul.f32 %v6380_v20, %v6380_v20 }
 0x124   : > { %v945_v38 = vadd.f32 %v6244_v48, %v944_v36  ;;  %v1212_v40 = vsel %vm1019_vm3, %v1196_v26, 0.0  ;;  %v1182_v56 = vmul.f32 %v6384_v23, %v6384_v23  ;;  %v1118_v48 = vmul.f32 %v6384_v23, %v6235_v44 }
 0x125   : > { %v6393_v46 = vmul.f32 %v6248_v50, %v950_v32  ;;  %v1141_v10 = vsel %vm1019_vm3, %v1119_v51, 0.0  ;;  %v1199_v15 = vmul.f32 %v6233_v42, %v1183_v0  ;;  %v6421_v19 = vadd.f32 %v6415_v12, %v6409_v6 }
 0x126   : > { %v6400_v58 = vmul.f32 %v945_v38, %v6250_v52  ;;  %1213 = vadd.xlane.f32.xlu1 %v1212_v40  ;;  %v1198_v11 = vmul.f32 %v1182_v56, %v6235_v44  ;;  %v1138_v13 = vsel %vm1019_vm3, %v1118_v48, 0.0  ;;  %v6425_v22 = vmul.f32 %v6272_v2, %v6325_v30 }
 0x127   : > { %1216 = vadd.xlane.f32.xlu0 %v1215_v60  ;;  %8019 = vst [vmem:[#allocation26_spill] sm:$0xff] %v6421_v19  ;;  %v6429_v24 = vmul.f32 %v6316_v27, %v6269_v1  ;;  %v6433_v25 = vmul.f32 %v6301_v18, %v6344_v45  ;;  %v6437_v26 = vmul.f32 %v6342_v43, %v6293_v14  ;;  %v1221_v1 = vsel %vm1019_vm3, %v1199_v15, 0.0 }
 0x128   : > { %8020 = vst [vmem:[#allocation27_spill] sm:$0xff] %v6425_v22  ;;  %v1218_v31 = vsel %vm1019_vm3, %v1198_v11, 0.0  ;;  %v1121_v32 = vmul.f32 %v6248_v50, %v6393_v46  ;;  %v1184_v2 = vmul.f32 %v6400_v58, %v6400_v58  ;;  %v1120_v36 = vmul.f32 %v6400_v58, %v6250_v52 }
 0x129   : > { %8021 = vst [vmem:[#allocation28_spill] sm:$0xff] %v6429_v24  ;;  %8022 = vst [vmem:[#allocation29_spill] sm:$0xff] %v6433_v25  ;;  %v1185_v18 = vmul.f32 %v6393_v46, %v6393_v46  ;;  %v1188_v60 = vmul.f32 %v6323_v29, %v6323_v29  ;;  %v1124_v0 = vmul.f32 %v6323_v29, %v6284_v9 }
 0x12a   : > { %1142 = vadd.xlane.f32.xlu1 %v1141_v10  ;;  %8023 = vst [vmem:[#allocation30_spill] sm:$0xff] %v6437_v26  ;;  %v1147_v14 = vsel %vm1019_vm3, %v1121_v32, 0.0  ;;  %v1200_v38 = vmul.f32 %v1184_v2, %v6250_v52  ;;  %v1144_v40 = vsel %vm1019_vm3, %v1120_v36, 0.0  ;;  %v1126_v36 = vmul.f32 %v6356_v54, %v6306_v21 }
 0x12b   : > { %1139 = vadd.xlane.f32.xlu0 %v1138_v13  ;;  %v1201_v51 = vmul.f32 %v6248_v50, %v1185_v18  ;;  %v1204_v10 = vmul.f32 %v1188_v60, %v6284_v9  ;;  %v1156_v11 = vsel %vm1019_vm3, %v1124_v0, 0.0  ;;  %v1189_v13 = vmul.f32 %v6333_v34, %v6333_v34  ;;  %v1625_v60 = vld [vmem:[%s7911_s6 + $0x28] sm:$0xff] }
 0x12c   : > { %v1224_v56 = vsel %vm1019_vm3, %v1200_v38, 0.0  ;;  %v1621_v38 = vld [vmem:[%s7911_s6 + $0x8] sm:$0xff] }
 0x12d   : > { %v1227_v48 = vsel %vm1019_vm3, %v1201_v51, 0.0  ;;  %v1236_v15 = vsel %vm1019_vm3, %v1204_v10, 0.0  ;;  %v1205_v32 = vmul.f32 %v6279_v5, %v1189_v13  ;;  %v1620_v51 = vld [vmem:[%s7911_s6] sm:$0xff]  ;;  %v1127_v10 = vmul.f32 %v6296_v16, %v6359_v55 }
 0x12e   : > { %1219 = vadd.xlane.f32.xlu1 %v1218_v31  ;;  %v1125_v31 = vmul.f32 %v6279_v5, %v6333_v34 }
 0x12f   : > { %1222 = vadd.xlane.f32.xlu0 %v1221_v1  ;;  %v1239_v1 = vsel %vm1019_vm3, %v1205_v32, 0.0  ;;  %v1626_v32 = vld [vmem:[%s7911_s6 + $0x30] sm:$0xff] }
 0x130   : > { %v1159_v2 = vsel %vm1019_vm3, %v1125_v31, 0.0  ;;  %v1624_v31 = vld [vmem:[%s7911_s6 + $0x20] sm:$0xff] }
 0x132   : > { %1148 = vadd.xlane.f32.xlu1 %v1147_v14  ;;  %v1162_v14 = vsel %vm1019_vm3, %v1126_v36, 0.0  ;;  %v1631_v36 = vld [vmem:[%s7911_s6 + $0x58] sm:$0xff] }
 0x133   : > { %1145 = vadd.xlane.f32.xlu0 %v1144_v40  ;;  %v1623_v40 = vld [vmem:[%s7911_s6 + $0x18] sm:$0xff] }
 0x136   : > { %1225 = vadd.xlane.f32.xlu1 %v1224_v56  ;;  %v5433_v56 = vpack.c.bf16 %v1623_v40, %v1621_v38  ;;  %v1630_v40 = vld [vmem:[%s7911_s6 + $0x50] sm:$0xff] }
 0x137   : > { %1228 = vadd.xlane.f32.xlu0 %v1227_v48  ;;  %v1627_v48 = vld [vmem:[%s7911_s6 + $0x38] sm:$0xff] }
 0x138   : > { %v5437_v13 = vpack.c.bf16 %v1627_v48, %v1625_v60  ;;  %5434 = vmatprep.subr.bf16.mxu0 %v5433_v56  ;;  %v1129_v48 = vmul.f32 %v6316_v27, %v6429_v24 }
 0x13a   : > { %1054 = vadd.xlane.f32.xlu1 %v6320_v28  ;;  %v1190_v28 = vmul.f32 %v6356_v54, %v6356_v54 }
 0x13b   : > { %1157 = vadd.xlane.f32.xlu0 %v1156_v11 }
 0x13c   : > { %v1206_v18 = vmul.f32 %v1190_v28, %v6306_v21  ;;  %v1192_v28 = vmul.f32 %v6425_v22, %v6425_v22 }
 0x13e   : > { %1237 = vadd.xlane.f32.xlu1 %v1236_v15  ;;  %v1242_v0 = vsel %vm1019_vm3, %v1206_v18, 0.0  ;;  %v1628_v18 = vld [vmem:[%s7911_s6 + $0x40] sm:$0xff]  ;;  %v1208_v56 = vmul.f32 %v1192_v28, %v6325_v30  ;;  %v1131_v28 = vmul.f32 %v6342_v43, %v6437_v26 }
 0x13f   : > { %1057 = vadd.xlane.f32.xlu0 %v6339_v39  ;;  %v1191_v39 = vmul.f32 %v6359_v55, %v6359_v55 }
 0x141   : > { %v1207_v15 = vmul.f32 %v6296_v16, %v1191_v39  ;;  %v1128_v39 = vmul.f32 %v6425_v22, %v6325_v30 }
 0x142   : > { %1160 = vadd.xlane.f32.xlu1 %v1159_v2  ;;  %v1165_v2 = vsel %vm1019_vm3, %v1127_v10, 0.0 }
 0x143   : > { %1240 = vadd.xlane.f32.xlu0 %v1239_v1  ;;  %v5439_v1 = vpack.c.bf16 %v1626_v32, %v1624_v31  ;;  %v1168_v60 = vsel %vm1019_vm3, %v1128_v39, 0.0  ;;  %v1195_v32 = vmul.f32 %v6437_v26, %v6437_v26 }
 0x146   : > { %1060 = vadd.xlane.f32.xlu1 %v6349_v47  ;;  %v1622_v47 = vld [vmem:[%s7911_s6 + $0x10] sm:$0xff] }
 0x147   : > { %1163 = vadd.xlane.f32.xlu0 %v1162_v14  ;;  %v5435_v11 = vpack.c.bf16 %v1622_v47, %v1620_v51  ;;  %v1245_v14 = vsel %vm1019_vm3, %v1207_v15, 0.0  ;;  %v5443_v51 = vpack.c.bf16 %v1630_v40, %v1628_v18  ;;  %v1193_v47 = vmul.f32 %v6429_v24, %v6429_v24 }
 0x149   : > { %5436 = vmatpush1.bf16.msra.mxu0 %v5435_v11  ;;  %v1209_v10 = vmul.f32 %v6316_v27, %v1193_v47  ;;  %v1194_v11 = vmul.f32 %v6433_v25, %v6433_v25 }
 0x14a   : > { %1243 = vadd.xlane.f32.xlu1 %v1242_v0  ;;  %5438 = vmatprep.subr.bf16.mxu0 %v5437_v13  ;;  %v1248_v0 = vsel %vm1019_vm3, %v1208_v56, 0.0  ;;  %v1171_v13 = vsel %vm1019_vm3, %v1129_v48, 0.0 }
 0x14b   : > { %1063 = vadd.xlane.f32.xlu0 %v6409_v6  ;;  %v1629_v6 = vld [vmem:[%s7911_s6 + $0x48] sm:$0xff]  ;;  %v1251_v15 = vsel %vm1019_vm3, %v1209_v10, 0.0  ;;  %v1210_v31 = vmul.f32 %v1194_v11, %v6344_v45 }
 0x14c   : > { %v5441_v38 = vpack.c.bf16 %v1631_v36, %v1629_v6  ;;  %v1211_v6 = vmul.f32 %v6342_v43, %v1195_v32  ;;  %v1177_v36 = vsel %vm1019_vm3, %v1131_v28, 0.0 }
 0x14d   : > { %5440 = vmatpush1.bf16.msra.mxu0 %v5439_v1  ;;  %v1254_v1 = vsel %vm1019_vm3, %v1210_v31, 0.0 }
 0x14e   : > { %1166 = vadd.xlane.f32.xlu1 %v1165_v2  ;;  %5442 = vmatprep.subr.bf16.mxu0 %v5441_v38  ;;  %v1257_v18 = vsel %vm1019_vm3, %v1211_v6, 0.0 }
 0x14f   : > { %1246 = vadd.xlane.f32.xlu0 %v1245_v14 }
 0x151   : > { %5444 = vmatpush1.bf16.msra.mxu0 %v5443_v51 }
 0x152   : > { %1066 = vadd.xlane.f32.xlu1 %v6415_v12  ;;  %v1130_v12 = vmul.f32 %v6433_v25, %v6344_v45 }
 0x153   : > { %1169 = vadd.xlane.f32.xlu0 %v1168_v60 }
 0x154   : > { %v1174_v2 = vsel %vm1019_vm3, %v1130_v12, 0.0 }
 0x156   : > { %1249 = vadd.xlane.f32.xlu1 %v1248_v0 }
 0x157   : > { %1172 = vadd.xlane.f32.xlu0 %v1171_v13 }
 0x15a   : > { %1252 = vadd.xlane.f32.xlu1 %v1251_v15 }
 0x15b   : > { %1175 = vadd.xlane.f32.xlu0 %v1174_v2 }
 0x15e   : > { %1255 = vadd.xlane.f32.xlu1 %v1254_v1 }
 0x15f   : > { %1178 = vadd.xlane.f32.xlu0 %v1177_v36 }
 0x162   : > { %1258 = vadd.xlane.f32.xlu1 %v1257_v18 }
 0x189   : > { %v1025_v14 = vpop.xlane.xlu0 %1024 }
 0x18a   : > { %v1069_v11 = vmax.f32 %v1025_v14, 1.0 }
 0x18c   : > { %5748 = vrcp.f32 %v1069_v11 }
 0x18d   : > { %v1022_v39 = vpop.xlane.xlu0 %1021  ;;  %v1031_v38 = vpop.xlane.xlu1 %1030 }
 0x18e   : > { %v1068_v13 = vmax.f32 %v1022_v39, 1.0  ;;  %v1071_v31 = vmax.f32 %v1031_v38, 1.0 }
 0x190   : > { %5750 = vrcp.f32 %v1068_v13 }
 0x191   : > { %v1028_v40 = vpop.xlane.xlu1 %1027  ;;  %5752 = vrcp.f32 %v1071_v31 }
 0x192   : > { %v1034_v51 = vpop.xlane.xlu0 %1033  ;;  %v1070_v32 = vmax.f32 %v1028_v40, 1.0 }
 0x193   : > { %v1072_v11 = vmax.f32 %v1034_v51, 1.0 }
 0x194   : > { %5754 = vrcp.f32 %v1070_v32 }
 0x195   : > { %v1037_v56 = vpop.xlane.xlu1 %1036 }
 0x196   : > { %v1040_v47 = vpop.xlane.xlu0 %1039  ;;  %v6558_v6 = vpop.eup %5748  ;;  %v1073_v40 = vmax.f32 %v1037_v56, 1.0 }
 0x197   : > { %v1074_v2 = vmax.f32 %v1040_v47, 1.0  ;;  %8024 = vst [vmem:[#allocation31_spill] sm:$0xff] %v6558_v6 }
 0x199   : > { %v1043_v60 = vpop.xlane.xlu1 %1042  ;;  %5756 = vrcp.f32 %v1074_v2 }
 0x19a   : > { %v1046_v48 = vpop.xlane.xlu0 %1045  ;;  %v1075_v36 = vmax.f32 %v1043_v60, 1.0  ;;  %v6560_v14 = vpop.eup %5750 }
 0x19b   : > { %8025 = vst [vmem:[#allocation32_spill] sm:$0xff] %v6560_v14  ;;  %v6574_v7 = vpop.eup %5752 }
 0x19c   : > { %5758 = vrcp.f32 %v1075_v36  ;;  %8026 = vst [vmem:[#allocation33_spill] sm:$0xff] %v6574_v7 }
 0x19d   : > { %v6552_v0 = vpop.xlane.xlu1 %1048  ;;  %5760 = vrcp.f32 %v1072_v11 }
 0x19e   : > { %v1152_v10 = vpop.xlane.xlu0 %1151  ;;  %5762 = vrcp.f32 %v1073_v40  ;;  %v6576_v36 = vpop.eup %5754 }
 0x19f   : > { %8027 = vst [vmem:[#allocation34_spill] sm:$0xff] %v6576_v36 }
 0x1a1   : > { %v1155_v12 = vpop.xlane.xlu1 %1154 }
 0x1a2   : > { %v6554_v15 = vpop.xlane.xlu0 %1234 }
 0x1a3   : > { %v6578_v33 = vpop.eup %5756 }
 0x1a4   : > { %8028 = vst [vmem:[#allocation35_spill] sm:$0xff] %v6578_v33 }
 0x1a5   : > { %v1232_v28 = vpop.xlane.xlu1 %1231 }
 0x1a6   : > { %v6556_v1 = vpop.xlane.xlu0 %1051  ;;  %v6592_v4 = vpop.eup %5758  ;;  %v1282_v49 = vmul.f32 %v6578_v33, %v1232_v28 }
 0x1a7   : > { %8029 = vst [vmem:[#allocation36_spill] sm:$0xff] %v6592_v4 }
 0x1af   : > { %v1137_v18 = vpop.xlane.xlu1 %1136 }
 0x1b0   : > { %v1134_v39 = vpop.xlane.xlu0 %1133  ;;  %v6563_v13 = vmul.f32 %v6558_v6, %v1137_v18 }
 0x1b1   : > { %v6566_v38 = vmul.f32 %v6560_v14, %v1134_v39 }
 0x1b2   : > { %v1293_v2 = vmul.f32 %v6563_v13, %v6563_v13 }
 0x1b3   : > { %v1292_v47 = vmul.f32 %v6566_v38, %v6566_v38  ;;  %v1214_v31 = vpop.xlane.xlu1 %1213 }
 0x1b4   : > { %v1276_v32 = vmul.f32 %v6560_v14, %v1214_v31  ;;  %v1217_v60 = vpop.xlane.xlu0 %1216 }
 0x1b5   : > { %v1277_v51 = vmul.f32 %v6558_v6, %v1217_v60  ;;  %v1076_v60 = vmax.f32 %v1046_v48, 1.0 }
 0x1b6   : > { %v1308_v18 = vsub.f32 %v1276_v32, %v1292_v47 }
 0x1b7   : > { %v1309_v39 = vsub.f32 %v1277_v51, %v1293_v2  ;;  %v1143_v56 = vpop.xlane.xlu1 %1142  ;;  %v6589_v51 = vmul.f32 %v6578_v33, %v1152_v10  ;;  %v1078_v33 = vmax.f32 %v6556_v1, 1.0 }
 0x1b8   : > { %v1324_v19 = vmax.f32 %v1308_v18, 0.0  ;;  %v1140_v53 = vpop.xlane.xlu0 %1139  ;;  %v6581_v11 = vmul.f32 %v6574_v7, %v1143_v56  ;;  %v6597_v56 = vpop.eup %5760 }
 0x1b9   : > { %v1325_v31 = vmax.f32 %v1309_v39, 0.0  ;;  %v6584_v17 = vmul.f32 %v6576_v36, %v1140_v53  ;;  %8030 = vst [vmem:[#allocation37_spill] sm:$0xff] %v6597_v56 }
 0x1ba   : > { %v1356_v40 = vadd.f32 1e-05, %v1324_v19  ;;  %v1295_v53 = vmul.f32 %v6581_v11, %v6581_v11 }
 0x1bb   : > { %v1357_v47 = vadd.f32 1e-05, %v1325_v31  ;;  %v1294_v32 = vmul.f32 %v6584_v17, %v6584_v17  ;;  %v1220_v2 = vpop.xlane.xlu1 %1219  ;;  %v1077_v31 = vmax.f32 %v6552_v0, 1.0 }
 0x1bc   : > { %5764 = vrsqrt.f32 %v1356_v40  ;;  %v1278_v18 = vmul.f32 %v6576_v36, %v1220_v2  ;;  %v1223_v39 = vpop.xlane.xlu0 %1222  ;;  %v6600_v40 = vpop.eup %5762  ;;  %v1298_v2 = vmul.f32 %v6589_v51, %v6589_v51 }
 0x1bd   : > { %5766 = vrsqrt.f32 %v1357_v47  ;;  %v1279_v19 = vmul.f32 %v6574_v7, %v1223_v39  ;;  %8031 = vst [vmem:[#allocation38_spill] sm:$0xff] %v6600_v40  ;;  %v6605_v47 = vmul.f32 %v6592_v4, %v1155_v12 }
 0x1be   : > { %5768 = vrcp.f32 %v1076_v60  ;;  %v1310_v48 = vsub.f32 %v1278_v18, %v1294_v32  ;;  %v1314_v28 = vsub.f32 %v1282_v49, %v1298_v2 }
 0x1bf   : > { %v1311_v10 = vsub.f32 %v1279_v19, %v1295_v53  ;;  %v1149_v57 = vpop.xlane.xlu1 %1148  ;;  %5770 = vrcp.f32 %v1077_v31  ;;  %v1299_v12 = vmul.f32 %v6605_v47, %v6605_v47 }
 0x1c0   : > { %v1326_v41 = vmax.f32 %v1310_v48, 0.0  ;;  %v1146_v39 = vpop.xlane.xlu0 %1145  ;;  %v6609_v32 = vmul.f32 %v6600_v40, %v1149_v57  ;;  %v1340_v57 = vsub.f32 %v6367_v63, %v6566_v38  ;;  %v1330_v14 = vmax.f32 %v1314_v28, 0.0 }
 0x1c1   : > { %v1327_v60 = vmax.f32 %v1311_v10, 0.0  ;;  %v6612_v0 = vmul.f32 %v6597_v56, %v1146_v39 }
 0x1c2   : > { %v1358_v18 = vadd.f32 1e-05, %v1326_v41  ;;  %v1297_v41 = vmul.f32 %v6609_v32, %v6609_v32  ;;  %v1362_v28 = vadd.f32 1e-05, %v1330_v14 }
 0x1c3   : > { %v1359_v53 = vadd.f32 1e-05, %v1327_v60  ;;  %v1296_v19 = vmul.f32 %v6612_v0, %v6612_v0  ;;  %v1226_v36 = vpop.xlane.xlu1 %1225  ;;  %v1283_v60 = vmul.f32 %v6592_v4, %v6554_v15 }
 0x1c4   : > { %5772 = vrsqrt.f32 %v1358_v18  ;;  %v1280_v48 = vmul.f32 %v6597_v56, %v1226_v36  ;;  %v1229_v10 = vpop.xlane.xlu0 %1228  ;;  %v1341_v36 = vsub.f32 %v6364_v62, %v6563_v13 }
 0x1c5   : > { %5774 = vrsqrt.f32 %v1359_v53  ;;  %v1281_v31 = vmul.f32 %v6600_v40, %v1229_v10  ;;  %v1315_v7 = vsub.f32 %v1283_v60, %v1299_v12 }
 0x1c6   : > { %v5765_v39 = vpop.eup %5764  ;;  %v1312_v49 = vsub.f32 %v1280_v48, %v1296_v19  ;;  %5776 = vrcp.f32 %v1078_v33  ;;  %v1342_v33 = vsub.f32 %v6384_v23, %v6584_v17 }
 0x1c7   : > { %v5767_v2 = vpop.eup %5766  ;;  %v1388_v18 = vmul.f32 %v5765_v39, %v1340_v57  ;;  %v1313_v56 = vsub.f32 %v1281_v31, %v1297_v41  ;;  %v1055_v38 = vpop.xlane.xlu1 %1054  ;;  %v1331_v12 = vmax.f32 %v1315_v7, 0.0  ;;  %v8033_v31 = vmov 0.0  }
 0x1c8   : > { %v6629_v53 = vpop.eup %5768  ;;  %v1328_v6 = vmax.f32 %v1312_v49, 0.0  ;;  %v1158_v10 = vpop.xlane.xlu0 %1157  ;;  %v1389_v1 = vmul.f32 %v5767_v2, %v1341_v36  ;;  %v1343_v7 = vsub.f32 %v6380_v20, %v6581_v11 }
 0x1c9   : > { %8032 = vst [vmem:[#allocation39_spill] sm:$0xff] %v6629_v53  ;;  %v1329_v40 = vmax.f32 %v1313_v56, 0.0  ;;  %v6632_v63 = vmul.f32 %v6629_v53, %v1158_v10  ;;  %v1404_v15 = vmul.f32 %v1388_v18, %v6225_v37  ;;  %v6640_v39 = vpop.eup %5770  ;;  %v1363_v18 = vadd.f32 1e-05, %v1331_v12 }
 0x1ca   : > { %v1360_v19 = vadd.f32 1e-05, %v1328_v6  ;;  %8034 = vst [vmem:[#allocation40_spill] sm:$0xff] %v6640_v39  ;;  %v1079_v6 = vmax.f32 %v1055_v38, 1.0 }
 0x1cb   : > { %v1361_v48 = vadd.f32 1e-05, %v1329_v40  ;;  %v1300_v13 = vmul.f32 %v6632_v63, %v6632_v63  ;;  %v1238_v57 = vpop.xlane.xlu1 %1237  ;;  %4863 = vmatmul.mubr.msk.f32.vlgmr.msra.gmra.mrb[22].mxu0 %vm1019_vm3, %v1404_v15  ;;  %v1405_v40 = vmul.f32 %v6223_v35, %v1389_v1 }
 0x1cc   : > { %5778 = vrsqrt.f32 %v1360_v19  ;;  %v1284_v56 = vmul.f32 %v6629_v53, %v1238_v57  ;;  %v1058_v41 = vpop.xlane.xlu0 %1057  ;;  %1762 = vmatprep.mubr.f32.mxu0 %v8033_v31 }
 0x1cd   : > { %5780 = vrsqrt.f32 %v1361_v48  ;;  %v1080_v11 = vmax.f32 %v1058_v41, 1.0 }
 0x1ce   : > { %v5773_v60 = vpop.eup %5772  ;;  %v1316_v49 = vsub.f32 %v1284_v56, %v1300_v13  ;;  %5782 = vrsqrt.f32 %v1362_v28 }
 0x1cf   : > { %v5775_v2 = vpop.eup %5774  ;;  %v1161_v14 = vpop.xlane.xlu1 %1160  ;;  %4864 = vmatmul.mubr.msk.f32.gmra.mrb[24].mxu0 %vm1019_vm3, %v1405_v40  ;;  %v1390_v36 = vmul.f32 %v5773_v60, %v1342_v33  ;;  %5784 = vrcp.f32 %v1079_v6  ;;  %v1344_v33 = vsub.f32 %v6400_v58, %v6612_v0 }
 0x1d0   : > { %v1332_v10 = vmax.f32 %v1316_v49, 0.0  ;;  %v6649_v15 = vmul.f32 %v6640_v39, %v1161_v14  ;;  %v1241_v17 = vpop.xlane.xlu0 %1240  ;;  %1768 = vmatprep.mubr.f32.mxu0 %v8033_v31  ;;  %v1391_v19 = vmul.f32 %v5775_v2, %v1343_v7  ;;  %v6657_v57 = vpop.eup %5776  ;;  %5786 = vrsqrt.f32 %v1363_v18 }
 0x1d1   : > { %v1285_v38 = vmul.f32 %v6640_v39, %v1241_v17  ;;  %v1406_v1 = vmul.f32 %v1390_v36, %v6235_v44  ;;  %8035 = vst [vmem:[#allocation41_spill] sm:$0xff] %v6657_v57  ;;  %5788 = vrcp.f32 %v1080_v11  ;;  %v1345_v7 = vsub.f32 %v6393_v46, %v6609_v32 }
 0x1d2   : > { %v1301_v48 = vmul.f32 %v6649_v15, %v6649_v15  ;;  %v1364_v12 = vadd.f32 1e-05, %v1332_v10  ;;  %v1407_v41 = vmul.f32 %v6233_v42, %v1391_v19 }
 0x1d3   : > { %v1061_v13 = vpop.xlane.xlu1 %1060  ;;  %4865 = vmatmul.mubr.msk.f32.gmra.mrb[26].mxu0 %vm1019_vm3, %v1406_v1 }
 0x1d4   : > { %v1317_v28 = vsub.f32 %v1285_v38, %v1301_v48  ;;  %v1164_v56 = vpop.xlane.xlu0 %1163  ;;  %1774 = vmatprep.mubr.f32.mxu0 %v8033_v31  ;;  %v1081_v49 = vmax.f32 %v1061_v13, 1.0  ;;  %5790 = vrsqrt.f32 %v1364_v12  ;;  %v1346_v13 = vsub.f32 %v6275_v3, %v6589_v51  ;;  %v538_v3 = vld [vmem:[%s6861_s27 + $0x50] sm:$0xff] }
 0x1d5   : > { %v6663_v6 = vmul.f32 %v6657_v57, %v1164_v56 }
 0x1d6   : > { %v5779_v40 = vpop.eup %5778  ;;  %v1333_v60 = vmax.f32 %v1317_v28, 0.0  ;;  %5792 = vrcp.f32 %v1081_v49 }
 0x1d7   : > { %v5781_v2 = vpop.eup %5780  ;;  %v1302_v14 = vmul.f32 %v6663_v6, %v6663_v6  ;;  %v1244_v36 = vpop.xlane.xlu1 %1243  ;;  %4866 = vmatmul.mubr.msk.f32.gmra.mrb[28].mxu0 %vm1019_vm3, %v1407_v41  ;;  %v1392_v0 = vmul.f32 %v5779_v40, %v1344_v33 }
 0x1d8   : > { %v1365_v18 = vadd.f32 1e-05, %v1333_v60  ;;  %v1286_v10 = vmul.f32 %v6657_v57, %v1244_v36  ;;  %v1064_v17 = vpop.xlane.xlu0 %1063  ;;  %1780 = vmatprep.mubr.f32.mxu0 %v8033_v31  ;;  %v1393_v1 = vmul.f32 %v5781_v2, %v1345_v7  ;;  %v5783_v19 = vpop.eup %5782  ;;  %v1347_v7 = vsub.f32 %v6282_v8, %v6605_v47 }
 0x1d9   : > { %v1408_v38 = vmul.f32 %v1392_v0, %v6250_v52  ;;  %v1082_v11 = vmax.f32 %v1064_v17, 1.0  ;;  %v6674_v48 = vpop.eup %5784  ;;  %v1394_v60 = vmul.f32 %v5783_v19, %v1346_v13  ;;  %v1348_v47 = vsub.f32 %v6323_v29, %v6632_v63  ;;  %v537_v29 = vld [vmem:[%s6861_s27 + $0x48] sm:$0xff] }
 0x1da   : > { %v1318_v32 = vsub.f32 %v1286_v10, %v1302_v14  ;;  %8036 = vst [vmem:[#allocation42_spill] sm:$0xff] %v6674_v48  ;;  %5794 = vrsqrt.f32 %v1365_v18  ;;  %v1409_v40 = vmul.f32 %v6248_v50, %v1393_v1  ;;  %v5787_v49 = vpop.eup %5786 }
 0x1db   : > { %v1167_v28 = vpop.xlane.xlu1 %1166  ;;  %4867 = vmatmul.mubr.msk.f32.gmra.mrb[30].mxu0 %vm1019_vm3, %v1408_v38  ;;  %5796 = vrcp.f32 %v1082_v11  ;;  %v6690_v36 = vpop.eup %5788  ;;  %v1410_v38 = vmul.f32 %v1394_v60, %v6262_v61  ;;  %v1395_v1 = vmul.f32 %v5787_v49, %v1347_v7 }
 0x1dc   : > { %v1334_v12 = vmax.f32 %v1318_v32, 0.0  ;;  %v6680_v56 = vmul.f32 %v6674_v48, %v1167_v28  ;;  %v1247_v33 = vpop.xlane.xlu0 %1246  ;;  %1786 = vmatprep.mubr.f32.mxu0 %v8033_v31  ;;  %8037 = vst [vmem:[#allocation43_spill] sm:$0xff] %v6690_v36 }
 0x1dd   : > { %v1287_v41 = vmul.f32 %v6674_v48, %v1247_v33  ;;  %v1411_v60 = vmul.f32 %v6260_v59, %v1395_v1 }
 0x1de   : > { %v1366_v2 = vadd.f32 1e-05, %v1334_v12  ;;  %v1303_v51 = vmul.f32 %v6680_v56, %v6680_v56  ;;  %v5791_v19 = vpop.eup %5790 }
 0x1df   : > { %v1067_v14 = vpop.xlane.xlu1 %1066  ;;  %4868 = vmatmul.mubr.msk.f32.gmra.mrb[32].mxu0 %vm1019_vm3, %v1409_v40  ;;  %v1396_v63 = vmul.f32 %v5791_v19, %v1348_v47 }
 0x1e0   : > { %5798 = vrsqrt.f32 %v1366_v2  ;;  %v1319_v0 = vsub.f32 %v1287_v41, %v1303_v51  ;;  %v1083_v18 = vmax.f32 %v1067_v14, 1.0  ;;  %v1170_v10 = vpop.xlane.xlu0 %1169  ;;  %1792 = vmatprep.mubr.f32.mxu0 %v8033_v31  ;;  %v6702_v28 = vpop.eup %5792  ;;  %v1349_v51 = vsub.f32 %v6333_v34, %v6649_v15  ;;  %v532_v34 = vld [vmem:[%s6861_s27 + $0x20] sm:$0xff] }
 0x1e1   : > { %v6694_v17 = vmul.f32 %v6690_v36, %v1170_v10  ;;  %8038 = vst [vmem:[#allocation44_spill] sm:$0xff] %v6702_v28  ;;  %v1412_v19 = vmul.f32 %v1396_v63, %v6284_v9  ;;  %v1424_v9 = vsub.f32 1.0, %v532_v34  ;;  %v1430_v34 = vsub.f32 1.0, %v538_v3 }
 0x1e2   : > { %v1335_v32 = vmax.f32 %v1319_v0, 0.0  ;;  %5800 = vrcp.f32 %v1083_v18 }
 0x1e3   : > { %v1304_v11 = vmul.f32 %v6694_v17, %v6694_v17  ;;  %v1250_v13 = vpop.xlane.xlu1 %1249  ;;  %4869 = vmatmul.mubr.msk.f32.gmra.mrb[34].mxu0 %vm1019_vm3, %v1410_v38 }
 0x1e4   : > { %v1367_v12 = vadd.f32 1e-05, %v1335_v32  ;;  %v1288_v33 = vmul.f32 %v6690_v36, %v1250_v13  ;;  %v1173_v41 = vpop.xlane.xlu0 %1172  ;;  %1798 = vmatprep.mubr.f32.mxu0 %v8033_v31  ;;  %v5795_v49 = vpop.eup %5794  ;;  %v1350_v13 = vsub.f32 %v6356_v54, %v6663_v6 }
 0x1e5   : > { %v6707_v40 = vmul.f32 %v6702_v28, %v1173_v41  ;;  %v6715_v0 = vpop.eup %5796  ;;  %v1397_v32 = vmul.f32 %v5795_v49, %v1349_v51 }
 0x1e6   : > { %5802 = vrsqrt.f32 %v1367_v12  ;;  %v1320_v2 = vsub.f32 %v1288_v33, %v1304_v11  ;;  %8039 = vst [vmem:[#allocation45_spill] sm:$0xff] %v6715_v0 }
 0x1e7   : > { %v1305_v7 = vmul.f32 %v6707_v40, %v6707_v40  ;;  %v1253_v14 = vpop.xlane.xlu1 %1252  ;;  %4870 = vmatmul.mubr.msk.f32.gmra.mrb[36].mxu0 %vm1019_vm3, %v1411_v60  ;;  %v1413_v49 = vmul.f32 %v6279_v5, %v1397_v32  ;;  %v534_v5 = vld [vmem:[%s6861_s27 + $0x30] sm:$0xff] }
 0x1e8   : > { %v1336_v18 = vmax.f32 %v1320_v2, 0.0  ;;  %v1289_v10 = vmul.f32 %v6702_v28, %v1253_v14  ;;  %v1176_v38 = vpop.xlane.xlu0 %1175  ;;  %1804 = vmatprep.mubr.f32.mxu0 %v8033_v31 }
 0x1e9   : > { %v1274_v1 = vmul.f32 %v6715_v0, %v1176_v38 }
 0x1ea   : > { %v5799_v15 = vpop.eup %5798  ;;  %v1368_v47 = vadd.f32 1e-05, %v1336_v18  ;;  %v1321_v11 = vsub.f32 %v1289_v10, %v1305_v7  ;;  %v1351_v18 = vsub.f32 %v6359_v55, %v6680_v56 }
 0x1eb   : > { %v1306_v12 = vmul.f32 %v1274_v1, %v1274_v1  ;;  %v1256_v33 = vpop.xlane.xlu1 %1255  ;;  %4871 = vmatmul.mubr.msk.f32.gmra.mrb[38].mxu0 %vm1019_vm3, %v1412_v19  ;;  %v1398_v51 = vmul.f32 %v5799_v15, %v1350_v13 }
 0x1ec   : > { %v6724_v41 = vpop.eup %5800  ;;  %5804 = vrsqrt.f32 %v1368_v47  ;;  %v1337_v60 = vmax.f32 %v1321_v11, 0.0  ;;  %v1290_v2 = vmul.f32 %v6715_v0, %v1256_v33  ;;  %v1179_v14 = vpop.xlane.xlu0 %1178  ;;  %1810 = vmatprep.mubr.f32.mxu0 %v8033_v31 }
 0x1ed   : > { %8040 = vst [vmem:[#allocation46_spill] sm:$0xff] %v6724_v41  ;;  %v1275_v63 = vmul.f32 %v6724_v41, %v1179_v14  ;;  %v1414_v33 = vmul.f32 %v1398_v51, %v6306_v21  ;;  %v1353_v51 = vsub.f32 %v6429_v24, %v6707_v40 }
 0x1ee   : > { %v1369_v7 = vadd.f32 1e-05, %v1337_v60  ;;  %v1322_v6 = vsub.f32 %v1290_v2, %v1306_v12  ;;  %v1352_v12 = vsub.f32 %v6425_v22, %v6694_v17  ;;  %v1354_v17 = vsub.f32 %v6433_v25, %v1274_v1 }
 0x1ef   : > { %v1307_v10 = vmul.f32 %v1275_v63, %v1275_v63  ;;  %v1259_v38 = vpop.xlane.xlu1 %1258  ;;  %4872 = vmatmul.mubr.msk.f32.gmra.mrb[40].mxu0 %vm1019_vm3, %v1413_v49  ;;  %v1355_v40 = vsub.f32 %v6437_v26, %v1275_v63  ;;  %v1632_v63 = vld [vmem:[%s7912_s7] sm:$0x3] }
 0x1f0   : > { %v5803_v19 = vpop.eup %5802  ;;  %5806 = vrsqrt.f32 %v1369_v7  ;;  %v1338_v47 = vmax.f32 %v1322_v6, 0.0  ;;  %v1291_v11 = vmul.f32 %v6724_v41, %v1259_v38  ;;  %1816 = vmatprep.mubr.f32.mxu0 %v8033_v31 }
 0x1f1   : > { %v1399_v32 = vmul.f32 %v5803_v19, %v1351_v18 }
 0x1f2   : > { %v1370_v15 = vadd.f32 1e-05, %v1338_v47  ;;  %v1323_v13 = vsub.f32 %v1291_v11, %v1307_v10 }
 0x1f3   : > { %4873 = vmatmul.mubr.msk.f32.gmra.mrb[42].mxu0 %vm1019_vm3, %v1414_v33  ;;  %v1415_v60 = vmul.f32 %v6296_v16, %v1399_v32  ;;  %v5989_v32 = vmov 0  }
 0x1f4   : > { %5808 = vrsqrt.f32 %v1370_v15  ;;  %v1339_v56 = vmax.f32 %v1323_v13, 0.0  ;;  %1822 = vmatprep.mubr.f32.mxu0 %v8033_v31  ;;  %5666 = vset.pattern.permute.xlu0 %v5989_v32  ;;  %v1532_v15 = vlaneseq }
 0x1f5   : > { %5667 = vset.pattern.permute.xlu1 %v5989_v32 }
 0x1f6   : > { %v5805_v2 = vpop.eup %5804  ;;  %v1371_v14 = vadd.f32 1e-05, %v1339_v56  ;;  %v1533_v13 = vshrl.u32 %v1532_v15, 7 }
 0x1f7   : > { %4874 = vmatmul.mubr.msk.f32.gmra.mrb[44].mxu0 %vm1019_vm3, %v1415_v60  ;;  %v1400_v49 = vmul.f32 %v5805_v2, %v1352_v12 }
 0x1f8   : > { %5810 = vrsqrt.f32 %v1371_v14  ;;  %1828 = vmatprep.mubr.f32.mxu0 %v8033_v31  ;;  %v6758_v56 = vsub.s32 0, %v1533_v13  ;;  %v1640_v12 = vsub.s32 1, %v1533_v13 }
 0x1f9   : > { %v1416_v7 = vmul.f32 %v1400_v49, %v6325_v30 }
 0x1fa   : > { %v5807_v6 = vpop.eup %5806  ;;  %v6764_v60 = vrot.slane %v1632_v63, %v6758_v56  ;;  %v6766_v2 = vrot.slane %v1632_v63, %v1640_v12 }
 0x1fb   : > { %4875 = vmatmul.mubr.msk.f32.gmra.mrb[46].mxu0 %vm1019_vm3, %v1416_v7  ;;  %v1401_v18 = vmul.f32 %v5807_v6, %v1353_v51 }
 0x1fc   : > { %1834 = vmatprep.mubr.f32.mxu0 %v8033_v31 }
 0x1fd   : > { %v1417_v10 = vmul.f32 %v6316_v27, %v1401_v18 }
 0x1fe   : > { %v5809_v38 = vpop.eup %5808 }
 0x1ff   : > { %4876 = vmatmul.mubr.msk.f32.gmra.mrb[48].mxu0 %vm1019_vm3, %v1417_v10  ;;  %v1402_v19 = vmul.f32 %v5809_v38, %v1354_v17 }
 0x200   : > { %1840 = vmatprep.mubr.f32.mxu0 %v8033_v31 }
 0x201   : > { %v1418_v47 = vmul.f32 %v1402_v19, %v6344_v45 }
 0x202   : > { %v5811_v11 = vpop.eup %5810 }
 0x203   : > { %4877 = vmatmul.mubr.msk.f32.gmra.mrb[50].mxu0 %vm1019_vm3, %v1418_v47  ;;  %v1403_v33 = vmul.f32 %v5811_v11, %v1355_v40 }
 0x204   : > { %1846 = vmatprep.mubr.f32.mxu0 %v8033_v31 }
 0x205   : > { %v1419_v1 = vmul.f32 %v6342_v43, %v1403_v33 }
 0x207   : > { %4878 = vmatmul.mubr.msk.f32.gmra.mrb[52].mxu0 %vm1019_vm3, %v1419_v1 }
 0x29e   : > { %v1758_v14 = vpop.f32.mrb[22].mxu0 }
 0x29f   : > { %v6769_v49 = vadd.f32 %v1758_v14, %v6764_v60  ;;  %v1760_v51 = vpop.f32.mrb[23].mxu0 }
 0x2a0   : > { %v6772_v7 = vadd.f32 %v1760_v51, %v6766_v2 }
 0x2a1   : > { %5197 = vmatprep.mubr.msk.f32.mxu1 %vm1019_vm3, %v6769_v49 }
 0x2a2   : > { %v1764_v18 = vpop.f32.mrb[24].mxu0 }
 0x2a3   : > { %v6779_v17 = vadd.f32 %v1764_v18, %v6764_v60  ;;  %v6781_v10 = vpop.f32.mrb[25].mxu0 }
 0x2a5   : > { %v5626_v38 = vpack.i.bf16 %v6779_v17, %v6769_v49 }
 0x2a6   : > { %v1770_v19 = vpop.f32.mrb[26].mxu0 }
 0x2a7   : > { %5627 = vrot.lane.b32.xlu0 %v5626_v38, %s5990_s5  ;;  %v6786_v40 = vpop.f32.mrb[27].mxu0  ;;  %v6789_v11 = vadd.f32 %v1770_v19, %v6764_v60 }
 0x2aa   : > { %v1776_v47 = vpop.f32.mrb[28].mxu0 }
 0x2ab   : > { %v6792_v33 = vadd.f32 %v1776_v47, %v6764_v60  ;;  %v6794_v1 = vpop.f32.mrb[29].mxu0 }
 0x2ad   : > { %v5631_v32 = vpack.i.bf16 %v6792_v33, %v6789_v11 }
 0x2ae   : > { %v1782_v15 = vpop.f32.mrb[30].mxu0 }
 0x2af   : > { %5632 = vrot.lane.b32.xlu1 %v5631_v32, %s5990_s5  ;;  %v6799_v13 = vpop.f32.mrb[31].mxu0  ;;  %v6802_v12 = vadd.f32 %v1782_v15, %v6764_v60 }
 0x2b2   : > { %v1788_v63 = vpop.f32.mrb[32].mxu0 }
 0x2b3   : > { %v6805_v14 = vadd.f32 %v1788_v63, %v6764_v60  ;;  %v6807_v51 = vpop.f32.mrb[33].mxu0 }
 0x2b5   : > { %v5636_v18 = vpack.i.bf16 %v6805_v14, %v6802_v12 }
 0x2b6   : > { %v1794_v38 = vpop.f32.mrb[34].mxu0 }
 0x2b7   : > { %v6811_v19 = vpop.f32.mrb[35].mxu0  ;;  %5637 = vrot.lane.b32.xlu1 %v5636_v18, %s5990_s5  ;;  %v6815_v32 = vadd.f32 %v1794_v38, %v6764_v60 }
 0x2ba   : > { %v1800_v47 = vpop.f32.mrb[36].mxu0 }
 0x2bb   : > { %v6818_v15 = vadd.f32 %v1800_v47, %v6764_v60  ;;  %v6820_v63 = vpop.f32.mrb[37].mxu0 }
 0x2bd   : > { %v5641_v6 = vpack.i.bf16 %v6818_v15, %v6815_v32 }
 0x2be   : > { %v1806_v0 = vpop.f32.mrb[38].mxu0 }
 0x2bf   : > { %5642 = vrot.lane.b32.xlu1 %v5641_v6, %s5990_s5  ;;  %v6825_v41 = vpop.f32.mrb[39].mxu0  ;;  %v6828_v18 = vadd.f32 %v1806_v0, %v6764_v60 }
 0x2c2   : > { %v1812_v36 = vpop.f32.mrb[40].mxu0 }
 0x2c3   : > { %v6831_v38 = vadd.f32 %v1812_v36, %v6764_v60  ;;  %v6833_v28 = vpop.f32.mrb[41].mxu0 }
 0x2c5   : > { %v5646_v47 = vpack.i.bf16 %v6831_v38, %v6828_v18 }
 0x2c6   : > { %v1818_v57 = vpop.f32.mrb[42].mxu0 }
 0x2c7   : > { %5647 = vrot.lane.b32.xlu0 %v5646_v47, %s5990_s5  ;;  %v6839_v6 = vpop.f32.mrb[43].mxu0  ;;  %v6844_v0 = vadd.f32 %v1818_v57, %v6764_v60 }
 0x2ca   : > { %v1824_v48 = vpop.f32.mrb[44].mxu0 }
 0x2cb   : > { %v6847_v36 = vadd.f32 %v1824_v48, %v6764_v60  ;;  %v6849_v53 = vpop.f32.mrb[45].mxu0 }
 0x2cd   : > { %v5651_v39 = vpack.i.bf16 %v6847_v36, %v6844_v0 }
 0x2ce   : > { %v1830_v4 = vpop.f32.mrb[46].mxu0 }
 0x2cf   : > { %5652 = vrot.lane.b32.xlu1 %v5651_v39, %s5990_s5  ;;  %v1832_v47 = vpop.f32.mrb[47].mxu0  ;;  %v6864_v48 = vadd.f32 %v1830_v4, %v6764_v60 }
 0x2d0   : > { %v6856_v25 = vadd.f32 %v1832_v47, %v6766_v2  ;;  %v528_v47 = vld [vmem:[%s6861_s27] sm:$0xff] }
 0x2d1   : > { %v1420_v30 = vsub.f32 1.0, %v528_v47  ;;  %v529_v47 = vld [vmem:[%s6861_s27 + $0x8] sm:$0xff] }
 0x2d2   : > { %v1836_v57 = vpop.f32.mrb[48].mxu0 }
 0x2d3   : > { %v6867_v26 = vadd.f32 %v1836_v57, %v6764_v60  ;;  %v1838_v45 = vpop.f32.mrb[49].mxu0  ;;  %v531_v57 = vld [vmem:[%s6861_s27 + $0x18] sm:$0xff] }
 0x2d4   : > { %v6870_v39 = vadd.f32 %v1838_v45, %v6766_v2  ;;  %v1423_v21 = vsub.f32 1.0, %v531_v57 }
 0x2d5   : > { %v5656_v43 = vpack.i.bf16 %v6867_v26, %v6864_v48 }
 0x2d6   : > { %v1842_v22 = vpop.f32.mrb[50].mxu0 }
 0x2d7   : > { %5657 = vrot.lane.b32.xlu0 %v5656_v43, %s5990_s5  ;;  %v1844_v24 = vpop.f32.mrb[51].mxu0  ;;  %v6881_v45 = vadd.f32 %v1842_v22, %v6764_v60  ;;  %v1421_v22 = vsub.f32 1.0, %v529_v47  ;;  %v1426_v47 = vsub.f32 1.0, %v534_v5 }
 0x2d8   : > { %v6877_v4 = vadd.f32 %v1844_v24, %v6766_v2  ;;  %v533_v24 = vld [vmem:[%s6861_s27 + $0x28] sm:$0xff] }
 0x2da   : > { %v1848_v27 = vpop.f32.mrb[52].mxu0 }
 0x2db   : > { %v6884_v54 = vadd.f32 %v1848_v27, %v6764_v60  ;;  %1446 = vperm.xlu0 %5666, %v1420_v30   ;;  %v1850_v55 = vpop.f32.mrb[53].mxu0  ;;  %v1425_v27 = vsub.f32 1.0, %v533_v24  ;;  %v535_v30 = vld [vmem:[%s6861_s27 + $0x38] sm:$0xff]  ;;  %v530_v60 = vld [vmem:[%s6861_s27 + $0x10] sm:$0xff] }
 0x2dc   : > { %v6887_v43 = vadd.f32 %v1850_v55, %v6766_v2  ;;  %v1427_v55 = vsub.f32 1.0, %v535_v30  ;;  %v1422_v57 = vsub.f32 1.0, %v530_v60 }
 0x2dd   : > { %v5661_v16 = vpack.i.bf16 %v6884_v54, %v6881_v45 }
 0x2df   : > { %1461 = vperm.xlu0 %5666, %v1423_v21   ;;  %5662 = vrot.lane.b32.xlu1 %v5661_v16, %s5990_s5  ;;  %v1429_v21 = vsub.f32 1.0, %v537_v29  ;;  %v539_v16 = vld [vmem:[%s6861_s27 + $0x58] sm:$0xff] }
 0x2e0   : > { %v1431_v24 = vsub.f32 1.0, %v539_v16 }
 0x2e3   : > { %1471 = vperm.xlu0 %5666, %v1425_v27   ;;  %1451 = vperm.xlu1 %5667, %v1421_v22   ;;  %v541_v27 = vld [vmem:[%s6861_s27 + $0x68] sm:$0xff]  ;;  %v536_v22 = vld [vmem:[%s6861_s27 + $0x40] sm:$0xff] }
 0x2e4   : > { %v1433_v30 = vsub.f32 1.0, %v541_v27  ;;  %v1428_v60 = vsub.f32 1.0, %v536_v22  ;;  %v1791_v27 = vadd.f32 %v6807_v51, %v6766_v2 }
 0x2e6   : > { %v5693_v22 = vpack.i.bf16 %v1791_v27, %v6805_v14 }
 0x2e7   : > { %1481 = vperm.xlu0 %5666, %v1427_v55   ;;  %1456 = vperm.xlu1 %5667, %v1422_v57   ;;  %v543_v55 = vld [vmem:[%s6861_s27 + $0x78] sm:$0xff]  ;;  %v540_v57 = vld [vmem:[%s6861_s27 + $0x60] sm:$0xff] }
 0x2e8   : > { %v1435_v29 = vsub.f32 1.0, %v543_v55  ;;  %v1432_v5 = vsub.f32 1.0, %v540_v57  ;;  %v1821_v57 = vadd.f32 %v6839_v6, %v6766_v2 }
 0x2eb   : > { %1491 = vperm.xlu0 %5666, %v1429_v21   ;;  %1466 = vperm.xlu1 %5667, %v1424_v9   ;;  %v1767_v21 = vadd.f32 %v6781_v10, %v6766_v2  ;;  %v542_v9 = vld [vmem:[%s6861_s27 + $0x70] sm:$0xff]  ;;  %v1773_v10 = vadd.f32 %v6786_v40, %v6766_v2  ;;  %v1827_v40 = vadd.f32 %v6849_v53, %v6766_v2  ;;  %s5928_s27 = sshll.u32 %s5992_s26, 4  ;;  %s5929_s27 = int_to_ptr.vmem [resolvable:$false] %s5928_s27 }
 0x2ec   : > { %v1803_v53 = vadd.f32 %v6820_v63, %v6766_v2 }
 0x2ed   : > { %v5673_v16 = vpack.i.bf16 %v1767_v21, %v6779_v17  ;;  %v5678_v51 = vpack.i.bf16 %v1773_v10, %v6789_v11  ;;  %v5718_v21 = vpack.i.bf16 %v1821_v57, %v6844_v0 }
 0x2ef   : > { %1501 = vperm.xlu0 %5666, %v1431_v24   ;;  %1476 = vperm.xlu1 %5667, %v1426_v47   ;;  %v1779_v24 = vadd.f32 %v6794_v1, %v6766_v2  ;;  %v1434_v47 = vsub.f32 1.0, %v542_v9  ;;  %v1815_v1 = vadd.f32 %v6833_v28, %v6766_v2 }
 0x2f1   : > { %v5683_v3 = vpack.i.bf16 %v1779_v24, %v6792_v33  ;;  %v5713_v55 = vpack.i.bf16 %v1815_v1, %v6831_v38 }
 0x2f3   : > { %1511 = vperm.xlu0 %5666, %v1433_v30   ;;  %1486 = vperm.xlu1 %5667, %v1428_v60   ;;  %v8041_v30 = vpack.i.bf16 %v6772_v7, %v6769_v49  ;;  %v1785_v60 = vadd.f32 %v6799_v13, %v6766_v2  ;;  %v1797_v49 = vadd.f32 %v6811_v19, %v6766_v2 }
 0x2f4   : > { %v5723_v7 = vpack.i.bf16 %v1827_v40, %v6847_v36 }
 0x2f5   : > { %v5688_v28 = vpack.i.bf16 %v1785_v60, %v6802_v12  ;;  %v5698_v13 = vpack.i.bf16 %v1797_v49, %v6815_v32 }
 0x2f7   : > { %1521 = vperm.xlu0 %5666, %v1435_v29   ;;  %1496 = vperm.xlu1 %5667, %v1430_v34   ;;  %v5703_v29 = vpack.i.bf16 %v1803_v53, %v6818_v15  ;;  %v1809_v34 = vadd.f32 %v6825_v41, %v6766_v2 }
 0x2f9   : > { %v5708_v19 = vpack.i.bf16 %v1809_v34, %v6828_v18 }
 0x2fb   : > { %5674 = vrot.lane.b32.xlu0 %v5673_v16, %s5991_s28  ;;  %1506 = vperm.xlu1 %5667, %v1432_v5  }
 0x2ff   : > { %5684 = vrot.lane.b32.xlu0 %v5683_v3, %s5991_s28  ;;  %1516 = vperm.xlu1 %5667, %v1434_v47  }
 0x303   : > { %5694 = vrot.lane.b32.xlu0 %v5693_v22, %s5991_s28  ;;  %5669 = vrot.lane.b32.xlu1 %v8041_v30, %s5991_s28 }
 0x307   : > { %5714 = vrot.lane.b32.xlu0 %v5713_v55, %s5991_s28  ;;  %5679 = vrot.lane.b32.xlu1 %v5678_v51, %s5991_s28 }
 0x30b   : > { %5724 = vrot.lane.b32.xlu0 %v5723_v7, %s5991_s28  ;;  %5689 = vrot.lane.b32.xlu1 %v5688_v28, %s5991_s28 }
 0x30f   : > { %5699 = vrot.lane.b32.xlu1 %v5698_v13, %s5991_s28 }
 0x313   : > { %5704 = vrot.lane.b32.xlu1 %v5703_v29, %s5991_s28 }
 0x317   : > { %5709 = vrot.lane.b32.xlu1 %v5708_v19, %s5991_s28 }
 0x319   : > { %v5628_v5 = vpop.permute.xlu0 %5627 }
 0x31a   : > { %v5630_v63 = vunpack.i.h.bf16 %v5628_v5  ;;  %v5629_v9 = vunpack.i.l.bf16 %v5628_v5 }
 0x31b   : > { %5719 = vrot.lane.b32.xlu1 %v5718_v21, %s5991_s28 }
 0x31c   : > { %v5445_v16 = vpack.c.bf16 %v5630_v63, %v5629_v9 }
 0x31e   : > { %5447 = vmatprep.subr.msk.bf16.mxu1 %vm6956_vm1, %v5445_v16 }
 0x31f   : > { %5450 = vmatpush3.bf16.xpose.msk.msra.mxu1 %vm6956_vm1, %v5445_v16 }
 0x321   : > { %v5633_v2 = vpop.permute.xlu1 %5632 }
 0x322   : > { %v5635_v6 = vunpack.i.h.bf16 %v5633_v2  ;;  %v5634_v24 = vunpack.i.l.bf16 %v5633_v2 }
 0x324   : > { %v5451_v47 = vpack.c.bf16 %v5635_v6, %v5634_v24 }
 0x326   : > { %5198 = vmatmul.mubr.msk.f32.vlgmr.msra.gmra.mrb[10].mxu1 %vm1019_vm3, %v6779_v17  ;;  %5453 = vmatprep.subr.msk.bf16.mxu1 %vm6956_vm1, %v5451_v47 }
 0x327   : > { %5456 = vmatpush3.bf16.xpose.msk.msra.mxu1 %vm6956_vm1, %v5451_v47  ;;  %5204 = vmatprep.mubr.msk.f32.mxu1 %vm1019_vm3, %v6789_v11 }
 0x329   : > { %v5638_v3 = vpop.permute.xlu1 %5637 }
 0x32a   : > { %v5640_v27 = vunpack.i.h.bf16 %v5638_v3  ;;  %v5639_v10 = vunpack.i.l.bf16 %v5638_v3 }
 0x32c   : > { %v5457_v22 = vpack.c.bf16 %v5640_v27, %v5639_v10 }
 0x32e   : > { %5205 = vmatmul.mubr.msk.f32.vlgmr.msra.gmra.mrb[12].mxu1 %vm1019_vm3, %v6792_v33  ;;  %5459 = vmatprep.subr.msk.bf16.mxu1 %vm6956_vm1, %v5457_v22 }
 0x32f   : > { %5462 = vmatpush3.bf16.xpose.msk.msra.mxu1 %vm6956_vm1, %v5457_v22  ;;  %5211 = vmatprep.mubr.msk.f32.mxu1 %vm1019_vm3, %v6802_v12 }
 0x331   : > { %v5643_v17 = vpop.permute.xlu1 %5642 }
 0x332   : > { %v5645_v1 = vunpack.i.h.bf16 %v5643_v17  ;;  %v5644_v30 = vunpack.i.l.bf16 %v5643_v17 }
 0x334   : > { %v5463_v11 = vpack.c.bf16 %v5645_v1, %v5644_v30 }
 0x336   : > { %5212 = vmatmul.mubr.msk.f32.vlgmr.msra.gmra.mrb[14].mxu1 %vm1019_vm3, %v6805_v14  ;;  %5465 = vmatprep.subr.msk.bf16.mxu1 %vm6956_vm1, %v5463_v11 }
 0x337   : > { %5468 = vmatpush3.bf16.xpose.msk.msra.mxu1 %vm6956_vm1, %v5463_v11  ;;  %5218 = vmatprep.mubr.msk.f32.mxu1 %vm1019_vm3, %v6815_v32 }
 0x339   : > { %v5648_v33 = vpop.permute.xlu0 %5647 }
 0x33a   : > { %v5650_v51 = vunpack.i.h.bf16 %v5648_v33  ;;  %v5649_v60 = vunpack.i.l.bf16 %v5648_v33 }
 0x33c   : > { %v5469_v12 = vpack.c.bf16 %v5650_v51, %v5649_v60 }
 0x33e   : > { %5219 = vmatmul.mubr.msk.f32.vlgmr.msra.gmra.mrb[16].mxu1 %vm1019_vm3, %v6818_v15  ;;  %5471 = vmatprep.subr.msk.bf16.mxu1 %vm6956_vm1, %v5469_v12 }
 0x33f   : > { %5474 = vmatpush3.bf16.xpose.msk.msra.mxu1 %vm6956_vm1, %v5469_v12  ;;  %5225 = vmatprep.mubr.msk.f32.mxu1 %vm1019_vm3, %v6828_v18 }
 0x341   : > { %v5653_v14 = vpop.permute.xlu1 %5652 }
 0x342   : > { %v5655_v55 = vunpack.i.h.bf16 %v5653_v14  ;;  %v5654_v40 = vunpack.i.l.bf16 %v5653_v14 }
 0x344   : > { %v5475_v32 = vpack.c.bf16 %v5655_v55, %v5654_v40 }
 0x346   : > { %5226 = vmatmul.mubr.msk.f32.vlgmr.msra.gmra.mrb[18].mxu1 %vm1019_vm3, %v6831_v38  ;;  %5477 = vmatprep.subr.msk.bf16.mxu1 %vm6956_vm1, %v5475_v32 }
 0x347   : > { %5480 = vmatpush3.bf16.xpose.msk.msra.mxu1 %vm6956_vm1, %v5475_v32  ;;  %5232 = vmatprep.mubr.msk.f32.mxu1 %vm1019_vm3, %v6844_v0 }
 0x349   : > { %v5658_v15 = vpop.permute.xlu0 %5657 }
 0x34a   : > { %v5660_v28 = vunpack.i.h.bf16 %v5658_v15  ;;  %v5659_v49 = vunpack.i.l.bf16 %v5658_v15 }
 0x34c   : > { %v5481_v18 = vpack.c.bf16 %v5660_v28, %v5659_v49 }
 0x34e   : > { %5233 = vmatmul.mubr.msk.f32.vlgmr.msra.gmra.mrb[20].mxu1 %vm1019_vm3, %v6847_v36  ;;  %5483 = vmatprep.subr.msk.bf16.mxu1 %vm6956_vm1, %v5481_v18 }
 0x34f   : > { %5486 = vmatpush3.bf16.xpose.msk.msra.mxu1 %vm6956_vm1, %v5481_v18  ;;  %5239 = vmatprep.mubr.msk.f32.mxu1 %vm1019_vm3, %v6864_v48 }
 0x351   : > { %v5663_v38 = vpop.permute.xlu1 %5662 }
 0x352   : > { %v5665_v7 = vunpack.i.h.bf16 %v5663_v38  ;;  %v5664_v13 = vunpack.i.l.bf16 %v5663_v38 }
 0x354   : > { %v5487_v0 = vpack.c.bf16 %v5665_v7, %v5664_v13 }
 0x356   : > { %5240 = vmatmul.mubr.msk.f32.vlgmr.msra.gmra.mrb[22].mxu1 %vm1019_vm3, %v6867_v26  ;;  %5489 = vmatprep.subr.msk.bf16.mxu1 %vm6956_vm1, %v5487_v0 }
 0x357   : > { %5492 = vmatpush3.bf16.xpose.msk.msra.mxu1 %vm6956_vm1, %v5487_v0  ;;  %5246 = vmatprep.mubr.msk.f32.mxu1 %vm1019_vm3, %v6881_v45 }
 0x35a   : > { %v7020_v36 = vpop.permute.xlu0 %1446 }
 0x35e   : > { %v7022_v53 = vpop.permute.xlu0 %1461  ;;  %5247 = vmatmul.mubr.msk.f32.vlgmr.msra.gmra.mrb[24].mxu1 %vm1019_vm3, %v6884_v54 }
 0x362   : > { %v7026_v29 = vpop.permute.xlu1 %1451  ;;  %v7028_v34 = vpop.permute.xlu0 %1471 }
 0x366   : > { %v7030_v19 = vpop.permute.xlu1 %1456  ;;  %v7032_v57 = vpop.permute.xlu0 %1481 }
 0x36a   : > { %v7034_v21 = vpop.permute.xlu1 %1466  ;;  %v7036_v5 = vpop.permute.xlu0 %1491 }
 0x36e   : > { %v7038_v63 = vpop.permute.xlu1 %1476  ;;  %v7040_v9 = vpop.permute.xlu0 %1501 }
 0x372   : > { %v7042_v41 = vpop.permute.xlu1 %1486  ;;  %v7044_v16 = vpop.permute.xlu0 %1511 }
 0x376   : > { %v7046_v2 = vpop.permute.xlu1 %1496  ;;  %v7048_v6 = vpop.permute.xlu0 %1521 }
 0x37a   : > { %v7050_v24 = vpop.permute.xlu1 %1506  ;;  %v5675_v47 = vpop.permute.xlu0 %5674 }
 0x37b   : > { %v5677_v10 = vunpack.i.h.bf16 %v5675_v47  ;;  %v5676_v22 = vunpack.i.l.bf16 %v5675_v47 }
 0x37d   : > { %v2786_v60 = vsel %vm2784_vm4, %v5676_v22, %v5677_v10 }
 0x37e   : > { %v7052_v3 = vpop.permute.xlu1 %1516  ;;  %v5685_v27 = vpop.permute.xlu0 %5684 }
 0x37f   : > { %v5687_v11 = vunpack.i.h.bf16 %v5685_v27  ;;  %v5686_v33 = vunpack.i.l.bf16 %v5685_v27 }
 0x381   : > { %v2881_v18 = vsel %vm2784_vm4, %v5686_v33, %v5687_v11 }
 0x382   : > { %v5670_v17 = vpop.permute.xlu1 %5669  ;;  %v5695_v12 = vpop.permute.xlu0 %5694 }
 0x383   : > { %v5672_v1 = vunpack.i.h.bf16 %v5670_v17  ;;  %v5671_v30 = vunpack.i.l.bf16 %v5670_v17  ;;  %v5697_v15 = vunpack.i.h.bf16 %v5695_v12  ;;  %v5696_v28 = vunpack.i.l.bf16 %v5695_v12 }
 0x385   : > { %v2785_v51 = vsel %vm2784_vm4, %v5671_v30, %v5672_v1  ;;  %v2976_v27 = vsel %vm2784_vm4, %v5696_v28, %v5697_v15 }
 0x386   : > { %v5680_v14 = vpop.permute.xlu1 %5679  ;;  %v5493_v55 = vpack.c.bf16 %v2786_v60, %v2785_v51  ;;  %v5715_v30 = vpop.permute.xlu0 %5714 }
 0x387   : > { %v5682_v40 = vunpack.i.h.bf16 %v5680_v14  ;;  %v5681_v32 = vunpack.i.l.bf16 %v5680_v14  ;;  %v5717_v60 = vunpack.i.h.bf16 %v5715_v30  ;;  %v5716_v12 = vunpack.i.l.bf16 %v5715_v30 }
 0x388   : > { %5494 = vmatprep.subr.bf16.mxu1 %v5493_v55 }
 0x389   : > { %5496 = vmatpush3.bf16.msra.mxu1 %v5493_v55  ;;  %v2880_v49 = vsel %vm2784_vm4, %v5681_v32, %v5682_v40 }
 0x38a   : > { %v5690_v38 = vpop.permute.xlu1 %5689  ;;  %v5497_v7 = vpack.c.bf16 %v2881_v18, %v2880_v49  ;;  %v3166_v18 = vsel %vm2784_vm4, %v5716_v12, %v5717_v60 }
 0x38b   : > { %v5692_v13 = vunpack.i.h.bf16 %v5690_v38  ;;  %v5691_v0 = vunpack.i.l.bf16 %v5690_v38 }
 0x38c   : > { %5498 = vmatprep.subr.bf16.mxu0 %v5497_v7 }
 0x38d   : > { %5500 = vmatpush3.bf16.msra.mxu0 %v5497_v7  ;;  %v2975_v47 = vsel %vm2784_vm4, %v5691_v0, %v5692_v13  ;;  %v544_v7 = vld [vmem:[%s7076_s1] sm:$0x1] }
 0x38e   : > { %v5700_v10 = vpop.permute.xlu1 %5699  ;;  %v7060_v22 = vpack.c.bf16 %v2976_v27, %v2975_v47  ;;  %v1436_v13 = vsub.f32 1.0, %v544_v7  ;;  %v545_v47 = vld [vmem:[%s7076_s1 + $0x1] sm:$0x1] }
 0x38f   : > { %v5702_v17 = vunpack.i.h.bf16 %v5700_v10  ;;  %v5701_v1 = vunpack.i.l.bf16 %v5700_v10 }
 0x390   : > { %5502 = vmatprep.subr.bf16.mxu1 %v7060_v22  ;;  %v1535_v0 = vrot.slane %v1436_v13, %v6758_v56 }
 0x391   : > { %v3070_v14 = vsel %vm2784_vm4, %v5701_v1, %v5702_v17  ;;  %v1437_v17 = vsub.f32 1.0, %v545_v47 }
 0x392   : > { %v5705_v11 = vpop.permute.xlu1 %5704  ;;  %v1573_v27 = vmul.f32 %v1535_v0, %v7026_v29  ;;  %v1572_v10 = vmul.f32 %v1535_v0, %v7020_v36 }
 0x393   : > { %v5707_v33 = vunpack.i.h.bf16 %v5705_v11  ;;  %v5706_v51 = vunpack.i.l.bf16 %v5705_v11  ;;  %v1539_v1 = vrot.slane %v1437_v17, %v6758_v56  ;;  %v546_v11 = vld [vmem:[%s7076_s1 + $0x2] sm:$0x1] }
 0x394   : > { %vm1589_vm5 = vcmp.gt.f32.partialorder %v1573_v27, 0.5  ;;  %vm1588_vm6 = vcmp.gt.f32.partialorder %v1572_v10, 0.5 }
 0x395   : > { %v3071_v55 = vsel %vm2784_vm4, %v5706_v51, %v5707_v33  ;;  %v1605_v30 = vsel %vm1589_vm5, -1e+09, %v8033_v31  ;;  %v1604_v51 = vsel %vm1588_vm6, -1e+09, %v8033_v31  ;;  %v1575_v29 = vmul.f32 %v1539_v1, %v7022_v53  ;;  %v547_v53 = vld [vmem:[%s7076_s1 + $0x3] sm:$0x1] }
 0x396   : > { %v5710_v40 = vpop.permute.xlu1 %5709  ;;  %v7065_v32 = vpack.c.bf16 %v3071_v55, %v3070_v14  ;;  %v1438_v55 = vsub.f32 1.0, %v546_v11  ;;  %v1439_v17 = vsub.f32 1.0, %v547_v53 }
 0x397   : > { %v5712_v15 = vunpack.i.h.bf16 %v5710_v40  ;;  %v5711_v28 = vunpack.i.l.bf16 %v5710_v40  ;;  %v1574_v40 = vmul.f32 %v1539_v1, %v7030_v19  ;;  %vm1591_vm8 = vcmp.gt.f32.partialorder %v1575_v29, 0.5 }
 0x398   : > { %5506 = vmatprep.subr.bf16.mxu0 %v7065_v32  ;;  %v1607_v19 = vsel %vm1591_vm8, -1e+09, %v8033_v31 }
 0x399   : > { %v3165_v49 = vsel %vm2784_vm4, %v5711_v28, %v5712_v15  ;;  %vm1590_vm9 = vcmp.gt.f32.partialorder %v1574_v40, 0.5 }
 0x39a   : > { %v7070_v38 = vpack.c.bf16 %v3166_v18, %v3165_v49  ;;  %v1543_v18 = vrot.slane %v1438_v55, %v6758_v56  ;;  %v1606_v10 = vsel %vm1590_vm9, -1e+09, %v8033_v31 }
 0x39c   : > { %v1577_v27 = vmul.f32 %v1543_v18, %v7028_v34 }
 0x39e   : > { %vm1593_vm10 = vcmp.gt.f32.partialorder %v1577_v27, 0.5 }
 0x39f   : > { %v1609_v55 = vsel %vm1593_vm10, -1e+09, %v8033_v31 }
 0x3f9   : > { %v5199_v33 = vpop.f32.mrb[10].mxu1 }
 0x3fa   : > { %v2566_v60 = vmul.f32 0.14433756, %v5199_v33  ;;  %v1933_v12 = vpop.f32.mrb[11].mxu1 }
 0x3fb   : > { %v2565_v14 = vmul.f32 0.14433756, %v1933_v12 }
 0x3fc   : > { %v7088_v36 = vadd.f32 %v2566_v60, %v1605_v30  ;;  %v1576_v30 = vmul.f32 %v1543_v18, %v7034_v21  ;;  %v548_v60 = vld [vmem:[%s7076_s1 + $0x4] sm:$0x1] }
 0x3fd   : > { %v7091_v15 = vadd.f32 %v2565_v14, %v1604_v51  ;;  %v1547_v51 = vrot.slane %v1439_v17, %v6758_v56 }
 0x3fe   : > { %v2601_v28 = vsel %vm2597_vm7, %v7088_v36, -inf  ;;  %vm1592_vm11 = vcmp.gt.f32.partialorder %v1576_v30, 0.5 }
 0x3ff   : > { %2602 = vmax.xlane.f32.xlu0 %v2601_v28  ;;  %v2598_v49 = vsel %vm2597_vm7, %v7091_v15, -inf  ;;  %v1579_v40 = vmul.f32 %v1547_v51, %v7032_v57  ;;  %v1608_v28 = vsel %vm1592_vm11, -1e+09, %v8033_v31  ;;  %v1578_v53 = vmul.f32 %v1547_v51, %v7038_v63  ;;  %v549_v57 = vld [vmem:[%s7076_s1 + $0x5] sm:$0x1] }
 0x400   : > { %2599 = vmax.xlane.f32.xlu1 %v2598_v49  ;;  %v1440_v49 = vsub.f32 1.0, %v548_v60  ;;  %v1441_v51 = vsub.f32 1.0, %v549_v57 }
 0x401   : > { %v5206_v7 = vpop.f32.mrb[12].mxu1  ;;  %vm1595_vm12 = vcmp.gt.f32.partialorder %v1579_v40, 0.5  ;;  %vm1594_vm13 = vcmp.gt.f32.partialorder %v1578_v53, 0.5 }
 0x402   : > { %v2568_v13 = vmul.f32 0.14433756, %v5206_v7  ;;  %v2022_v0 = vpop.f32.mrb[13].mxu1  ;;  %v1611_v63 = vsel %vm1595_vm12, -1e+09, %v8033_v31 }
 0x403   : > { %v2567_v47 = vmul.f32 0.14433756, %v2022_v0 }
 0x404   : > { %v7102_v1 = vadd.f32 %v2568_v13, %v1607_v19  ;;  %v1551_v19 = vrot.slane %v1440_v49, %v6758_v56 }
 0x405   : > { %v7105_v11 = vadd.f32 %v2567_v47, %v1606_v10 }
 0x406   : > { %v2607_v33 = vsel %vm2597_vm7, %v7102_v1, -inf  ;;  %v1581_v30 = vmul.f32 %v1551_v19, %v7036_v5  ;;  %v550_v5 = vld [vmem:[%s7076_s1 + $0x6] sm:$0x1] }
 0x407   : > { %2608 = vmax.xlane.f32.xlu0 %v2607_v33  ;;  %v2604_v29 = vsel %vm2597_vm7, %v7105_v11, -inf  ;;  %v1610_v33 = vsel %vm1594_vm13, -1e+09, %v8033_v31 }
 0x408   : > { %vm1597_vm14 = vcmp.gt.f32.partialorder %v1581_v30, 0.5 }
 0x409   : > { %v5213_v12 = vpop.f32.mrb[14].mxu1 }
 0x40a   : > { %v2570_v34 = vmul.f32 0.14433756, %v5213_v12  ;;  %v2111_v14 = vpop.f32.mrb[15].mxu1  ;;  %v1580_v12 = vmul.f32 %v1551_v19, %v7042_v41  ;;  %v1613_v41 = vsel %vm1597_vm14, -1e+09, %v8033_v31 }
 0x40b   : > { %v2569_v21 = vmul.f32 0.14433756, %v2111_v14  ;;  %2605 = vmax.xlane.f32.xlu0 %v2604_v29 }
 0x40c   : > { %v7116_v18 = vadd.f32 %v2570_v34, %v1609_v55  ;;  %v1555_v55 = vrot.slane %v1441_v51, %v6758_v56  ;;  %vm1596_vm15 = vcmp.gt.f32.partialorder %v1580_v12, 0.5 }
 0x40d   : > { %v7119_v7 = vadd.f32 %v2569_v21, %v1608_v28 }
 0x40e   : > { %v2613_v13 = vsel %vm2597_vm7, %v7116_v18, -inf  ;;  %v1583_v53 = vmul.f32 %v1555_v55, %v7040_v9  ;;  %v1582_v57 = vmul.f32 %v1555_v55, %v7046_v2  ;;  %v551_v9 = vld [vmem:[%s7076_s1 + $0x7] sm:$0x1] }
 0x40f   : > { %2614 = vmax.xlane.f32.xlu0 %v2613_v13  ;;  %v2610_v0 = vsel %vm2597_vm7, %v7119_v7, -inf  ;;  %v1612_v13 = vsel %vm1596_vm15, -1e+09, %v8033_v31 }
 0x410   : > { %2611 = vmax.xlane.f32.xlu1 %v2610_v0  ;;  %v1442_v0 = vsub.f32 1.0, %v550_v5  ;;  %vm1599_vm0 = vcmp.gt.f32.partialorder %v1583_v53, 0.5  ;;  %vm1598_vm2 = vcmp.gt.f32.partialorder %v1582_v57, 0.5 }
 0x411   : > { %v5220_v47 = vpop.f32.mrb[16].mxu1  ;;  %v1615_v2 = vsel %vm1599_vm0, -1e+09, %v8033_v31 }
 0x412   : > { %v2572_v27 = vmul.f32 0.14433756, %v5220_v47  ;;  %v2200_v10 = vpop.f32.mrb[17].mxu1 }
 0x413   : > { %v2571_v17 = vmul.f32 0.14433756, %v2200_v10 }
 0x414   : > { %v7130_v60 = vadd.f32 %v2572_v27, %v1611_v63  ;;  %v1559_v63 = vrot.slane %v1442_v0, %v6758_v56 }
 0x415   : > { %v7133_v34 = vadd.f32 %v2571_v17, %v1610_v33 }
 0x416   : > { %v2619_v14 = vsel %vm2597_vm7, %v7130_v60, -inf  ;;  %v1585_v12 = vmul.f32 %v1559_v63, %v7044_v16  ;;  %v1584_v5 = vmul.f32 %v1559_v63, %v7050_v24 }
 0x417   : > { %2620 = vmax.xlane.f32.xlu0 %v2619_v14  ;;  %v2616_v29 = vsel %vm2597_vm7, %v7133_v34, -inf  ;;  %v1614_v14 = vsel %vm1598_vm2, -1e+09, %v8033_v31 }
 0x418   : > { %2617 = vmax.xlane.f32.xlu1 %v2616_v29  ;;  %v1443_v29 = vsub.f32 1.0, %v551_v9  ;;  %vm1601_vm1 = vcmp.gt.f32.partialorder %v1585_v12, 0.5  ;;  %vm1600_vm5 = vcmp.gt.f32.partialorder %v1584_v5, 0.5  ;;  %v5728_v5 = vpack.i.bf16 %v6856_v25, %v6864_v48 }
 0x419   : > { %v5227_v21 = vpop.f32.mrb[18].mxu1  ;;  %v1616_v57 = vsel %vm1600_vm5, -1e+09, %v8033_v31 }
 0x41a   : > { %v2574_v40 = vmul.f32 0.14433756, %v5227_v21  ;;  %v2289_v28 = vpop.f32.mrb[19].mxu1 }
 0x41b   : > { %v2573_v49 = vmul.f32 0.14433756, %v2289_v28 }
 0x41c   : > { %v7144_v19 = vadd.f32 %v2574_v40, %v1613_v41  ;;  %v1563_v41 = vrot.slane %v1443_v29, %v6758_v56 }
 0x41d   : > { %v7147_v47 = vadd.f32 %v2573_v49, %v1612_v13  ;;  %v1617_v13 = vsel %vm1601_vm1, -1e+09, %v8033_v31 }
 0x41e   : > { %v2625_v27 = vsel %vm2597_vm7, %v7144_v19, -inf  ;;  %v1587_v0 = vmul.f32 %v1563_v41, %v7048_v6 }
 0x41f   : > { %2626 = vmax.xlane.f32.xlu0 %v2625_v27  ;;  %v2622_v10 = vsel %vm2597_vm7, %v7147_v47, -inf }
 0x420   : > { %2623 = vmax.xlane.f32.xlu1 %v2622_v10  ;;  %v1586_v10 = vmul.f32 %v1563_v41, %v7052_v3  ;;  %vm1603_vm6 = vcmp.gt.f32.partialorder %v1587_v0, 0.5 }
 0x421   : > { %v5234_v17 = vpop.f32.mrb[20].mxu1 }
 0x422   : > { %v2576_v30 = vmul.f32 0.14433756, %v5234_v17  ;;  %v2378_v33 = vpop.f32.mrb[21].mxu1  ;;  %vm1602_vm8 = vcmp.gt.f32.partialorder %v1586_v10, 0.5 }
 0x423   : > { %v2575_v51 = vmul.f32 0.14433756, %v2378_v33  ;;  %v1619_v33 = vsel %vm1603_vm6, -1e+09, %v8033_v31  ;;  %v1618_v3 = vsel %vm1602_vm8, -1e+09, %v8033_v31  ;;  %v5733_v31 = vpack.i.bf16 %v6870_v39, %v6867_v26 }
 0x424   : > { %v7158_v55 = vadd.f32 %v2576_v30, %v1615_v2 }
 0x425   : > { %v7161_v21 = vadd.f32 %v2575_v51, %v1614_v14 }
 0x426   : > { %v2631_v40 = vsel %vm2597_vm7, %v7158_v55, -inf }
 0x427   : > { %2632 = vmax.xlane.f32.xlu0 %v2631_v40  ;;  %v2628_v28 = vsel %vm2597_vm7, %v7161_v21, -inf  ;;  %v7196_v40 = vpop.permute.xlu0 %5724 }
 0x428   : > { %2629 = vmax.xlane.f32.xlu1 %v2628_v28  ;;  %v7198_v28 = vpop.permute.xlu1 %5719 }
 0x429   : > { %v5241_v16 = vpop.f32.mrb[22].mxu1 }
 0x42a   : > { %v2578_v49 = vmul.f32 0.14433756, %v5241_v16  ;;  %v2467_v53 = vpop.f32.mrb[23].mxu1 }
 0x42b   : > { %v2577_v24 = vmul.f32 0.14433756, %v2467_v53 }
 0x42c   : > { %v7171_v27 = vadd.f32 %v2578_v49, %v1617_v13 }
 0x42d   : > { %v7174_v63 = vadd.f32 %v2577_v24, %v1616_v57 }
 0x42e   : > { %v2637_v56 = vsel %vm2597_vm7, %v7171_v27, -inf }
 0x42f   : > { %2638 = vmax.xlane.f32.xlu0 %v2637_v56  ;;  %v2634_v9 = vsel %vm2597_vm7, %v7174_v63, -inf }
 0x430   : > { %2635 = vmax.xlane.f32.xlu1 %v2634_v9 }
 0x431   : > { %v5248_v17 = vpop.f32.mrb[24].mxu1 }
 0x432   : > { %v2580_v6 = vmul.f32 0.14433756, %v5248_v17  ;;  %v2556_v30 = vpop.f32.mrb[25].mxu1 }
 0x433   : > { %v2579_v2 = vmul.f32 0.14433756, %v2556_v30 }
 0x434   : > { %v7182_v51 = vadd.f32 %v2580_v6, %v1619_v33 }
 0x435   : > { %v7184_v12 = vadd.f32 %v2579_v2, %v1618_v3 }
 0x436   : > { %v2643_v14 = vsel %vm2597_vm7, %v7182_v51, -inf }
 0x437   : > { %2644 = vmax.xlane.f32.xlu0 %v2643_v14  ;;  %v2640_v29 = vsel %vm2597_vm7, %v7184_v12, -inf }
 0x438   : > { %2641 = vmax.xlane.f32.xlu1 %v2640_v29 }
 0x449   : > { %5729 = vrot.lane.b32.xlu1 %v5728_v5, %s5991_s28 }
 0x44d   : > { %5734 = vrot.lane.b32.xlu0 %v5733_v31, %s5991_s28 }
 0x48c   : > { %v2603_v41 = vpop.xlane.xlu0 %2602 }
 0x48d   : > { %v2647_v16 = vsub.f32 %v7088_v36, %v2603_v41  ;;  %v2600_v49 = vpop.xlane.xlu1 %2599 }
 0x48e   : > { %v2646_v53 = vsub.f32 %v7091_v15, %v2600_v49 }
 0x48f   : > { %v2664_v13 = vmul.f32 1.442695, %v2647_v16 }
 0x490   : > { %v2662_v24 = vmul.f32 1.442695, %v2646_v53 }
 0x491   : > { %5812 = vpow2.f32 %v2664_v13 }
 0x492   : > { %5814 = vpow2.f32 %v2662_v24 }
 0x494   : > { %v2609_v25 = vpop.xlane.xlu0 %2608 }
 0x495   : > { %v2649_v48 = vsub.f32 %v7102_v1, %v2609_v25 }
 0x497   : > { %v2668_v26 = vmul.f32 1.442695, %v2649_v48 }
 0x498   : > { %v2606_v39 = vpop.xlane.xlu0 %2605 }
 0x499   : > { %5816 = vpow2.f32 %v2668_v26  ;;  %v2648_v0 = vsub.f32 %v7105_v11, %v2606_v39 }
 0x49b   : > { %v7204_v57 = vpop.eup %5812  ;;  %v2666_v10 = vmul.f32 1.442695, %v2648_v0 }
 0x49c   : > { %v7206_v56 = vpop.eup %5814  ;;  %v2615_v36 = vpop.xlane.xlu0 %2614  ;;  %v2697_v15 = vsel %vm2597_vm7, %v7204_v57, 0.0 }
 0x49d   : > { %5818 = vpow2.f32 %v2666_v10  ;;  %v2651_v9 = vsub.f32 %v7116_v18, %v2615_v36  ;;  %v2612_v17 = vpop.xlane.xlu1 %2611  ;;  %2698 = vadd.xlane.f32.xlu0 %v2697_v15  ;;  %v2694_v1 = vsel %vm2597_vm7, %v7206_v56, 0.0 }
 0x49e   : > { %v2650_v6 = vsub.f32 %v7119_v7, %v2612_v17  ;;  %2695 = vadd.xlane.f32.xlu1 %v2694_v1 }
 0x49f   : > { %v2672_v11 = vmul.f32 1.442695, %v2651_v9 }
 0x4a0   : > { %v2670_v30 = vmul.f32 1.442695, %v2650_v6 }
 0x4a1   : > { %5820 = vpow2.f32 %v2672_v11 }
 0x4a2   : > { %5822 = vpow2.f32 %v2670_v30 }
 0x4a3   : > { %v7214_v33 = vpop.eup %5816 }
 0x4a4   : > { %v2621_v2 = vpop.xlane.xlu0 %2620  ;;  %v2703_v3 = vsel %vm2597_vm7, %v7214_v33, 0.0 }
 0x4a5   : > { %v2653_v18 = vsub.f32 %v7130_v60, %v2621_v2  ;;  %v2618_v14 = vpop.xlane.xlu1 %2617  ;;  %2704 = vadd.xlane.f32.xlu0 %v2703_v3 }
 0x4a6   : > { %v2652_v29 = vsub.f32 %v7133_v34, %v2618_v14 }
 0x4a7   : > { %v7220_v5 = vpop.eup %5818  ;;  %v2676_v7 = vmul.f32 1.442695, %v2653_v18 }
 0x4a8   : > { %v2674_v31 = vmul.f32 1.442695, %v2652_v29  ;;  %v2700_v41 = vsel %vm2597_vm7, %v7220_v5, 0.0 }
 0x4a9   : > { %5824 = vpow2.f32 %v2676_v7  ;;  %2701 = vadd.xlane.f32.xlu1 %v2700_v41 }
 0x4aa   : > { %5826 = vpow2.f32 %v2674_v31 }
 0x4ab   : > { %v7224_v16 = vpop.eup %5820 }
 0x4ac   : > { %v7226_v49 = vpop.eup %5822  ;;  %v2627_v53 = vpop.xlane.xlu0 %2626  ;;  %v2709_v60 = vsel %vm2597_vm7, %v7224_v16, 0.0 }
 0x4ad   : > { %v2655_v34 = vsub.f32 %v7144_v19, %v2627_v53  ;;  %v2624_v13 = vpop.xlane.xlu1 %2623  ;;  %2710 = vadd.xlane.f32.xlu0 %v2709_v60  ;;  %v2706_v24 = vsel %vm2597_vm7, %v7226_v49, 0.0 }
 0x4ae   : > { %v2654_v25 = vsub.f32 %v7147_v47, %v2624_v13  ;;  %2707 = vadd.xlane.f32.xlu1 %v2706_v24 }
 0x4af   : > { %v2680_v48 = vmul.f32 1.442695, %v2655_v34 }
 0x4b0   : > { %v2678_v26 = vmul.f32 1.442695, %v2654_v25 }
 0x4b1   : > { %5828 = vpow2.f32 %v2680_v48 }
 0x4b2   : > { %5830 = vpow2.f32 %v2678_v26 }
 0x4b3   : > { %v7234_v39 = vpop.eup %5824 }
 0x4b4   : > { %v7236_v0 = vpop.eup %5826  ;;  %v2633_v10 = vpop.xlane.xlu0 %2632  ;;  %v2715_v19 = vsel %vm2597_vm7, %v7234_v39, 0.0 }
 0x4b5   : > { %v2657_v36 = vsub.f32 %v7158_v55, %v2633_v10  ;;  %v2630_v15 = vpop.xlane.xlu1 %2629  ;;  %2716 = vadd.xlane.f32.xlu0 %v2715_v19  ;;  %v2712_v47 = vsel %vm2597_vm7, %v7236_v0, 0.0 }
 0x4b6   : > { %v2656_v9 = vsub.f32 %v7161_v21, %v2630_v15  ;;  %2713 = vadd.xlane.f32.xlu1 %v2712_v47  ;;  %v5738_v15 = vpack.i.bf16 %v6877_v4, %v6881_v45  ;;  %v5743_v47 = vpack.i.bf16 %v6887_v43, %v6884_v54 }
 0x4b7   : > { %v2684_v17 = vmul.f32 1.442695, %v2657_v36 }
 0x4b8   : > { %v2682_v1 = vmul.f32 1.442695, %v2656_v9 }
 0x4b9   : > { %5832 = vpow2.f32 %v2684_v17 }
 0x4ba   : > { %5834 = vpow2.f32 %v2682_v1 }
 0x4bb   : > { %v7244_v6 = vpop.eup %5828 }
 0x4bc   : > { %v7246_v11 = vpop.eup %5830  ;;  %v2639_v30 = vpop.xlane.xlu0 %2638  ;;  %v2721_v55 = vsel %vm2597_vm7, %v7244_v6, 0.0 }
 0x4bd   : > { %v2659_v2 = vsub.f32 %v7171_v27, %v2639_v30  ;;  %v2636_v3 = vpop.xlane.xlu1 %2635  ;;  %2722 = vadd.xlane.f32.xlu0 %v2721_v55  ;;  %v2718_v21 = vsel %vm2597_vm7, %v7246_v11, 0.0 }
 0x4be   : > { %v2658_v18 = vsub.f32 %v7174_v63, %v2636_v3  ;;  %2719 = vadd.xlane.f32.xlu1 %v2718_v21 }
 0x4bf   : > { %v2688_v14 = vmul.f32 1.442695, %v2659_v2 }
 0x4c0   : > { %v2686_v29 = vmul.f32 1.442695, %v2658_v18  ;;  %v5722_v18 = vunpack.i.h.bf16 %v7198_v28 }
 0x4c1   : > { %5836 = vpow2.f32 %v2688_v14  ;;  %v5721_v14 = vunpack.i.l.bf16 %v7198_v28 }
 0x4c2   : > { %5838 = vpow2.f32 %v2686_v29 }
 0x4c3   : > { %v7254_v7 = vpop.eup %5832 }
 0x4c4   : > { %v7256_v31 = vpop.eup %5834  ;;  %v2645_v41 = vpop.xlane.xlu0 %2644  ;;  %v2727_v27 = vsel %vm2597_vm7, %v7254_v7, 0.0 }
 0x4c5   : > { %v2661_v53 = vsub.f32 %v7182_v51, %v2645_v41  ;;  %2728 = vadd.xlane.f32.xlu0 %v2727_v27  ;;  %v2642_v60 = vpop.xlane.xlu1 %2641  ;;  %v2724_v63 = vsel %vm2597_vm7, %v7256_v31, 0.0 }
 0x4c6   : > { %v2660_v34 = vsub.f32 %v7184_v12, %v2642_v60  ;;  %2725 = vadd.xlane.f32.xlu1 %v2724_v63 }
 0x4c7   : > { %v2692_v13 = vmul.f32 1.442695, %v2661_v53 }
 0x4c8   : > { %v2690_v24 = vmul.f32 1.442695, %v2660_v34  ;;  %v5735_v9 = vpop.permute.xlu0 %5734 }
 0x4c9   : > { %5840 = vpow2.f32 %v2692_v13  ;;  %v5730_v17 = vpop.permute.xlu1 %5729  ;;  %v5737_v27 = vunpack.i.h.bf16 %v5735_v9  ;;  %v5736_v53 = vunpack.i.l.bf16 %v5735_v9 }
 0x4ca   : > { %5842 = vpow2.f32 %v2690_v24  ;;  %v5732_v34 = vunpack.i.h.bf16 %v5730_v17  ;;  %v5731_v13 = vunpack.i.l.bf16 %v5730_v17 }
 0x4cb   : > { %v7264_v25 = vpop.eup %5836 }
 0x4cc   : > { %v7266_v48 = vpop.eup %5838  ;;  %v2733_v26 = vsel %vm2597_vm7, %v7264_v25, 0.0 }
 0x4cd   : > { %2734 = vadd.xlane.f32.xlu0 %v2733_v26  ;;  %v2730_v51 = vsel %vm2597_vm7, %v7266_v48, 0.0 }
 0x4ce   : > { %2731 = vadd.xlane.f32.xlu1 %v2730_v51 }
 0x4d3   : > { %v7272_v10 = vpop.eup %5840 }
 0x4d4   : > { %v7274_v12 = vpop.eup %5842  ;;  %v2739_v19 = vsel %vm2597_vm7, %v7272_v10, 0.0 }
 0x4d5   : > { %2740 = vadd.xlane.f32.xlu0 %v2739_v19  ;;  %v2736_v36 = vsel %vm2597_vm7, %v7274_v12, 0.0 }
 0x4d6   : > { %2737 = vadd.xlane.f32.xlu1 %v2736_v36  ;;  %v3355_v36 = vsel %vm2784_vm4, %v5731_v13, %v5732_v34 }
 0x4e7   : > { %5739 = vrot.lane.b32.xlu1 %v5738_v15, %s5991_s28 }
 0x4eb   : > { %5744 = vrot.lane.b32.xlu0 %v5743_v47, %s5991_s28  ;;  %s491_s28 = sand.u32 1, %s5978_s30  }
 0x4ec   : > { %s4805_s18 = sshll.u32 %s491_s28, 3  ;;  %s4708_s25 = scalar_lea.sflag [#allocation3], %s491_s28 }
 0x4ed   : > { %s493_s1 = scalar_lea.vmem [#allocation2], %s4805_s18  ;;  %s5930_s18 = scalar_lea.vmem %s5929_s27, 256 }
 0x4ee   : > { %s4721_s4 = sshll.u32 %s493_s1, 4  ;;  %s7864_s4 = int_to_ptr.vmem [resolvable:$true] %s4721_s4 }
 0x4ef   : > { %s5924_s17 = scalar_lea.vmem %s7864_s4, 128  ;;  %p5931_p1 = scmp.lt.s32.totalorder %s7864_s4, %s5929_s27 }
 0x4f0   : > { %p5925_p12 = scmp.ne.s32.totalorder %s7864_s4, %s5924_s17  ;;  %p5932_p2 = scmp.lt.s32.totalorder %s5930_s18, %s5924_s17 }
 0x4f2   : > { %p5926_p13 = pnand %p5925_p12, %p6106_p5  ;;  %p5933_p3 = por %p5932_p2, %p5931_p1 }
 0x4f4   : > { %p5927_p0 = pneg %p5926_p13 }
 0x4f6   : > { %p5934_p4 = pnand %p5933_p3, %p5927_p0 }
 0x52a   : > { %v2699_v1 = vpop.xlane.xlu0 %2698 }
 0x52b   : > { %5844 = vrcp.f32 %v2699_v1  ;;  %v2696_v30 = vpop.xlane.xlu1 %2695 }
 0x52c   : > { %5846 = vrcp.f32 %v2696_v30 }
 0x532   : > { %v2705_v55 = vpop.xlane.xlu0 %2704 }
 0x533   : > { %5848 = vrcp.f32 %v2705_v55 }
 0x535   : > { %v5845_v2 = vpop.eup %5844 }
 0x536   : > { %v5847_v3 = vpop.eup %5846  ;;  %v2702_v21 = vpop.xlane.xlu1 %2701  ;;  %v2745_v45 = vmul.f32 %v5845_v2, %v7204_v57  ;;  %v5726_v57 = vunpack.i.l.bf16 %v7196_v40 }
 0x537   : > { %5850 = vrcp.f32 %v2702_v21  ;;  %v2743_v4 = vmul.f32 %v5847_v3, %v7206_v56  ;;  %v5727_v56 = vunpack.i.h.bf16 %v7196_v40 }
 0x539   : > { %5253 = vmatprep.mubr.msk.f32.mxu1 %vm2597_vm7, %v2743_v4  ;;  %v3261_v28 = vsel %vm2784_vm4, %v5726_v57, %v5727_v56  ;;  %v3537_v57 = vld [vmem:[%s7913_s8 + $0x10] sm:$0xff] }
 0x53a   : > { %v2711_v54 = vpop.xlane.xlu0 %2710  ;;  %5254 = vmatmul.mubr.msk.f32.vlgmr.msra.gmra.mrb[26].mxu1 %vm2597_vm7, %v2745_v45 }
 0x53b   : > { %5852 = vrcp.f32 %v2711_v54  ;;  %5504 = vmatpush3.bf16.msra.mxu1 %v7060_v22  ;;  %v2708_v43 = vpop.xlane.xlu1 %2707  ;;  %v3260_v22 = vsel %vm2784_vm4, %v5721_v14, %v5722_v18 }
 0x53c   : > { %5510 = vmatprep.subr.bf16.mxu1 %v7070_v38  ;;  %5854 = vrcp.f32 %v2708_v43  ;;  %v5513_v51 = vpack.c.bf16 %v3261_v28, %v3260_v22  ;;  %v3539_v28 = vld [vmem:[%s7913_s8 + $0x20] sm:$0xff] }
 0x53d   : > { %v5849_v29 = vpop.eup %5848 }
 0x53e   : > { %v2749_v24 = vmul.f32 %v5849_v29, %v7214_v33  ;;  %v3356_v33 = vsel %vm2784_vm4, %v5736_v53, %v5737_v27 }
 0x53f   : > { %v5517_v9 = vpack.c.bf16 %v3356_v33, %v3355_v36 }
 0x541   : > { %v5851_v41 = vpop.eup %5850 }
 0x542   : > { %v2717_v60 = vpop.xlane.xlu0 %2716  ;;  %v2747_v63 = vmul.f32 %v5851_v41, %v7220_v5  ;;  %v3538_v41 = vld [vmem:[%s7913_s8 + $0x18] sm:$0xff] }
 0x543   : > { %5856 = vrcp.f32 %v2717_v60  ;;  %v2714_v26 = vpop.xlane.xlu1 %2713 }
 0x544   : > { %5858 = vrcp.f32 %v2714_v26  ;;  %5260 = vmatprep.mubr.msk.f32.mxu0 %vm2597_vm7, %v2747_v63 }
 0x545   : > { %v5853_v40 = vpop.eup %5852  ;;  %5261 = vmatmul.mubr.msk.f32.vlgmr.msra.gmra.mrb[54].mxu0 %vm2597_vm7, %v2749_v24  ;;  %v5529_v24 = vpack.c.bf16 %v3538_v41, %v3537_v57 }
 0x546   : > { %v5855_v19 = vpop.eup %5854  ;;  %5508 = vmatpush3.bf16.msra.mxu0 %v7065_v32  ;;  %v2753_v15 = vmul.f32 %v5853_v40, %v7224_v16  ;;  %v3540_v40 = vld [vmem:[%s7913_s8 + $0x28] sm:$0xff] }
 0x547   : > { %5514 = vmatprep.subr.bf16.mxu0 %v5513_v51  ;;  %v2751_v5 = vmul.f32 %v5855_v19, %v7226_v49 }
 0x549   : > { %5267 = vmatprep.mubr.msk.f32.mxu1 %vm2597_vm7, %v2751_v5 }
 0x54a   : > { %v2723_v47 = vpop.xlane.xlu0 %2722  ;;  %5268 = vmatmul.mubr.msk.f32.vlgmr.msra.gmra.mrb[28].mxu1 %vm2597_vm7, %v2753_v15 }
 0x54b   : > { %5860 = vrcp.f32 %v2723_v47  ;;  %5512 = vmatpush3.bf16.msra.mxu1 %v7070_v38  ;;  %v2720_v17 = vpop.xlane.xlu1 %2719  ;;  %v3535_v38 = vld [vmem:[%s7913_s8] sm:$0xff] }
 0x54c   : > { %5862 = vrcp.f32 %v2720_v17  ;;  %5518 = vmatprep.subr.bf16.mxu1 %v5517_v9 }
 0x54d   : > { %v5857_v32 = vpop.eup %5856 }
 0x54e   : > { %v5859_v49 = vpop.eup %5858  ;;  %v2757_v30 = vmul.f32 %v5857_v32, %v7234_v39 }
 0x54f   : > { %v2755_v1 = vmul.f32 %v5859_v49, %v7236_v0  ;;  %v3536_v0 = vld [vmem:[%s7913_s8 + $0x8] sm:$0xff] }
 0x550   : > { %v5525_v4 = vpack.c.bf16 %v3536_v0, %v3535_v38 }
 0x551   : > { %5274 = vmatprep.mubr.msk.f32.mxu0 %vm2597_vm7, %v2755_v1 }
 0x552   : > { %v2729_v16 = vpop.xlane.xlu0 %2728  ;;  %5275 = vmatmul.mubr.msk.f32.vlgmr.msra.gmra.mrb[56].mxu0 %vm2597_vm7, %v2757_v30 }
 0x553   : > { %5864 = vrcp.f32 %v2729_v16  ;;  %5516 = vmatpush3.bf16.msra.mxu0 %v5513_v51  ;;  %v2726_v55 = vpop.xlane.xlu1 %2725  ;;  %v5533_v51 = vpack.c.bf16 %v3540_v40, %v3539_v28 }
 0x554   : > { %5866 = vrcp.f32 %v2726_v55 }
 0x555   : > { %v5861_v2 = vpop.eup %5860 }
 0x556   : > { %v5863_v3 = vpop.eup %5862  ;;  %v2761_v21 = vmul.f32 %v5861_v2, %v7244_v6 }
 0x557   : > { %v2759_v39 = vmul.f32 %v5863_v3, %v7246_v11 }
 0x559   : > { %5281 = vmatprep.mubr.msk.f32.mxu1 %vm2597_vm7, %v2759_v39  ;;  %v7369_v39 = vld [vmem:[%s7914_s9] ss:$0 sm:$0xff] }
 0x55a   : > { %v2735_v45 = vpop.xlane.xlu0 %2734  ;;  %5282 = vmatmul.mubr.msk.f32.vlgmr.msra.gmra.mrb[30].mxu1 %vm2597_vm7, %v2761_v21 }
 0x55b   : > { %5868 = vrcp.f32 %v2735_v45  ;;  %5520 = vmatpush3.bf16.msra.mxu1 %v5517_v9  ;;  %v2732_v54 = vpop.xlane.xlu1 %2731 }
 0x55c   : > { %5870 = vrcp.f32 %v2732_v54  ;;  %5526 = vmatprep.subr.bf16.mxu1 %v5525_v4 }
 0x55d   : > { %v5865_v43 = vpop.eup %5864 }
 0x55e   : > { %v5867_v18 = vpop.eup %5866  ;;  %v2765_v29 = vmul.f32 %v5865_v43, %v7254_v7 }
 0x55f   : > { %v2763_v14 = vmul.f32 %v5867_v18, %v7256_v31 }
 0x561   : > { %5288 = vmatprep.mubr.msk.f32.mxu0 %vm2597_vm7, %v2763_v14 }
 0x562   : > { %v2741_v6 = vpop.xlane.xlu0 %2740  ;;  %5289 = vmatmul.mubr.msk.f32.vlgmr.msra.gmra.mrb[58].mxu0 %vm2597_vm7, %v2765_v29 }
 0x563   : > { %5872 = vrcp.f32 %v2741_v6  ;;  %v2738_v11 = vpop.xlane.xlu1 %2737 }
 0x564   : > { %5874 = vrcp.f32 %v2738_v11  ;;  %v8044_v11 = vld [vmem:[#allocation25_spill] sm:$0xff] }
 0x565   : > { %v5869_v56 = vpop.eup %5868 }
 0x566   : > { %v5871_v31 = vpop.eup %5870  ;;  %v5745_v27 = vpop.permute.xlu0 %5744  ;;  %v2769_v22 = vmul.f32 %v5869_v56, %v7264_v25 }
 0x567   : > { %v5747_v7 = vunpack.i.h.bf16 %v5745_v27  ;;  %v5746_v53 = vunpack.i.l.bf16 %v5745_v27  ;;  %v5740_v60 = vpop.permute.xlu1 %5739  ;;  %v2767_v63 = vmul.f32 %v5871_v31, %v7266_v48 }
 0x568   : > { %v5742_v34 = vunpack.i.h.bf16 %v5740_v60  ;;  %v5741_v13 = vunpack.i.l.bf16 %v5740_v60 }
 0x569   : > { %5295 = vmatprep.mubr.msk.f32.mxu1 %vm2597_vm7, %v2767_v63  ;;  %v3451_v26 = vsel %vm2784_vm4, %v5746_v53, %v5747_v7 }
 0x56a   : > { %5296 = vmatmul.mubr.msk.f32.vlgmr.msra.gmra.mrb[32].mxu1 %vm2597_vm7, %v2769_v22  ;;  %v3450_v48 = vsel %vm2784_vm4, %v5741_v13, %v5742_v34 }
 0x56b   : > { %v5521_v25 = vpack.c.bf16 %v3451_v26, %v3450_v48  ;;  %5528 = vmatpush3.bf16.msra.mxu1 %v5525_v4 }
 0x56c   : > { %5530 = vmatprep.subr.bf16.mxu1 %v5529_v24 }
 0x56d   : > { %v5873_v19 = vpop.eup %5872  ;;  %5522 = vmatprep.subr.bf16.mxu0 %v5521_v25 }
 0x56e   : > { %v5875_v5 = vpop.eup %5874  ;;  %5524 = vmatpush3.bf16.msra.mxu0 %v5521_v25  ;;  %v2773_v33 = vmul.f32 %v5873_v19, %v7272_v10 }
 0x56f   : > { %v2771_v36 = vmul.f32 %v5875_v5, %v7274_v12  ;;  %5532 = vmatpush3.bf16.msra.mxu1 %v5529_v24 }
 0x570   : > { %5534 = vmatprep.subr.bf16.mxu1 %v5533_v51 }
 0x571   : > { %5302 = vmatprep.mubr.msk.f32.mxu0 %vm2597_vm7, %v2771_v36 }
 0x572   : > { %5303 = vmatmul.mubr.msk.f32.vlgmr.msra.gmra.mrb[60].mxu0 %vm2597_vm7, %v2773_v33 }
 0x573   : > { %5536 = vmatpush3.bf16.msra.mxu1 %v5533_v51 }
 0x60d   : > { %v5255_v15 = vpop.f32.mrb[26].mxu1 }
 0x60e   : > { %v2861_v47 = vpop.f32.mrb[27].mxu1 }
 0x60f   : > { %5317 = vmatprep.mubr.msk.f32.mxu1 %vm1019_vm3, %v2861_v47 }
 0x610   : > { %5318 = vmatmul.mubr.msk.f32.vlgmr.msra.gmra.mrb[34].mxu1 %vm1019_vm3, %v5255_v15 }
 0x618   : > { %v5262_v9 = vpop.f32.mrb[54].mxu0 }
 0x619   : > { %v2956_v17 = vpop.f32.mrb[55].mxu0 }
 0x61a   : > { %5320 = vmatprep.mubr.msk.f32.mxu1 %vm1019_vm3, %v2956_v17 }
 0x61b   : > { %5321 = vmatmul.mubr.msk.f32.gmra.mrb[36].mxu1 %vm1019_vm3, %v5262_v9 }
 0x61d   : > { %v5269_v12 = vpop.f32.mrb[28].mxu1 }
 0x61e   : > { %v3051_v10 = vpop.f32.mrb[29].mxu1 }
 0x61f   : > { %5323 = vmatprep.mubr.msk.f32.mxu1 %vm1019_vm3, %v3051_v10 }
 0x620   : > { %5324 = vmatmul.mubr.msk.f32.gmra.mrb[38].mxu1 %vm1019_vm3, %v5269_v12 }
 0x625   : > { %v5276_v32 = vpop.f32.mrb[56].mxu0 }
 0x626   : > { %v3146_v49 = vpop.f32.mrb[57].mxu0 }
 0x627   : > { %5326 = vmatprep.mubr.msk.f32.mxu1 %vm1019_vm3, %v3146_v49 }
 0x628   : > { %5327 = vmatmul.mubr.msk.f32.gmra.mrb[40].mxu1 %vm1019_vm3, %v5276_v32 }
 0x62d   : > { %v5283_v1 = vpop.f32.mrb[30].mxu1 }
 0x62e   : > { %v3241_v30 = vpop.f32.mrb[31].mxu1 }
 0x62f   : > { %5329 = vmatprep.mubr.msk.f32.mxu1 %vm1019_vm3, %v3241_v30 }
 0x630   : > { %5330 = vmatmul.mubr.msk.f32.gmra.mrb[42].mxu1 %vm1019_vm3, %v5283_v1 }
 0x635   : > { %v5290_v16 = vpop.f32.mrb[58].mxu0 }
 0x636   : > { %v3336_v55 = vpop.f32.mrb[59].mxu0 }
 0x637   : > { %5332 = vmatprep.mubr.msk.f32.mxu1 %vm1019_vm3, %v3336_v55 }
 0x638   : > { %5333 = vmatmul.mubr.msk.f32.gmra.mrb[44].mxu1 %vm1019_vm3, %v5290_v16 }
 0x63d   : > { %v5297_v2 = vpop.f32.mrb[32].mxu1 }
 0x63e   : > { %v3431_v38 = vpop.f32.mrb[33].mxu1 }
 0x63f   : > { %5335 = vmatprep.mubr.msk.f32.mxu1 %vm1019_vm3, %v3431_v38 }
 0x640   : > { %5336 = vmatmul.mubr.msk.f32.gmra.mrb[46].mxu1 %vm1019_vm3, %v5297_v2 }
 0x645   : > { %v5304_v0 = vpop.f32.mrb[60].mxu0 }
 0x646   : > { %v3526_v3 = vpop.f32.mrb[61].mxu0 }
 0x647   : > { %5338 = vmatprep.mubr.msk.f32.mxu1 %vm1019_vm3, %v3526_v3 }
 0x648   : > { %5339 = vmatmul.mubr.msk.f32.gmra.mrb[48].mxu1 %vm1019_vm3, %v5304_v0 }
 0x6e3   : > { %v5319_v21 = vpop.f32.mrb[34].mxu1 }
 0x6e4   : > { %v3668_v4 = vadd.f32 %v5319_v21, %v7369_v39  ;;  %v3662_v45 = vpop.f32.mrb[35].mxu1 }
 0x6e5   : > { %v3663_v54 = vadd.f32 %v7369_v39, %v3662_v45 }
 0x6e6   : > { %vm3742_vm4 = vcmp.ne.f32.partialorder %v3668_v4, %v3668_v4 }
 0x6e7   : > { %v3758_v43 = vsel %vm3742_vm4, 0.0, %v3668_v4  ;;  %vm3741_vm7 = vcmp.ne.f32.partialorder %v3663_v54, %v3663_v54 }
 0x6e8   : > { %v3774_v18 = vmul.f32 %v6223_v35, %v3758_v43  ;;  %v3757_v14 = vsel %vm3741_vm7, 0.0, %v3663_v54  ;;  %vm4691_vm7 = vcmask 1041409  }
 0x6e9   : > { %v3773_v29 = vmul.f32 %v3757_v14, %v6225_v37 }
 0x6ea   : > { %v7376_v6 = vadd.f32 %v3774_v18, %v6364_v62 }
 0x6eb   : > { %v7379_v56 = vadd.f32 %v3773_v29, %v8044_v11 }
 0x6ec   : > { %v3806_v57 = vmul.f32 %v6223_v35, %v7376_v6  ;;  %v3870_v41 = vmul.f32 %v7376_v6, %v7376_v6 }
 0x6ed   : > { %v3805_v31 = vmul.f32 %v7379_v56, %v6225_v37  ;;  %v3869_v62 = vmul.f32 %v7379_v56, %v7379_v56 }
 0x6ee   : > { %v5322_v27 = vpop.f32.mrb[36].mxu1  ;;  %v3824_v7 = vsel %vm1019_vm3, %v3806_v57, 0.0  ;;  %v3886_v53 = vmul.f32 %v6223_v35, %v3870_v41 }
 0x6ef   : > { %v3678_v60 = vadd.f32 %v5322_v27, %v7369_v39  ;;  %3825 = vadd.xlane.f32.xlu0 %v3824_v7  ;;  %v3672_v63 = vpop.f32.mrb[37].mxu1  ;;  %v3821_v22 = vsel %vm1019_vm3, %v3805_v31, 0.0  ;;  %v3885_v26 = vmul.f32 %v3869_v62, %v6225_v37 }
 0x6f0   : > { %v3673_v34 = vadd.f32 %v7369_v39, %v3672_v63  ;;  %3822 = vadd.xlane.f32.xlu1 %v3821_v22  ;;  %v3904_v24 = vsel %vm1019_vm3, %v3886_v53, 0.0  ;;  %v8045_v53 = vld [vmem:[#allocation8_spill] sm:$0xff] }
 0x6f1   : > { %vm3744_vm9 = vcmp.ne.f32.partialorder %v3678_v60, %v3678_v60  ;;  %v3901_v15 = vsel %vm1019_vm3, %v3885_v26, 0.0 }
 0x6f2   : > { %v3760_v13 = vsel %vm3744_vm9, 0.0, %v3678_v60  ;;  %vm3743_vm10 = vcmp.ne.f32.partialorder %v3673_v34, %v3673_v34  ;;  %vm4693_vm9 = vcmask 1042434  }
 0x6f3   : > { %v3776_v28 = vmul.f32 %v6233_v42, %v3760_v13  ;;  %v3759_v40 = vsel %vm3743_vm10, 0.0, %v3673_v34  ;;  %3905 = vadd.xlane.f32.xlu0 %v3904_v24  ;;  %v5325_v48 = vpop.f32.mrb[38].mxu1  ;;  %vm4695_vm10 = vcmask 1043459  }
 0x6f4   : > { %v3775_v25 = vmul.f32 %v3759_v40, %v6235_v44  ;;  %v3688_v51 = vadd.f32 %v5325_v48, %v7369_v39  ;;  %v3682_v19 = vpop.f32.mrb[39].mxu1 }
 0x6f5   : > { %v7400_v5 = vadd.f32 %v3776_v28, %v6380_v20  ;;  %v3683_v36 = vadd.f32 %v7369_v39, %v3682_v19 }
 0x6f6   : > { %v7404_v33 = vadd.f32 %v3775_v25, %v6384_v23  ;;  %vm3746_vm11 = vcmp.ne.f32.partialorder %v3688_v51, %v3688_v51  ;;  %v8046_v25 = vld [vmem:[#allocation10_spill] sm:$0xff] }
 0x6f7   : > { %v3762_v47 = vsel %vm3746_vm11, 0.0, %v3688_v51  ;;  %vm3745_vm12 = vcmp.ne.f32.partialorder %v3683_v36, %v3683_v36  ;;  %3902 = vadd.xlane.f32.xlu0 %v3901_v15  ;;  %v3808_v9 = vmul.f32 %v6233_v42, %v7400_v5  ;;  %v3872_v17 = vmul.f32 %v7400_v5, %v7400_v5 }
 0x6f8   : > { %v3778_v20 = vmul.f32 %v6248_v50, %v3762_v47  ;;  %v3761_v12 = vsel %vm3745_vm12, 0.0, %v3683_v36  ;;  %v3807_v10 = vmul.f32 %v7404_v33, %v6235_v44  ;;  %v3871_v23 = vmul.f32 %v7404_v33, %v7404_v33  ;;  %v8047_v36 = vld [vmem:[#allocation11_spill] sm:$0xff] }
 0x6f9   : > { %v3777_v32 = vmul.f32 %v3761_v12, %v6250_v52  ;;  %v3830_v49 = vsel %vm1019_vm3, %v3808_v9, 0.0  ;;  %v3888_v1 = vmul.f32 %v6233_v42, %v3872_v17  ;;  %v8048_v9 = vld [vmem:[#allocation19_spill] sm:$0xff]  ;;  %vm4697_vm11 = vcmask 1044484  }
 0x6fa   : > { %v7420_v30 = vadd.f32 %v3778_v20, %v6393_v46  ;;  %v3827_v16 = vsel %vm1019_vm3, %v3807_v10, 0.0  ;;  %v3887_v55 = vmul.f32 %v3871_v23, %v6235_v44  ;;  %v8049_v23 = vld [vmem:[#allocation16_spill] sm:$0xff]  ;;  %vm4699_vm12 = vcmask 1045509  }
 0x6fb   : > { %v7425_v2 = vadd.f32 %v3777_v32, %v6400_v58  ;;  %v5328_v38 = vpop.f32.mrb[40].mxu1  ;;  %3831 = vadd.xlane.f32.xlu0 %v3830_v49  ;;  %3828 = vadd.xlane.f32.xlu1 %v3827_v16  ;;  %v3910_v4 = vsel %vm1019_vm3, %v3888_v1, 0.0 }
 0x6fc   : > { %v3698_v0 = vadd.f32 %v5328_v38, %v7369_v39  ;;  %v3692_v3 = vpop.f32.mrb[41].mxu1  ;;  %v3874_v46 = vmul.f32 %v7420_v30, %v7420_v30  ;;  %v3907_v58 = vsel %vm1019_vm3, %v3887_v55, 0.0  ;;  %v3810_v54 = vmul.f32 %v6248_v50, %v7420_v30 }
 0x6fd   : > { %v3693_v21 = vadd.f32 %v7369_v39, %v3692_v3  ;;  %v3873_v45 = vmul.f32 %v7425_v2, %v7425_v2  ;;  %v3809_v43 = vmul.f32 %v7425_v2, %v6250_v52 }
 0x6fe   : > { %vm3748_vm13 = vcmp.ne.f32.partialorder %v3698_v0, %v3698_v0  ;;  %v3890_v57 = vmul.f32 %v6248_v50, %v3874_v46  ;;  %v3836_v27 = vsel %vm1019_vm3, %v3810_v54, 0.0 }
 0x6ff   : > { %v3764_v18 = vsel %vm3748_vm13, 0.0, %v3698_v0  ;;  %vm3747_vm14 = vcmp.ne.f32.partialorder %v3693_v21, %v3693_v21  ;;  %3911 = vadd.xlane.f32.xlu0 %v3910_v4  ;;  %3908 = vadd.xlane.f32.xlu1 %v3907_v58  ;;  %v3889_v41 = vmul.f32 %v3873_v45, %v6250_v52  ;;  %v3833_v7 = vsel %vm1019_vm3, %v3809_v43, 0.0  ;;  %v8050_v58 = vld [vmem:[#allocation12_spill] sm:$0xff] }
 0x700   : > { %v3780_v14 = vmul.f32 %v6260_v59, %v3764_v18  ;;  %v3763_v29 = vsel %vm3747_vm14, 0.0, %v3693_v21  ;;  %v3916_v13 = vsel %vm1019_vm3, %v3890_v57, 0.0  ;;  %v8051_v18 = vld [vmem:[#allocation14_spill] sm:$0xff]  ;;  %v8052_v57 = vld [vmem:[#allocation24_spill] sm:$0xff]  ;;  %vm4701_vm13 = vcmask 1046534  }
 0x701   : > { %v3779_v11 = vmul.f32 %v3763_v29, %v6262_v61  ;;  %vm4703_vm14 = vcmask 1047559  }
 0x702   : > { %v7444_v31 = vadd.f32 %v3780_v14, %v6282_v8  ;;  %v3913_v8 = vsel %vm1019_vm3, %v3889_v41, 0.0 }
 0x703   : > { %v7449_v62 = vadd.f32 %v3779_v11, %v8045_v53  ;;  %v5331_v60 = vpop.f32.mrb[42].mxu1  ;;  %3837 = vadd.xlane.f32.xlu0 %v3836_v27  ;;  %3834 = vadd.xlane.f32.xlu1 %v3833_v7  ;;  %v8053_v53 = vld [vmem:[#allocation23_spill] sm:$0xff] }
 0x704   : > { %v3708_v63 = vadd.f32 %v5331_v60, %v7369_v39  ;;  %v3702_v22 = vpop.f32.mrb[43].mxu1  ;;  %v3876_v24 = vmul.f32 %v7444_v31, %v7444_v31  ;;  %v3812_v26 = vmul.f32 %v6260_v59, %v7444_v31 }
 0x705   : > { %v3703_v34 = vadd.f32 %v7369_v39, %v3702_v22  ;;  %v3811_v28 = vmul.f32 %v7449_v62, %v6262_v61  ;;  %v3875_v40 = vmul.f32 %v7449_v62, %v7449_v62 }
 0x706   : > { %vm3750_vm15 = vcmp.ne.f32.partialorder %v3708_v63, %v3708_v63  ;;  %v3892_v47 = vmul.f32 %v6260_v59, %v3876_v24  ;;  %v3842_v20 = vsel %vm1019_vm3, %v3812_v26, 0.0 }
 0x707   : > { %v3766_v48 = vsel %vm3750_vm15, 0.0, %v3708_v63  ;;  %vm3749_vm0 = vcmp.ne.f32.partialorder %v3703_v34, %v3703_v34  ;;  %3917 = vadd.xlane.f32.xlu0 %v3916_v13  ;;  %3914 = vadd.xlane.f32.xlu1 %v3913_v8  ;;  %v3839_v12 = vsel %vm1019_vm3, %v3811_v28, 0.0  ;;  %v3891_v10 = vmul.f32 %v3875_v40, %v6262_v61 }
 0x708   : > { %v3782_v51 = vmul.f32 %v8046_v25, %v3766_v48  ;;  %v3765_v19 = vsel %vm3749_vm0, 0.0, %v3703_v34  ;;  %v3922_v38 = vsel %vm1019_vm3, %v3892_v47, 0.0  ;;  %v8054_v47 = vld [vmem:[#allocation15_spill] sm:$0xff] }
 0x709   : > { %v3781_v15 = vmul.f32 %v3765_v19, %v8047_v36  ;;  %v3919_v21 = vsel %vm1019_vm3, %v3891_v10, 0.0  ;;  %v4110_v19 = vld [vmem:[%s7915_s10 + $0x8] sm:$0xff]  ;;  %v8055_v10 = vld [vmem:[#allocation17_spill] sm:$0xff] }
 0x70a   : > { %v7467_v17 = vadd.f32 %v3782_v51, %v8048_v9  ;;  %v4109_v51 = vld [vmem:[%s7915_s10] sm:$0xff] }
 0x70b   : > { %v7473_v32 = vadd.f32 %v3781_v15, %v8049_v23  ;;  %v5334_v49 = vpop.f32.mrb[44].mxu1  ;;  %3843 = vadd.xlane.f32.xlu0 %v3842_v20  ;;  %3840 = vadd.xlane.f32.xlu1 %v3839_v12  ;;  %v5537_v12 = vpack.c.bf16 %v4110_v19, %v4109_v51  ;;  %v8060_v19 = vld [vmem:[#allocation30_spill] sm:$0xff] }
 0x70c   : > { %v3718_v1 = vadd.f32 %v5334_v49, %v7369_v39  ;;  %v3712_v16 = vpop.f32.mrb[45].mxu1  ;;  %v3878_v0 = vmul.f32 %v7467_v17, %v7467_v17  ;;  %v3814_v4 = vmul.f32 %v8046_v25, %v7467_v17 }
 0x70d   : > { %v3713_v55 = vadd.f32 %v7369_v39, %v3712_v16  ;;  %v3877_v3 = vmul.f32 %v7473_v32, %v7473_v32  ;;  %v3813_v46 = vmul.f32 %v7473_v32, %v8047_v36  ;;  %5538 = vmatprep.subr.bf16.mxu0 %v5537_v12 }
 0x70e   : > { %vm3752_vm2 = vcmp.ne.f32.partialorder %v3718_v1, %v3718_v1  ;;  %v3894_v29 = vmul.f32 %v8046_v25, %v3878_v0  ;;  %v3848_v27 = vsel %vm1019_vm3, %v3814_v4, 0.0  ;;  %5540 = vmatpush3.bf16.msra.mxu0 %v5537_v12  ;;  %v8061_v12 = vld [vmem:[#allocation29_spill] sm:$0xff] }
 0x70f   : > { %v3768_v45 = vsel %vm3752_vm2, 0.0, %v3718_v1  ;;  %vm3751_vm1 = vcmp.ne.f32.partialorder %v3713_v55, %v3713_v55  ;;  %3923 = vadd.xlane.f32.xlu0 %v3922_v38  ;;  %3920 = vadd.xlane.f32.xlu1 %v3919_v21  ;;  %v3893_v11 = vmul.f32 %v3877_v3, %v8047_v36  ;;  %v3845_v7 = vsel %vm1019_vm3, %v3813_v46, 0.0  ;;  %v8056_v1 = vld [vmem:[#allocation28_spill] sm:$0xff]  ;;  %v8057_v3 = vld [vmem:[#allocation27_spill] sm:$0xff] }
 0x710   : > { %v3784_v54 = vmul.f32 %v8050_v58, %v3768_v45  ;;  %v3767_v43 = vsel %vm3751_vm1, 0.0, %v3713_v55  ;;  %v3928_v8 = vsel %vm1019_vm3, %v3894_v29, 0.0 }
 0x711   : > { %v3783_v14 = vmul.f32 %v3767_v43, %v8051_v18  ;;  %v3925_v24 = vsel %vm1019_vm3, %v3893_v11, 0.0 }
 0x712   : > { %v7492_v41 = vadd.f32 %v3784_v54, %v8052_v57 }
 0x713   : > { %v7497_v60 = vadd.f32 %v3783_v14, %v8053_v53  ;;  %v5337_v63 = vpop.f32.mrb[46].mxu1  ;;  %3849 = vadd.xlane.f32.xlu0 %v3848_v27  ;;  %3846 = vadd.xlane.f32.xlu1 %v3845_v7  ;;  %v4112_v7 = vld [vmem:[%s7915_s10 + $0x18] sm:$0xff]  ;;  %v4113_v53 = vld [vmem:[%s7915_s10 + $0x20] sm:$0xff] }
 0x714   : > { %v3728_v22 = vadd.f32 %v5337_v63, %v7369_v39  ;;  %v3722_v34 = vpop.f32.mrb[47].mxu1  ;;  %v3880_v26 = vmul.f32 %v7492_v41, %v7492_v41  ;;  %v3816_v28 = vmul.f32 %v8050_v58, %v7492_v41 }
 0x715   : > { %v3723_v13 = vadd.f32 %v7369_v39, %v3722_v34  ;;  %v3815_v40 = vmul.f32 %v7497_v60, %v8051_v18  ;;  %v3879_v48 = vmul.f32 %v7497_v60, %v7497_v60  ;;  %v8058_v34 = vld [vmem:[#allocation20_spill] sm:$0xff] }
 0x716   : > { %vm3754_vm5 = vcmp.ne.f32.partialorder %v3728_v22, %v3728_v22  ;;  %v3896_v49 = vmul.f32 %v8050_v58, %v3880_v26  ;;  %v3854_v55 = vsel %vm1019_vm3, %v3816_v28, 0.0  ;;  %v8059_v26 = vld [vmem:[#allocation21_spill] sm:$0xff] }
 0x717   : > { %v3770_v15 = vsel %vm3754_vm5, 0.0, %v3728_v22  ;;  %vm3753_vm6 = vcmp.ne.f32.partialorder %v3723_v13, %v3723_v13  ;;  %3929 = vadd.xlane.f32.xlu0 %v3928_v8  ;;  %3926 = vadd.xlane.f32.xlu1 %v3925_v24  ;;  %v3851_v38 = vsel %vm1019_vm3, %v3815_v40, 0.0  ;;  %v3895_v0 = vmul.f32 %v3879_v48, %v8051_v18  ;;  %v4114_v22 = vld [vmem:[%s7915_s10 + $0x28] sm:$0xff] }
 0x718   : > { %v3786_v9 = vmul.f32 %v8054_v47, %v3770_v15  ;;  %v3769_v20 = vsel %vm3753_vm6, 0.0, %v3723_v13  ;;  %v3934_v43 = vsel %vm1019_vm3, %v3896_v49, 0.0  ;;  %v5545_v51 = vpack.c.bf16 %v4114_v22, %v4113_v53  ;;  %v4335_v53 = vld [vmem:[%s7917_s12 + $0x20] sm:$0xff] }
 0x719   : > { %v3785_v23 = vmul.f32 %v3769_v20, %v8055_v10  ;;  %v3931_v11 = vsel %vm1019_vm3, %v3895_v0, 0.0 }
 0x71a   : > { %v7521_v16 = vadd.f32 %v3786_v9, %v8056_v1 }
 0x71b   : > { %v7527_v21 = vadd.f32 %v3785_v23, %v8057_v3  ;;  %v5340_v4 = vpop.f32.mrb[48].mxu1  ;;  %3855 = vadd.xlane.f32.xlu0 %v3854_v55  ;;  %3852 = vadd.xlane.f32.xlu1 %v3851_v38 }
 0x71c   : > { %v3738_v46 = vadd.f32 %v5340_v4, %v7369_v39  ;;  %v3732_v45 = vpop.f32.mrb[49].mxu1  ;;  %v3882_v14 = vmul.f32 %v7521_v16, %v7521_v16  ;;  %v3818_v57 = vmul.f32 %v8054_v47, %v7521_v16 }
 0x71d   : > { %v3733_v54 = vadd.f32 %v7369_v39, %v3732_v45  ;;  %v3881_v29 = vmul.f32 %v7527_v21, %v7527_v21  ;;  %v3817_v27 = vmul.f32 %v7527_v21, %v8055_v10  ;;  %v4111_v39 = vld [vmem:[%s7915_s10 + $0x10] sm:$0xff] }
 0x71e   : > { %vm3756_vm8 = vcmp.ne.f32.partialorder %v3738_v46, %v3738_v46  ;;  %v5541_v24 = vpack.c.bf16 %v4112_v7, %v4111_v39  ;;  %v3898_v40 = vmul.f32 %v8054_v47, %v3882_v14  ;;  %v3860_v9 = vsel %vm1019_vm3, %v3818_v57, 0.0  ;;  %v4333_v57 = vld [vmem:[%s7917_s12 + $0x10] sm:$0xff]  ;;  %v4334_v39 = vld [vmem:[%s7917_s12 + $0x18] sm:$0xff] }
 0x71f   : > { %v3772_v63 = vsel %vm3756_vm8, 0.0, %v3738_v46  ;;  %vm3755_vm4 = vcmp.ne.f32.partialorder %v3733_v54, %v3733_v54  ;;  %3935 = vadd.xlane.f32.xlu0 %v3934_v43  ;;  %3932 = vadd.xlane.f32.xlu1 %v3931_v11  ;;  %v3897_v48 = vmul.f32 %v3881_v29, %v8055_v10  ;;  %v3857_v20 = vsel %vm1019_vm3, %v3817_v27, 0.0  ;;  %v4331_v29 = vld [vmem:[%s7917_s12] sm:$0xff]  ;;  %v4332_v11 = vld [vmem:[%s7917_s12 + $0x8] sm:$0xff] }
 0x720   : > { %v3788_v13 = vmul.f32 %v8058_v34, %v3772_v63  ;;  %v3771_v8 = vsel %vm3755_vm4, 0.0, %v3733_v54  ;;  %5542 = vmatprep.subr.bf16.mxu0 %v5541_v24  ;;  %v3940_v49 = vsel %vm1019_vm3, %v3898_v40, 0.0  ;;  %v5549_v27 = vpack.c.bf16 %v4332_v11, %v4331_v29  ;;  %v4336_v63 = vld [vmem:[%s7917_s12 + $0x28] sm:$0xff] }
 0x721   : > { %v3787_v28 = vmul.f32 %v3771_v8, %v8059_v26  ;;  %5544 = vmatpush3.bf16.msra.mxu0 %v5541_v24  ;;  %v3937_v1 = vsel %vm1019_vm3, %v3897_v48, 0.0  ;;  %v5553_v7 = vpack.c.bf16 %v4334_v39, %v4333_v57  ;;  %v5557_v22 = vpack.c.bf16 %v4336_v63, %v4335_v53  ;;  %v4338_v8 = vld [vmem:[%s7917_s12 + $0x38] sm:$0xff]  ;;  %v4340_v40 = vld [vmem:[%s7917_s12 + $0x48] sm:$0xff] }
 0x722   : > { %v7558_v15 = vadd.f32 %v3788_v13, %v8060_v19  ;;  %5546 = vmatprep.subr.bf16.mxu0 %v5545_v51  ;;  %5550 = vmatprep.subr.bf16.mxu1 %v5549_v27  ;;  %v4337_v13 = vld [vmem:[%s7917_s12 + $0x30] sm:$0xff]  ;;  %v4342_v19 = vld [vmem:[%s7917_s12 + $0x58] sm:$0xff] }
 0x723   : > { %v7563_v23 = vadd.f32 %v3787_v28, %v8061_v12  ;;  %3861 = vadd.xlane.f32.xlu0 %v3860_v9  ;;  %3858 = vadd.xlane.f32.xlu1 %v3857_v20  ;;  %v5561_v24 = vpack.c.bf16 %v4338_v8, %v4337_v13  ;;  %v4339_v28 = vld [vmem:[%s7917_s12 + $0x40] sm:$0xff]  ;;  %v4344_v12 = vld [vmem:[%s7917_s12 + $0x68] sm:$0xff]  ;;  %v8065_v8 = vld [vmem:[#allocation34_spill] sm:$0xff] }
 0x724   : > { %v3820_v55 = vmul.f32 %v8058_v34, %v7558_v15  ;;  %v3884_v0 = vmul.f32 %v7558_v15, %v7558_v15  ;;  %5552 = vmatpush3.bf16.msra.mxu1 %v5549_v27  ;;  %v5565_v48 = vpack.c.bf16 %v4340_v40, %v4339_v28  ;;  %v4343_v20 = vld [vmem:[%s7917_s12 + $0x60] sm:$0xff] }
 0x725   : > { %v3819_v38 = vmul.f32 %v7563_v23, %v8059_v26  ;;  %v3883_v3 = vmul.f32 %v7563_v23, %v7563_v23  ;;  %5548 = vmatpush3.bf16.msra.mxu0 %v5545_v51  ;;  %5554 = vmatprep.subr.bf16.mxu1 %v5553_v7  ;;  %v4341_v51 = vld [vmem:[%s7917_s12 + $0x50] sm:$0xff] }
 0x726   : > { %v3866_v4 = vsel %vm1019_vm3, %v3820_v55, 0.0  ;;  %v3900_v45 = vmul.f32 %v8058_v34, %v3884_v0  ;;  %v5569_v9 = vpack.c.bf16 %v4342_v19, %v4341_v51  ;;  %v8062_v55 = vld [vmem:[#allocation31_spill] sm:$0xff] }
 0x727   : > { %3941 = vadd.xlane.f32.xlu0 %v3940_v49  ;;  %3938 = vadd.xlane.f32.xlu1 %v3937_v1  ;;  %v3863_v46 = vsel %vm1019_vm3, %v3819_v38, 0.0  ;;  %v3899_v54 = vmul.f32 %v3883_v3, %v8059_v26  ;;  %v5573_v49 = vpack.c.bf16 %v4344_v12, %v4343_v20 }
 0x728   : > { %v3946_v43 = vsel %vm1019_vm3, %v3900_v45, 0.0  ;;  %5556 = vmatpush3.bf16.msra.mxu1 %v5553_v7 }
 0x729   : > { %v3943_v14 = vsel %vm1019_vm3, %v3899_v54, 0.0  ;;  %5558 = vmatprep.subr.bf16.mxu1 %v5557_v22 }
 0x72b   : > { %3867 = vadd.xlane.f32.xlu0 %v3866_v4  ;;  %3864 = vadd.xlane.f32.xlu1 %v3863_v46  ;;  %v8063_v46 = vld [vmem:[#allocation32_spill] sm:$0xff] }
 0x72c   : > { %5560 = vmatpush3.bf16.msra.mxu1 %v5557_v22  ;;  %v8064_v22 = vld [vmem:[#allocation33_spill] sm:$0xff] }
 0x72d   : > { %5562 = vmatprep.subr.bf16.mxu1 %v5561_v24 }
 0x72f   : > { %3947 = vadd.xlane.f32.xlu0 %v3946_v43  ;;  %3944 = vadd.xlane.f32.xlu1 %v3943_v14 }
 0x730   : > { %5564 = vmatpush3.bf16.msra.mxu1 %v5561_v24 }
 0x731   : > { %5566 = vmatprep.subr.bf16.mxu1 %v5565_v48 }
 0x734   : > { %5568 = vmatpush3.bf16.msra.mxu1 %v5565_v48 }
 0x735   : > { %5570 = vmatprep.subr.bf16.mxu1 %v5569_v9 }
 0x738   : > { %5572 = vmatpush3.bf16.msra.mxu1 %v5569_v9 }
 0x739   : > { %5574 = vmatprep.subr.bf16.mxu1 %v5573_v49 }
 0x73c   : > { %5576 = vmatpush3.bf16.msra.mxu1 %v5573_v49 }
 0x77c   : > { %v3826_v1 = vpop.xlane.xlu0 %3825 }
 0x77d   : > { %v3950_v38 = vmul.f32 %v8062_v55, %v3826_v1  ;;  %v3823_v0 = vpop.xlane.xlu1 %3822 }
 0x77e   : > { %v3949_v45 = vmul.f32 %v8063_v46, %v3823_v0 }
 0x77f   : > { %v3982_v4 = vmul.f32 %v3950_v38, %v3950_v38 }
 0x780   : > { %v3906_v3 = vpop.xlane.xlu0 %3905  ;;  %v3981_v29 = vmul.f32 %v3949_v45, %v3949_v45 }
 0x781   : > { %v3966_v54 = vmul.f32 %v8062_v55, %v3906_v3 }
 0x783   : > { %v3998_v43 = vsub.f32 %v3966_v54, %v3982_v4  ;;  %v8066_v4 = vld [vmem:[#allocation38_spill] sm:$0xff]  ;;  %v8067_v54 = vld [vmem:[#allocation37_spill] sm:$0xff] }
 0x784   : > { %v3903_v14 = vpop.xlane.xlu0 %3902 }
 0x785   : > { %v4014_v11 = vmax.f32 %v3998_v43, 0.0  ;;  %v3965_v57 = vmul.f32 %v8063_v46, %v3903_v14 }
 0x787   : > { %v4046_v27 = vadd.f32 1e-05, %v4014_v11  ;;  %v3997_v39 = vsub.f32 %v3965_v57, %v3981_v29  ;;  %v4030_v57 = vsub.f32 %v7376_v6, %v3950_v38 }
 0x788   : > { %v3832_v7 = vpop.xlane.xlu0 %3831  ;;  %v3829_v53 = vpop.xlane.xlu1 %3828 }
 0x789   : > { %v4013_v63 = vmax.f32 %v3997_v39, 0.0  ;;  %v7628_v13 = vmul.f32 %v8064_v22, %v3832_v7  ;;  %v7631_v24 = vmul.f32 %v8065_v8, %v3829_v53  ;;  %5876 = vrsqrt.f32 %v4046_v27 }
 0x78b   : > { %v4045_v28 = vadd.f32 1e-05, %v4013_v63  ;;  %v3984_v40 = vmul.f32 %v7628_v13, %v7628_v13  ;;  %v3983_v19 = vmul.f32 %v7631_v24, %v7631_v24 }
 0x78c   : > { %v3912_v48 = vpop.xlane.xlu0 %3911  ;;  %v3909_v51 = vpop.xlane.xlu1 %3908 }
 0x78d   : > { %5878 = vrsqrt.f32 %v4045_v28  ;;  %v3968_v9 = vmul.f32 %v8064_v22, %v3912_v48  ;;  %v3967_v20 = vmul.f32 %v8065_v8, %v3909_v51  ;;  %v4029_v8 = vsub.f32 %v7379_v56, %v3949_v45 }
 0x78f   : > { %v4000_v12 = vsub.f32 %v3968_v9, %v3984_v40  ;;  %v3999_v49 = vsub.f32 %v3967_v20, %v3983_v19 }
 0x790   : > { %v3838_v1 = vpop.xlane.xlu0 %3837  ;;  %v3835_v55 = vpop.xlane.xlu1 %3834 }
 0x791   : > { %v4016_v0 = vmax.f32 %v4000_v12, 0.0  ;;  %v4015_v3 = vmax.f32 %v3999_v49, 0.0  ;;  %v7640_v46 = vmul.f32 %v8066_v4, %v3838_v1  ;;  %v7643_v43 = vmul.f32 %v8067_v54, %v3835_v55  ;;  %v8068_v49 = vld [vmem:[#allocation36_spill] sm:$0xff]  ;;  %v8069_v55 = vld [vmem:[#allocation35_spill] sm:$0xff] }
 0x793   : > { %v4048_v14 = vadd.f32 1e-05, %v4016_v0  ;;  %v4047_v29 = vadd.f32 1e-05, %v4015_v3  ;;  %v5877_v11 = vpop.eup %5876  ;;  %v3986_v27 = vmul.f32 %v7640_v46, %v7640_v46  ;;  %v3985_v53 = vmul.f32 %v7643_v43, %v7643_v43 }
 0x794   : > { %v3918_v39 = vpop.xlane.xlu0 %3917  ;;  %v3915_v7 = vpop.xlane.xlu1 %3914  ;;  %v4078_v38 = vmul.f32 %v5877_v11, %v4030_v57 }
 0x795   : > { %5880 = vrsqrt.f32 %v4048_v14  ;;  %v3970_v63 = vmul.f32 %v8066_v4, %v3918_v39  ;;  %v3969_v22 = vmul.f32 %v8067_v54, %v3915_v7  ;;  %v4032_v7 = vsub.f32 %v7400_v5, %v7628_v13 }
 0x796   : > { %5882 = vrsqrt.f32 %v4047_v29  ;;  %v4094_v54 = vmul.f32 %v6223_v35, %v4078_v38 }
 0x797   : > { %v5879_v28 = vpop.eup %5878  ;;  %v4002_v40 = vsub.f32 %v3970_v63, %v3986_v27  ;;  %v4001_v48 = vsub.f32 %v3969_v22, %v3985_v53 }
 0x798   : > { %v3844_v51 = vpop.xlane.xlu0 %3843  ;;  %v3841_v19 = vpop.xlane.xlu1 %3840  ;;  %v4077_v9 = vmul.f32 %v5879_v28, %v4029_v8  ;;  %v4031_v28 = vsub.f32 %v7404_v33, %v7631_v24 }
 0x799   : > { %v4018_v20 = vmax.f32 %v4002_v40, 0.0  ;;  %v4017_v12 = vmax.f32 %v4001_v48, 0.0  ;;  %v7654_v1 = vmul.f32 %v8068_v49, %v3844_v51  ;;  %v7657_v0 = vmul.f32 %v8069_v55, %v3841_v19 }
 0x79a   : > { %v4093_v3 = vmul.f32 %v4077_v9, %v6225_v37  ;;  %v8070_v9 = vld [vmem:[#allocation40_spill] sm:$0xff] }
 0x79b   : > { %v4050_v4 = vadd.f32 1e-05, %v4018_v20  ;;  %v4049_v45 = vadd.f32 1e-05, %v4017_v12  ;;  %v3988_v14 = vmul.f32 %v7654_v1, %v7654_v1  ;;  %v3987_v57 = vmul.f32 %v7657_v0, %v7657_v0  ;;  %v8071_v12 = vld [vmem:[#allocation39_spill] sm:$0xff] }
 0x79c   : > { %v3924_v29 = vpop.xlane.xlu0 %3923  ;;  %5353 = vmatprep.mubr.msk.f32.mxu0 %vm1019_vm3, %v4093_v3  ;;  %v3921_v11 = vpop.xlane.xlu1 %3920 }
 0x79d   : > { %5884 = vrsqrt.f32 %v4050_v4  ;;  %v3972_v27 = vmul.f32 %v8068_v49, %v3924_v29  ;;  %v3971_v39 = vmul.f32 %v8069_v55, %v3921_v11  ;;  %5354 = vmatmul.mubr.msk.f32.vlgmr.msra.gmra.mrb[62].mxu0 %vm1019_vm3, %v4094_v54 }
 0x79e   : > { %5886 = vrsqrt.f32 %v4049_v45 }
 0x79f   : > { %v5881_v53 = vpop.eup %5880  ;;  %v4004_v63 = vsub.f32 %v3972_v27, %v3988_v14  ;;  %v4003_v22 = vsub.f32 %v3971_v39, %v3987_v57  ;;  %v4034_v27 = vsub.f32 %v7420_v30, %v7640_v46  ;;  %v8073_v46 = vld [vmem:[#allocation41_spill] sm:$0xff] }
 0x7a0   : > { %v5883_v8 = vpop.eup %5882  ;;  %v3850_v40 = vpop.xlane.xlu0 %3849  ;;  %v4080_v38 = vmul.f32 %v5881_v53, %v4032_v7 }
 0x7a1   : > { %v3847_v48 = vpop.xlane.xlu1 %3846  ;;  %v4020_v51 = vmax.f32 %v4004_v63, 0.0  ;;  %v4019_v19 = vmax.f32 %v4003_v22, 0.0  ;;  %v7674_v20 = vmul.f32 %v8070_v9, %v3850_v40  ;;  %v4079_v13 = vmul.f32 %v5883_v8, %v4031_v28 }
 0x7a2   : > { %v7677_v49 = vmul.f32 %v8071_v12, %v3847_v48  ;;  %v4096_v4 = vmul.f32 %v6233_v42, %v4080_v38  ;;  %v4033_v22 = vsub.f32 %v7425_v2, %v7643_v43 }
 0x7a3   : > { %v4052_v55 = vadd.f32 1e-05, %v4020_v51  ;;  %v4051_v3 = vadd.f32 1e-05, %v4019_v19  ;;  %v3990_v45 = vmul.f32 %v7674_v20, %v7674_v20  ;;  %v4095_v54 = vmul.f32 %v4079_v13, %v6235_v44  ;;  %v8072_v51 = vld [vmem:[#allocation42_spill] sm:$0xff] }
 0x7a4   : > { %v3930_v24 = vpop.xlane.xlu0 %3929  ;;  %v3989_v29 = vmul.f32 %v7677_v49, %v7677_v49 }
 0x7a5   : > { %v3927_v14 = vpop.xlane.xlu1 %3926  ;;  %5888 = vrsqrt.f32 %v4052_v55  ;;  %v3974_v11 = vmul.f32 %v8070_v9, %v3930_v24  ;;  %5356 = vmatprep.mubr.msk.f32.mxu0 %vm1019_vm3, %v4095_v54 }
 0x7a6   : > { %v3973_v57 = vmul.f32 %v8071_v12, %v3927_v14  ;;  %5890 = vrsqrt.f32 %v4051_v3  ;;  %5357 = vmatmul.mubr.msk.f32.gmra.mrb[64].mxu0 %vm1019_vm3, %v4096_v4 }
 0x7a7   : > { %v5885_v39 = vpop.eup %5884  ;;  %v4006_v7 = vsub.f32 %v3974_v11, %v3990_v45  ;;  %v4036_v11 = vsub.f32 %v7444_v31, %v7654_v1  ;;  %v8075_v1 = vld [vmem:[#allocation43_spill] sm:$0xff] }
 0x7a8   : > { %v4005_v53 = vsub.f32 %v3973_v57, %v3989_v29  ;;  %v5887_v63 = vpop.eup %5886  ;;  %v3856_v8 = vpop.xlane.xlu0 %3855  ;;  %v4082_v40 = vmul.f32 %v5885_v39, %v4034_v27 }
 0x7a9   : > { %v3853_v28 = vpop.xlane.xlu1 %3852  ;;  %v4022_v48 = vmax.f32 %v4006_v7, 0.0  ;;  %v7694_v19 = vmul.f32 %v8072_v51, %v3856_v8  ;;  %v4081_v12 = vmul.f32 %v5887_v63, %v4033_v22 }
 0x7aa   : > { %v4021_v38 = vmax.f32 %v4005_v53, 0.0  ;;  %v7697_v9 = vmul.f32 %v8073_v46, %v3853_v28  ;;  %v4098_v3 = vmul.f32 %v6248_v50, %v4082_v40  ;;  %v4035_v53 = vsub.f32 %v7449_v62, %v7657_v0 }
 0x7ab   : > { %v4054_v13 = vadd.f32 1e-05, %v4022_v48  ;;  %v3992_v4 = vmul.f32 %v7694_v19, %v7694_v19  ;;  %v4097_v45 = vmul.f32 %v4081_v12, %v6250_v52  ;;  %v8074_v48 = vld [vmem:[#allocation44_spill] sm:$0xff] }
 0x7ac   : > { %v4053_v55 = vadd.f32 1e-05, %v4021_v38  ;;  %v3936_v43 = vpop.xlane.xlu0 %3935  ;;  %v3991_v54 = vmul.f32 %v7697_v9, %v7697_v9 }
 0x7ad   : > { %v3933_v24 = vpop.xlane.xlu1 %3932  ;;  %5892 = vrsqrt.f32 %v4054_v13  ;;  %v3976_v14 = vmul.f32 %v8072_v51, %v3936_v43  ;;  %5359 = vmatprep.mubr.msk.f32.mxu0 %vm1019_vm3, %v4097_v45 }
 0x7ae   : > { %v3975_v29 = vmul.f32 %v8073_v46, %v3933_v24  ;;  %5894 = vrsqrt.f32 %v4053_v55  ;;  %5360 = vmatmul.mubr.msk.f32.gmra.mrb[66].mxu0 %vm1019_vm3, %v4098_v3 }
 0x7af   : > { %v5889_v57 = vpop.eup %5888  ;;  %v4008_v27 = vsub.f32 %v3976_v14, %v3992_v4  ;;  %v4038_v14 = vsub.f32 %v7467_v17, %v7674_v20  ;;  %v8077_v20 = vld [vmem:[#allocation45_spill] sm:$0xff] }
 0x7b0   : > { %v4007_v39 = vsub.f32 %v3975_v29, %v3991_v54  ;;  %v5891_v7 = vpop.eup %5890  ;;  %v3862_v63 = vpop.xlane.xlu0 %3861  ;;  %v4084_v8 = vmul.f32 %v5889_v57, %v4036_v11 }
 0x7b1   : > { %v3859_v22 = vpop.xlane.xlu1 %3858  ;;  %v4024_v28 = vmax.f32 %v4008_v27, 0.0  ;;  %v7714_v38 = vmul.f32 %v8074_v48, %v3862_v63  ;;  %v4083_v46 = vmul.f32 %v5891_v7, %v4035_v53 }
 0x7b2   : > { %v4023_v40 = vmax.f32 %v4007_v39, 0.0  ;;  %v7717_v51 = vmul.f32 %v8075_v1, %v3859_v22  ;;  %v4100_v55 = vmul.f32 %v6260_v59, %v4084_v8  ;;  %v4037_v39 = vsub.f32 %v7473_v32, %v7677_v49 }
 0x7b3   : > { %v4056_v12 = vadd.f32 1e-05, %v4024_v28  ;;  %v3994_v3 = vmul.f32 %v7714_v38, %v7714_v38  ;;  %v4099_v4 = vmul.f32 %v4083_v46, %v6262_v61  ;;  %v8076_v28 = vld [vmem:[#allocation46_spill] sm:$0xff] }
 0x7b4   : > { %v4055_v13 = vadd.f32 1e-05, %v4023_v40  ;;  %v3942_v0 = vpop.xlane.xlu0 %3941  ;;  %v3993_v45 = vmul.f32 %v7717_v51, %v7717_v51 }
 0x7b5   : > { %v3939_v43 = vpop.xlane.xlu1 %3938  ;;  %5896 = vrsqrt.f32 %v4056_v12  ;;  %v3978_v24 = vmul.f32 %v8074_v48, %v3942_v0  ;;  %5362 = vmatprep.mubr.msk.f32.mxu0 %vm1019_vm3, %v4099_v4 }
 0x7b6   : > { %v3977_v54 = vmul.f32 %v8075_v1, %v3939_v43  ;;  %5898 = vrsqrt.f32 %v4055_v13  ;;  %5363 = vmatmul.mubr.msk.f32.gmra.mrb[68].mxu0 %vm1019_vm3, %v4100_v55 }
 0x7b7   : > { %v5893_v29 = vpop.eup %5892  ;;  %v4010_v11 = vsub.f32 %v3978_v24, %v3994_v3  ;;  %v4040_v24 = vsub.f32 %v7492_v41, %v7694_v19 }
 0x7b8   : > { %v4009_v57 = vsub.f32 %v3977_v54, %v3993_v45  ;;  %v5895_v27 = vpop.eup %5894  ;;  %v3868_v7 = vpop.xlane.xlu0 %3867  ;;  %v4086_v63 = vmul.f32 %v5893_v29, %v4038_v14  ;;  %v4039_v14 = vsub.f32 %v7497_v60, %v7697_v9  ;;  %v4042_v9 = vsub.f32 %v7521_v16, %v7714_v38 }
 0x7b9   : > { %v3865_v53 = vpop.xlane.xlu1 %3864  ;;  %v4026_v22 = vmax.f32 %v4010_v11, 0.0  ;;  %v3964_v40 = vmul.f32 %v8076_v28, %v3868_v7  ;;  %v4085_v1 = vmul.f32 %v5895_v27, %v4037_v39 }
 0x7ba   : > { %v4025_v8 = vmax.f32 %v4009_v57, 0.0  ;;  %v3963_v48 = vmul.f32 %v8077_v20, %v3865_v53  ;;  %v4102_v13 = vmul.f32 %v8046_v25, %v4086_v63 }
 0x7bb   : > { %v4058_v46 = vadd.f32 1e-05, %v4026_v22  ;;  %v3996_v3 = vmul.f32 %v3964_v40, %v3964_v40  ;;  %v4101_v0 = vmul.f32 %v4085_v1, %v8047_v36 }
 0x7bc   : > { %v4057_v12 = vadd.f32 1e-05, %v4025_v8  ;;  %v3948_v55 = vpop.xlane.xlu0 %3947  ;;  %v3995_v49 = vmul.f32 %v3963_v48, %v3963_v48 }
 0x7bd   : > { %v3945_v4 = vpop.xlane.xlu1 %3944  ;;  %5900 = vrsqrt.f32 %v4058_v46  ;;  %v3980_v43 = vmul.f32 %v8076_v28, %v3948_v55  ;;  %5365 = vmatprep.mubr.msk.f32.mxu0 %vm1019_vm3, %v4101_v0  ;;  %v4044_v55 = vsub.f32 %v7558_v15, %v3964_v40  ;;  %v4043_v0 = vsub.f32 %v7563_v23, %v3963_v48  ;;  %v4345_v40 = vld [vmem:[%s7917_s12 + $0x70] sm:$0xff] }
 0x7be   : > { %v3979_v45 = vmul.f32 %v8077_v20, %v3945_v4  ;;  %5902 = vrsqrt.f32 %v4057_v12  ;;  %5366 = vmatmul.mubr.msk.f32.gmra.mrb[70].mxu0 %vm1019_vm3, %v4102_v13  ;;  %v4041_v20 = vsub.f32 %v7527_v21, %v7717_v51 }
 0x7bf   : > { %v5897_v54 = vpop.eup %5896  ;;  %v4012_v29 = vsub.f32 %v3980_v43, %v3996_v3 }
 0x7c0   : > { %v4011_v11 = vsub.f32 %v3979_v45, %v3995_v49  ;;  %v5899_v57 = vpop.eup %5898  ;;  %v4088_v27 = vmul.f32 %v5897_v54, %v4040_v24  ;;  %v4346_v24 = vld [vmem:[%s7917_s12 + $0x78] sm:$0xff]  ;;  %v4944_v54 = vld [vmem:[%s7916_s11] ss:$0 sm:$0xff] }
 0x7c1   : > { %v4028_v39 = vmax.f32 %v4012_v29, 0.0  ;;  %v4087_v53 = vmul.f32 %v5899_v57, %v4039_v14  ;;  %v5577_v48 = vpack.c.bf16 %v4346_v24, %v4345_v40 }
 0x7c2   : > { %v4027_v7 = vmax.f32 %v4011_v11, 0.0  ;;  %v4104_v63 = vmul.f32 %v8050_v58, %v4088_v27 }
 0x7c3   : > { %v4060_v22 = vadd.f32 1e-05, %v4028_v39  ;;  %v4103_v8 = vmul.f32 %v4087_v53, %v8051_v18  ;;  %5578 = vmatprep.subr.bf16.mxu1 %v5577_v48 }
 0x7c4   : > { %v4059_v19 = vadd.f32 1e-05, %v4027_v7  ;;  %5580 = vmatpush3.bf16.msra.mxu1 %v5577_v48 }
 0x7c5   : > { %5904 = vrsqrt.f32 %v4060_v22  ;;  %5368 = vmatprep.mubr.msk.f32.mxu0 %vm1019_vm3, %v4103_v8 }
 0x7c6   : > { %5906 = vrsqrt.f32 %v4059_v19  ;;  %5369 = vmatmul.mubr.msk.f32.gmra.mrb[72].mxu0 %vm1019_vm3, %v4104_v63 }
 0x7c7   : > { %v5901_v28 = vpop.eup %5900 }
 0x7c8   : > { %v5903_v1 = vpop.eup %5902  ;;  %v4090_v46 = vmul.f32 %v5901_v28, %v4042_v9 }
 0x7c9   : > { %v4089_v12 = vmul.f32 %v5903_v1, %v4041_v20 }
 0x7ca   : > { %v4106_v13 = vmul.f32 %v8054_v47, %v4090_v46 }
 0x7cb   : > { %v4105_v3 = vmul.f32 %v4089_v12, %v8055_v10 }
 0x7cd   : > { %5371 = vmatprep.mubr.msk.f32.mxu0 %vm1019_vm3, %v4105_v3 }
 0x7ce   : > { %5372 = vmatmul.mubr.msk.f32.gmra.mrb[74].mxu0 %vm1019_vm3, %v4106_v13 }
 0x7cf   : > { %v5905_v38 = vpop.eup %5904 }
 0x7d0   : > { %v5907_v4 = vpop.eup %5906  ;;  %v4092_v49 = vmul.f32 %v5905_v38, %v4044_v55 }
 0x7d1   : > { %v4091_v43 = vmul.f32 %v5907_v4, %v4043_v0 }
 0x7d2   : > { %v4108_v51 = vmul.f32 %v8058_v34, %v4092_v49 }
 0x7d3   : > { %v4107_v45 = vmul.f32 %v4091_v43, %v8059_v26 }
 0x7d5   : > { %5374 = vmatprep.mubr.msk.f32.mxu0 %vm1019_vm3, %v4107_v45 }
 0x7d6   : > { %5375 = vmatmul.mubr.msk.f32.gmra.mrb[76].mxu0 %vm1019_vm3, %v4108_v51 }
 0x870   : > { %v5355_v14 = vpop.f32.mrb[62].mxu0 }
 0x871   : > { %v4242_v29 = vadd.f32 %v5355_v14, %v4944_v54  ;;  %v4236_v11 = vpop.f32.mrb[63].mxu0 }
 0x872   : > { %v4237_v57 = vadd.f32 %v4944_v54, %v4236_v11 }
 0x873   : > { %v4316_v39 = vmax.f32 %v4242_v29, 0.0 }
 0x874   : > { %v4315_v27 = vmax.f32 %v4237_v57, 0.0 }
 0x876   : > { %5409 = vmatprep.mubr.f32.mxu1 %v4315_v27 }
 0x877   : > { %5410 = vmatmul.mubr.f32.vlgmr.msra.gmra.mrb[50].mxu1 %v4316_v39 }
 0x879   : > { %v5358_v7 = vpop.f32.mrb[64].mxu0 }
 0x87a   : > { %v4252_v53 = vadd.f32 %v5358_v7, %v4944_v54  ;;  %v4246_v63 = vpop.f32.mrb[65].mxu0 }
 0x87b   : > { %v4247_v22 = vadd.f32 %v4944_v54, %v4246_v63 }
 0x87c   : > { %v4318_v8 = vmax.f32 %v4252_v53, 0.0 }
 0x87d   : > { %v4317_v19 = vmax.f32 %v4247_v22, 0.0 }
 0x87f   : > { %5412 = vmatprep.mubr.f32.mxu1 %v4317_v19 }
 0x880   : > { %5413 = vmatmul.mubr.f32.gmra.mrb[52].mxu1 %v4318_v8 }
 0x881   : > { %v5361_v9 = vpop.f32.mrb[66].mxu0 }
 0x882   : > { %v4262_v28 = vadd.f32 %v5361_v9, %v4944_v54  ;;  %v4256_v20 = vpop.f32.mrb[67].mxu0 }
 0x883   : > { %v4257_v1 = vadd.f32 %v4944_v54, %v4256_v20 }
 0x884   : > { %v4320_v12 = vmax.f32 %v4262_v28, 0.0 }
 0x885   : > { %v4319_v46 = vmax.f32 %v4257_v1, 0.0 }
 0x887   : > { %5415 = vmatprep.mubr.f32.mxu1 %v4319_v46 }
 0x888   : > { %5416 = vmatmul.mubr.f32.gmra.mrb[54].mxu1 %v4320_v12  ;;  %v8078_v12 = vld [vmem:[#allocation5_spill] sm:$0xff] }
 0x889   : > { %v5364_v13 = vpop.f32.mrb[68].mxu0 }
 0x88a   : > { %v4272_v3 = vadd.f32 %v5364_v13, %v4944_v54  ;;  %v4266_v55 = vpop.f32.mrb[69].mxu0  ;;  %v4604_v13 = vrot.slane %v8078_v12, 4 }
 0x88b   : > { %v4267_v38 = vadd.f32 %v4944_v54, %v4266_v55 }
 0x88c   : > { %v4322_v4 = vmax.f32 %v4272_v3, 0.0  ;;  %v4605_v3 = vadd.f32 %v4604_v13, %v8078_v12 }
 0x88d   : > { %v4321_v0 = vmax.f32 %v4267_v38, 0.0  ;;  %v8079_v38 = vld [vmem:[#allocation6_spill] sm:$0xff] }
 0x88e   : > { %v4606_v55 = vrot.slane %v4605_v3, 2 }
 0x88f   : > { %5418 = vmatprep.mubr.f32.mxu1 %v4321_v0  ;;  %v4611_v0 = vrot.slane %v8079_v38, 4 }
 0x890   : > { %5419 = vmatmul.mubr.f32.gmra.mrb[56].mxu1 %v4322_v4  ;;  %v4607_v4 = vadd.f32 %v4606_v55, %v4605_v3 }
 0x891   : > { %v5367_v49 = vpop.f32.mrb[70].mxu0 }
 0x892   : > { %v4282_v43 = vadd.f32 %v5367_v49, %v4944_v54  ;;  %v4276_v51 = vpop.f32.mrb[71].mxu0  ;;  %v4612_v49 = vadd.f32 %v4611_v0, %v8079_v38 }
 0x893   : > { %v4277_v45 = vadd.f32 %v4944_v54, %v4276_v51 }
 0x894   : > { %v4324_v24 = vmax.f32 %v4282_v43, 0.0  ;;  %v7779_v43 = vld [vmem:[%s7918_s13] ss:$0 sm:$0xff] }
 0x895   : > { %v4323_v40 = vmax.f32 %v4277_v45, 0.0  ;;  %v4613_v45 = vrot.slane %v4612_v49, 2 }
 0x897   : > { %5421 = vmatprep.mubr.f32.mxu1 %v4323_v40 }
 0x898   : > { %5422 = vmatmul.mubr.f32.gmra.mrb[58].mxu1 %v4324_v24 }
 0x899   : > { %v5370_v48 = vpop.f32.mrb[72].mxu0 }
 0x89a   : > { %v4292_v14 = vadd.f32 %v5370_v48, %v4944_v54  ;;  %v4286_v29 = vpop.f32.mrb[73].mxu0  ;;  %v8080_v48 = vld [vmem:[#allocation7_spill] sm:$0xff] }
 0x89b   : > { %v4287_v11 = vadd.f32 %v4944_v54, %v4286_v29 }
 0x89c   : > { %v4326_v27 = vmax.f32 %v4292_v14, 0.0  ;;  %v4618_v14 = vrot.slane %v8080_v48, 4 }
 0x89d   : > { %v4325_v57 = vmax.f32 %v4287_v11, 0.0 }
 0x89f   : > { %5424 = vmatprep.mubr.f32.mxu1 %v4325_v57 }
 0x8a0   : > { %5425 = vmatmul.mubr.f32.gmra.mrb[60].mxu1 %v4326_v27 }
 0x8a1   : > { %v5373_v39 = vpop.f32.mrb[74].mxu0 }
 0x8a2   : > { %v4302_v7 = vadd.f32 %v5373_v39, %v4944_v54  ;;  %v4296_v53 = vpop.f32.mrb[75].mxu0  ;;  %v4614_v39 = vadd.f32 %v4613_v45, %v4612_v49 }
 0x8a3   : > { %v4297_v63 = vadd.f32 %v4944_v54, %v4296_v53  ;;  %v4619_v53 = vadd.f32 %v4618_v14, %v8080_v48 }
 0x8a4   : > { %v4328_v19 = vmax.f32 %v4302_v7, 0.0 }
 0x8a5   : > { %v4327_v22 = vmax.f32 %v4297_v63, 0.0 }
 0x8a7   : > { %5427 = vmatprep.mubr.f32.mxu1 %v4327_v22 }
 0x8a8   : > { %5428 = vmatmul.mubr.f32.gmra.mrb[62].mxu1 %v4328_v19 }
 0x8a9   : > { %v5376_v8 = vpop.f32.mrb[76].mxu0 }
 0x8aa   : > { %v4312_v9 = vadd.f32 %v5376_v8, %v4944_v54  ;;  %v4306_v28 = vpop.f32.mrb[77].mxu0 }
 0x8ab   : > { %v4307_v20 = vadd.f32 %v4944_v54, %v4306_v28  ;;  %v4608_v54 = vrot.slane %v4607_v4, 1 }
 0x8ac   : > { %v4330_v46 = vmax.f32 %v4312_v9, 0.0  ;;  %v4615_v9 = vrot.slane %v4614_v39, 1 }
 0x8ad   : > { %v4329_v1 = vmax.f32 %v4307_v20, 0.0  ;;  %v4609_v57 = vadd.f32 %v4608_v54, %v4607_v4  ;;  %v4620_v20 = vrot.slane %v4619_v53, 2 }
 0x8ae   : > { %v4616_v3 = vadd.f32 %v4615_v9, %v4614_v39 }
 0x8af   : > { %5430 = vmatprep.mubr.f32.mxu1 %v4329_v1  ;;  %v4659_v19 = vmax.f32 %v4609_v57, 1.0  ;;  %v8081_v1 = vld [vmem:[#allocation9_spill] sm:$0xff]  ;;  %v4621_v38 = vadd.f32 %v4620_v20, %v4619_v53 }
 0x8b0   : > { %5431 = vmatmul.mubr.f32.gmra.mrb[64].mxu1 %v4330_v46  ;;  %v4660_v45 = vmax.f32 %v4616_v3, 1.0 }
 0x8b1   : > { %5908 = vrcp.f32 %v4659_v19  ;;  %v4622_v48 = vrot.slane %v4621_v38, 1 }
 0x8b2   : > { %5910 = vrcp.f32 %v4660_v45 }
 0x8b3   : > { %v4623_v19 = vadd.f32 %v4622_v48, %v4621_v38 }
 0x8b5   : > { %v4661_v3 = vmax.f32 %v4623_v19, 1.0 }
 0x8b7   : > { %5912 = vrcp.f32 %v4661_v3 }
 0x94a   : > { %v5411_v51 = vpop.f32.mrb[50].mxu1 }
 0x94b   : > { %v4426_v40 = vadd.f32 %v5411_v51, %v7779_v43  ;;  %v4420_v24 = vpop.f32.mrb[51].mxu1 }
 0x94c   : > { %v4421_v29 = vadd.f32 %v7779_v43, %v4420_v24 }
 0x94d   : > { %v4500_v11 = vadd.f32 %v4426_v40, %v7376_v6  ;;  %v4625_v6 = vrot.slane %v8081_v1, 4 }
 0x94e   : > { %v4499_v27 = vadd.f32 %v4421_v29, %v7379_v56  ;;  %v8082_v29 = vld [vmem:[#allocation13_spill] sm:$0xff] }
 0x94f   : > { %v4516_v7 = vmul.f32 %v6223_v35, %v4500_v11  ;;  %v4626_v0 = vadd.f32 %v4625_v6, %v8081_v1  ;;  %v4632_v11 = vrot.slane %v8082_v29, 4 }
 0x950   : > { %v4515_v63 = vmul.f32 %v4499_v27, %v6225_v37 }
 0x951   : > { %v4532_v22 = vsel %vm1019_vm3, %v4516_v7, 0.0  ;;  %v4627_v14 = vrot.slane %v4626_v0, 2  ;;  %v4633_v9 = vadd.f32 %v4632_v11, %v8082_v29 }
 0x952   : > { %v4531_v8 = vsel %vm1019_vm3, %v4515_v63, 0.0 }
 0x953   : > { %v4533_v28 = vadd.f32 %v4532_v22, %v4531_v8  ;;  %v5414_v46 = vpop.f32.mrb[52].mxu1  ;;  %v5909_v22 = vpop.eup %5908  ;;  %v4628_v8 = vadd.f32 %v4627_v14, %v4626_v0 }
 0x954   : > { %v4436_v56 = vadd.f32 %v5414_v46, %v7779_v43  ;;  %v4430_v13 = vpop.f32.mrb[53].mxu1  ;;  %v8083_v46 = vld [vmem:[#allocation18_spill] sm:$0xff]  ;;  %v5911_v14 = vpop.eup %5910 }
 0x955   : > { %v4534_v12 = vrot.slane %v4533_v28, 4  ;;  %v4431_v35 = vadd.f32 %v7779_v43, %v4430_v13 }
 0x956   : > { %v4502_v55 = vadd.f32 %v4436_v56, %v7400_v5 }
 0x957   : > { %v4535_v37 = vadd.f32 %v4534_v12, %v4533_v28  ;;  %v4501_v4 = vadd.f32 %v4431_v35, %v7404_v33  ;;  %v4639_v12 = vrot.slane %v8083_v46, 4 }
 0x958   : > { %v4518_v54 = vmul.f32 %v6233_v42, %v4502_v55 }
 0x959   : > { %v4536_v49 = vrot.slane %v4535_v37, 2  ;;  %v4517_v51 = vmul.f32 %v4501_v4, %v6235_v44 }
 0x95a   : > { %v4541_v24 = vsel %vm1019_vm3, %v4518_v54, 0.0 }
 0x95b   : > { %v4537_v40 = vadd.f32 %v4536_v49, %v4535_v37  ;;  %v4540_v5 = vsel %vm1019_vm3, %v4517_v51, 0.0  ;;  %v5417_v57 = vpop.f32.mrb[54].mxu1  ;;  %v4634_v37 = vrot.slane %v4633_v9, 2 }
 0x95c   : > { %v4542_v39 = vadd.f32 %v4541_v24, %v4540_v5  ;;  %v4446_v33 = vadd.f32 %v5417_v57, %v7779_v43  ;;  %v4440_v7 = vpop.f32.mrb[55].mxu1 }
 0x95d   : > { %v4538_v27 = vrot.slane %v4537_v40, 1  ;;  %v4441_v42 = vadd.f32 %v7779_v43, %v4440_v7  ;;  %v4635_v24 = vadd.f32 %v4634_v37, %v4633_v9  ;;  %v5913_v37 = vpop.eup %5912 }
 0x95e   : > { %v4543_v53 = vrot.slane %v4542_v39, 4  ;;  %v4504_v63 = vadd.f32 %v4446_v33, %v7420_v30  ;;  %v4629_v30 = vrot.slane %v4628_v8, 1 }
 0x95f   : > { %v4539_v44 = vadd.f32 %v4538_v27, %v4537_v40  ;;  %v4503_v28 = vadd.f32 %v4441_v42, %v7425_v2  ;;  %v8084_v27 = vld [vmem:[#allocation22_spill] sm:$0xff] }
 0x960   : > { %v4544_v1 = vadd.f32 %v4543_v53, %v4542_v39  ;;  %v4520_v6 = vmul.f32 %v6248_v50, %v4504_v63  ;;  %v4640_v50 = vadd.f32 %v4639_v12, %v8083_v46  ;;  %v4630_v40 = vadd.f32 %v4629_v30, %v4628_v8 }
 0x961   : > { %v4668_v20 = vmul.f32 %v5909_v22, %v4539_v44  ;;  %v4519_v56 = vmul.f32 %v4503_v28, %v6250_v52  ;;  %v4646_v39 = vrot.slane %v8084_v27, 4  ;;  %v4636_v53 = vrot.slane %v4635_v24, 1 }
 0x962   : > { %v4545_v13 = vrot.slane %v4544_v1, 2  ;;  %v4550_v35 = vsel %vm1019_vm3, %v4520_v6, 0.0  ;;  %v4641_v57 = vrot.slane %v4640_v50, 2  ;;  %v4662_v44 = vmax.f32 %v4630_v40, 1.0 }
 0x963   : > { %v4549_v55 = vsel %vm1019_vm3, %v4519_v56, 0.0  ;;  %v5420_v38 = vpop.f32.mrb[56].mxu1  ;;  %v4637_v56 = vadd.f32 %v4636_v53, %v4635_v24 }
 0x964   : > { %v4546_v0 = vadd.f32 %v4545_v13, %v4544_v1  ;;  %v4551_v4 = vadd.f32 %v4550_v35, %v4549_v55  ;;  %v4456_v2 = vadd.f32 %v5420_v38, %v7779_v43  ;;  %v4450_v49 = vpop.f32.mrb[57].mxu1  ;;  %v4642_v28 = vadd.f32 %v4641_v57, %v4640_v50 }
 0x965   : > { %v4451_v54 = vadd.f32 %v7779_v43, %v4450_v49  ;;  %v4647_v1 = vadd.f32 %v4646_v39, %v8084_v27  ;;  %5914 = vrcp.f32 %v4662_v44 }
 0x966   : > { %v4547_v51 = vrot.slane %v4546_v0, 1  ;;  %v4552_v52 = vrot.slane %v4551_v4, 4  ;;  %v4506_v45 = vadd.f32 %v4456_v2, %v7444_v31  ;;  %v4643_v55 = vrot.slane %v4642_v28, 1 }
 0x967   : > { %v4505_v48 = vadd.f32 %v4451_v54, %v7449_v62  ;;  %v4663_v54 = vmax.f32 %v4637_v56, 1.0 }
 0x968   : > { %v4548_v29 = vadd.f32 %v4547_v51, %v4546_v0  ;;  %v4553_v11 = vadd.f32 %v4552_v52, %v4551_v4  ;;  %v4522_v5 = vmul.f32 %v6260_v59, %v4506_v45  ;;  %v8085_v0 = vld [vmem:[#allocation26_spill] sm:$0xff] }
 0x969   : > { %v4521_v33 = vmul.f32 %v4505_v48, %v6262_v61  ;;  %v4653_v4 = vrot.slane %v8085_v0, 4  ;;  %5916 = vrcp.f32 %v4663_v54 }
 0x96a   : > { %v4670_v7 = vmul.f32 %v5911_v14, %v4548_v29  ;;  %v4554_v42 = vrot.slane %v4553_v11, 2  ;;  %v4559_v31 = vsel %vm1019_vm3, %v4522_v5, 0.0 }
 0x96b   : > { %v4558_v63 = vsel %vm1019_vm3, %v4521_v33, 0.0  ;;  %v5423_v62 = vpop.f32.mrb[58].mxu1  ;;  %v4654_v29 = vadd.f32 %v4653_v4, %v8085_v0 }
 0x96c   : > { %v4555_v22 = vadd.f32 %v4554_v42, %v4553_v11  ;;  %v4560_v19 = vadd.f32 %v4559_v31, %v4558_v63  ;;  %v4466_v8 = vadd.f32 %v5423_v62, %v7779_v43  ;;  %v4460_v59 = vpop.f32.mrb[59].mxu1  ;;  %v4692_v9 = vsel %vm4691_vm7, %v4670_v7, %v4668_v20 }
 0x96d   : > { %v4461_v61 = vadd.f32 %v7779_v43, %v4460_v59  ;;  %v4648_v20 = vrot.slane %v4647_v1, 2 }
 0x96e   : > { %v4556_v6 = vrot.slane %v4555_v22, 1  ;;  %v4561_v46 = vrot.slane %v4560_v19, 4  ;;  %v4508_v12 = vadd.f32 %v4466_v8, %v7467_v17 }
 0x96f   : > { %v4507_v13 = vadd.f32 %v4461_v61, %v7473_v32  ;;  %v4649_v48 = vadd.f32 %v4648_v20, %v4647_v1  ;;  %v5915_v42 = vpop.eup %5914 }
 0x970   : > { %v4557_v35 = vadd.f32 %v4556_v6, %v4555_v22  ;;  %v4562_v3 = vadd.f32 %v4561_v46, %v4560_v19  ;;  %v4524_v30 = vmul.f32 %v8046_v25, %v4508_v12 }
 0x971   : > { %v4523_v38 = vmul.f32 %v4507_v13, %v8047_v36  ;;  %v4644_v36 = vadd.f32 %v4643_v55, %v4642_v28  ;;  %v4650_v44 = vrot.slane %v4649_v48, 1 }
 0x972   : > { %v4672_v2 = vmul.f32 %v5913_v37, %v4557_v35  ;;  %v4563_v49 = vrot.slane %v4562_v3, 2  ;;  %v4568_v17 = vsel %vm1019_vm3, %v4524_v30, 0.0 }
 0x973   : > { %v5426_v50 = vpop.f32.mrb[60].mxu1  ;;  %v4567_v32 = vsel %vm1019_vm3, %v4523_v38, 0.0  ;;  %v4664_v31 = vmax.f32 %v4644_v36, 1.0  ;;  %v4651_v61 = vadd.f32 %v4650_v44, %v4649_v48  ;;  %v5917_v30 = vpop.eup %5916 }
 0x974   : > { %v4476_v51 = vadd.f32 %v5426_v50, %v7779_v43  ;;  %v4470_v52 = vpop.f32.mrb[61].mxu1  ;;  %v4564_v25 = vadd.f32 %v4563_v49, %v4562_v3  ;;  %v4569_v45 = vadd.f32 %v4568_v17, %v4567_v32  ;;  %v4694_v24 = vsel %vm4693_vm9, %v4672_v2, %v4692_v9 }
 0x975   : > { %v4471_v40 = vadd.f32 %v7779_v43, %v4470_v52  ;;  %5918 = vrcp.f32 %v4664_v31  ;;  %v4665_v20 = vmax.f32 %v4651_v61, 1.0 }
 0x976   : > { %v4510_v14 = vadd.f32 %v4476_v51, %v7492_v41  ;;  %v4565_v11 = vrot.slane %v4564_v25, 1  ;;  %v4570_v5 = vrot.slane %v4569_v45, 4  ;;  %v4655_v41 = vrot.slane %v4654_v29, 2 }
 0x977   : > { %v4509_v57 = vadd.f32 %v4471_v40, %v7497_v60  ;;  %5920 = vrcp.f32 %v4665_v20 }
 0x978   : > { %v4526_v27 = vmul.f32 %v8050_v58, %v4510_v14  ;;  %v4566_v39 = vadd.f32 %v4565_v11, %v4564_v25  ;;  %v4571_v33 = vadd.f32 %v4570_v5, %v4569_v45  ;;  %v4656_v6 = vadd.f32 %v4655_v41, %v4654_v29 }
 0x979   : > { %v4525_v7 = vmul.f32 %v4509_v57, %v8051_v18 }
 0x97a   : > { %v4577_v53 = vsel %vm1019_vm3, %v4526_v27, 0.0  ;;  %v4674_v63 = vmul.f32 %v5915_v42, %v4566_v39  ;;  %v4572_v62 = vrot.slane %v4571_v33, 2  ;;  %v4657_v38 = vrot.slane %v4656_v6, 1 }
 0x97b   : > { %v4576_v22 = vsel %vm1019_vm3, %v4525_v7, 0.0  ;;  %v5429_v19 = vpop.f32.mrb[62].mxu1 }
 0x97c   : > { %v4578_v60 = vadd.f32 %v4577_v53, %v4576_v22  ;;  %v4486_v8 = vadd.f32 %v5429_v19, %v7779_v43  ;;  %v4480_v58 = vpop.f32.mrb[63].mxu1  ;;  %v4573_v59 = vadd.f32 %v4572_v62, %v4571_v33  ;;  %v4696_v18 = vsel %vm4695_vm10, %v4674_v63, %v4694_v24 }
 0x97d   : > { %v4481_v9 = vadd.f32 %v7779_v43, %v4480_v58  ;;  %v4658_v51 = vadd.f32 %v4657_v38, %v4656_v6 }
 0x97e   : > { %v4579_v28 = vrot.slane %v4578_v60, 4  ;;  %v4512_v1 = vadd.f32 %v4486_v8, %v7521_v16  ;;  %v4574_v46 = vrot.slane %v4573_v59, 1 }
 0x97f   : > { %v4511_v12 = vadd.f32 %v4481_v9, %v7527_v21  ;;  %v5919_v25 = vpop.eup %5918  ;;  %v4666_v29 = vmax.f32 %v4658_v51, 1.0 }
 0x980   : > { %v4580_v56 = vadd.f32 %v4579_v28, %v4578_v60  ;;  %v4528_v13 = vmul.f32 %v8054_v47, %v4512_v1  ;;  %v4575_v35 = vadd.f32 %v4574_v46, %v4573_v59 }
 0x981   : > { %v4527_v3 = vmul.f32 %v4511_v12, %v8055_v10  ;;  %5922 = vrcp.f32 %v4666_v29  ;;  %v5921_v33 = vpop.eup %5920 }
 0x982   : > { %v4581_v37 = vrot.slane %v4580_v56, 2  ;;  %v4586_v55 = vsel %vm1019_vm3, %v4528_v13, 0.0  ;;  %v4676_v0 = vmul.f32 %v5917_v30, %v4575_v35 }
 0x983   : > { %v4585_v16 = vsel %vm1019_vm3, %v4527_v3, 0.0  ;;  %v5432_v4 = vpop.f32.mrb[64].mxu1 }
 0x984   : > { %v4582_v2 = vadd.f32 %v4581_v37, %v4580_v56  ;;  %v4587_v49 = vadd.f32 %v4586_v55, %v4585_v16  ;;  %v4496_v21 = vadd.f32 %v5432_v4, %v7779_v43  ;;  %v4490_v17 = vpop.f32.mrb[65].mxu1  ;;  %v4698_v50 = vsel %vm4697_vm11, %v4676_v0, %v4696_v18 }
 0x985   : > { %v4491_v47 = vadd.f32 %v7779_v43, %v4490_v17 }
 0x986   : > { %v4583_v10 = vrot.slane %v4582_v2, 1  ;;  %v4588_v54 = vrot.slane %v4587_v49, 4  ;;  %v4514_v32 = vadd.f32 %v4496_v21, %v7558_v15 }
 0x987   : > { %v4513_v52 = vadd.f32 %v4491_v47, %v7563_v23 }
 0x988   : > { %v4584_v45 = vadd.f32 %v4583_v10, %v4582_v2  ;;  %v4589_v40 = vadd.f32 %v4588_v54, %v4587_v49  ;;  %v4530_v24 = vmul.f32 %v8058_v34, %v4514_v32 }
 0x989   : > { %v4529_v36 = vmul.f32 %v4513_v52, %v8059_v26 }
 0x98a   : > { %v4590_v48 = vrot.slane %v4589_v40, 2  ;;  %v4595_v43 = vsel %vm1019_vm3, %v4530_v24, 0.0  ;;  %v4678_v14 = vmul.f32 %v5919_v25, %v4584_v45 }
 0x98b   : > { %v4594_v15 = vsel %vm1019_vm3, %v4529_v36, 0.0  ;;  %v5923_v41 = vpop.eup %5922 }
 0x98c   : > { %v4591_v11 = vadd.f32 %v4590_v48, %v4589_v40  ;;  %v4596_v5 = vadd.f32 %v4595_v43, %v4594_v15  ;;  %v4700_v57 = vsel %vm4699_vm12, %v4678_v14, %v4698_v50 }
 0x98e   : > { %v4592_v23 = vrot.slane %v4591_v11, 1  ;;  %v4597_v27 = vrot.slane %v4596_v5, 4 }
 0x990   : > { %v4593_v39 = vadd.f32 %v4592_v23, %v4591_v11  ;;  %v4598_v34 = vadd.f32 %v4597_v27, %v4596_v5 }
 0x992   : > { %v4599_v26 = vrot.slane %v4598_v34, 2  ;;  %v4680_v7 = vmul.f32 %v5921_v33, %v4593_v39 }
 0x994   : > { %v4600_v42 = vadd.f32 %v4599_v26, %v4598_v34  ;;  %v4702_v31 = vsel %vm4701_vm13, %v4680_v7, %v4700_v57 }
 0x996   : > { %v4601_v44 = vrot.slane %v4600_v42, 1 }
 0x998   : > { %v4602_v53 = vadd.f32 %v4601_v44, %v4600_v42 }
 0x99a   : > { %v4682_v63 = vmul.f32 %v5923_v41, %v4602_v53 }
 0x99c   : > { %v4704_v62 = vsel %vm4703_vm14, %v4682_v63, %v4702_v31 }
 0x99d   : > { %4706 = vst.msk [vmem:[%s493_s1] sm:$0xff] %vm1019_vm3, %v4704_v62 }
 0x99e   : > { %5937 = shalt.err (!%p5934_p4)
}
 0x99f   : > { %s5938_s28 = scalar_lea.hbm %s7862_s21, 128  ;;  %s5942_s5 = scalar_lea.hbm %s7919_s14, 256 }
 0x9a0   : > { %p5939_p7 = scmp.ne.s32.totalorder %s7862_s21, %s5938_s28  ;;  %p5943_p10 = scmp.lt.u32.totalorder %s7862_s21, %s7919_s14 }
 0x9a1   : > { %p5944_p11 = scmp.lt.u32.totalorder %s5942_s5, %s5938_s28  ;;  %p5946_p13 = scmp.lt.u32.totalorder %s5938_s28, %s7862_s21 }
 0x9a2   : > { %p5940_p8 = pnand %p5939_p7, %p6106_p5 }
 0x9a3   : > { %p5945_p12 = por %p5944_p11, %p5943_p10 }
 0x9a4   : > { %p5941_p9 = pneg %p5940_p8 }
 0x9a5   : > { %p5947_p0 = por %p5946_p13, %p5945_p12 }
 0x9a7   : > { %p5948_p1 = pnand %p5947_p0, %p5941_p9 }
 0x9a9   : > { %5951 = shalt.err (!%p5948_p1)
}
 0x9aa   : > { %5583 = dma.vmem_to_hbm [thread:$0]  (%p6106_p5), %s7864_s4, 128, %s7862_s21, %s4708_s25  }
 0x9ab PF: > { %p5589_p2 = scmp.ge.s32.totalorder %s5986_s16, 2  ;;  %s4733_s17 = sand.u32 1, %s5974_s29  }
 0x9ac   : > { %s4734_s27 = scalar_lea.sflag [#allocation3], %s4733_s17 }
 0x9ad   : > { %p5586_p3 = pnand %p5589_p2, %p6110_p6 }
 0x9af   : > { %5969 = dma.done.wait (!%p5586_p3), %s4734_s27, 128  }
 0x9b0   : > { %5971 = vsyncadd (!%p5586_p3), %s4734_s27, 4294967168  ;;  %p24_p4 = scmp.ge.s32.totalorder %s6093_s19, 4   ;;  %s8086_s29 = smov %s5978_s30 }
 0x9b1   : > { %s8087_s30 = smov %s5982_s15  ;;  %s8088_s15 = smov %s6104_s22 }
 0x9b2   : > { %s8089_s16 = smov %s6093_s19  ;;  %26 = sbr.rel (!%p24_p4) target bundleno = 8 (0x8), region = 117 }
 0x9b9   :  { %4739 = vsyncpa [#allocation3], 1 }
 0x9ba   :  { %4741 = vsyncpa [#allocation3 + $0x1], 1 }

</bundles_post_ra>
